<compile_context>
chip_gen: v7x
topology: tpu7x:2x2x1
jax: 0.10.0
libtpu: 0.0.40
codegen_flags: <defaults>
</compile_context>

<pallas_src>
import functools

import jax
import jax.numpy as jnp
from jax.experimental import pallas as pl
from jax.experimental.pallas import tpu as pltpu


def _leff_kernel(x_ref, w1_ref, b1_ref, dww_ref, dwb_ref, w2_ref, b2_ref,
                 o_ref, pad_ref, *, hh, halo, chunk):
    bt, HW, _ = o_ref.shape
    hidden = w1_ref.shape[1]
    nchunks = HW // chunk
    R = pad_ref.shape[1]                       # = 2*halo + HW
    sub_aligned = (chunk % 8 == 0) and (halo % 8 == 0) and (hh % 8 == 0)

    def hint(i):                               # truthful sublane-alignment hint
        return pl.multiple_of(i, 8) if sub_aligned else i

    zt = halo + 8                              # top zero region   [0, zt)
    zb = halo + HW - 8                         # bottom zero region [zb, R)

    for b in range(bt):                        # static unroll over images
        # ---- zero ONLY the halo rows of the 3 staging slabs (the interior is
        #      fully overwritten below; never gate this on program_id) -------
        for s in range(3):
            pad_ref[3 * b + s, pl.ds(0, zt), :] = (
                jnp.zeros((zt, hidden), jnp.float32))
            pad_ref[3 * b + s, pl.ds(zb, R - zb), :] = (
                jnp.zeros((R - zb, hidden), jnp.float32))

        # ---- Pass A: linear1 + GELU, stage centre + two column-shifted
        #      (edge-masked) copies so every conv tap read is aligned --------
        def stage(c, carry):
            q0 = c * chunk
            xc = x_ref[b, pl.ds(hint(q0), chunk), :]            # (chunk, 128)
            h = jnp.dot(xc, w1_ref[...], preferred_element_type=jnp.float32)
            h = jax.nn.gelu(h + b1_ref[...], approximate=True)  # (chunk, hidden)
            # TODO(synk): PyTorch nn.GELU defaults to the exact erf form; the
            # tanh approximation is used here (and in the in-script reference).
            col = (jax.lax.broadcasted_iota(jnp.int32, (chunk, 1), 0) + q0) % hh
            # slab 1: identity copy, row q -> row halo+q (aligned store)
            pad_ref[3 * b + 1, pl.ds(hint(halo + q0), chunk), :] = h
            # slab 0: supplies h[p-1]; store at +1 offset, zero right edge
            pad_ref[3 * b + 0, pl.ds(halo + 1 + q0, chunk), :] = (
                jnp.where(col != hh - 1, h, 0.0))
            # slab 2: supplies h[p+1]; store at -1 offset, zero left edge
            pad_ref[3 * b + 2, pl.ds(halo - 1 + q0, chunk), :] = (
                jnp.where(col != 0, h, 0.0))
            return carry
        jax.lax.fori_loop(0, nchunks, stage, 0, unroll=True)

        # ---- Pass B: depthwise 3x3 conv (9 aligned tap reads) + GELU +
        #      linear2, one row-chunk at a time to bound vreg pressure -------
        def tail(c, carry):
            q0 = c * chunk
            acc = jnp.zeros((chunk, hidden), jnp.float32)
            for dy in range(3):
                for dx in range(3):
                    t = 3 * dy + dx
                    v = pad_ref[3 * b + dx,
                                pl.ds(hint(halo + (dy - 1) * hh + q0), chunk), :]
                    acc = acc + v * dww_ref[t:t + 1, :]
            h2 = jax.nn.gelu(acc + dwb_ref[...], approximate=True)
            y = jnp.dot(h2, w2_ref[...],
                        preferred_element_type=jnp.float32) + b2_ref[...]
            o_ref[b, pl.ds(hint(q0), chunk), :] = y.astype(o_ref.dtype)
            return carry
        jax.lax.fori_loop(0, nchunks, tail, 0, unroll=True)
        # TODO(synk): optional ECA branch (use_eca=True) is not implemented;
        # the module default (nn.Identity) is what this kernel computes.


def leff_forward(x, w1, b1, dw_w, dw_b, w2, b2, *, block_b=None, chunk=128):
    """LeFF forward.

    x: (B, HW, dim); w1: (dim, hidden); b1: (hidden,);
    dw_w: (hidden, 1, 3, 3) torch-layout depthwise weight; dw_b: (hidden,);
    w2: (hidden, dim); b2: (dim,).
    """
    B, HW, dim = x.shape
    hh = int(round(HW ** 0.5))
    assert hh * hh == HW, "token count must be a perfect square"
    hidden = w1.shape[1]

    lane = 128
    in_pad = -(-dim // lane) * lane                    # lane-dense input feats
    out_pad = -(-dim // lane) * lane                   # lane-dense output feats
    halo = max(8, -(-hh // 8) * 8)                     # aligned conv halo
    R = 2 * halo + HW
    if chunk > HW or HW % chunk != 0:
        chunk = HW

    # Images per grid step: amortize per-step overhead while keeping >= 4
    # steps when the batch allows it (v7x dual-TC pipelining).
    if block_b is None:
        block_b = max(1, min(8, B // 4))
    block_b = max(1, min(block_b, B))
    Bp = -(-B // block_b) * block_b

    # Lane-dense zero padding of batch / feature dims (wrapper-side, cheap).
    xp = jnp.pad(x, ((0, Bp - B), (0, 0), (0, in_pad - dim)))
    w1p = jnp.pad(w1, ((0, in_pad - dim), (0, 0)))
    w2p = jnp.pad(w2, ((0, 0), (0, out_pad - dim)))
    b2p = jnp.pad(b2, (0, out_pad - dim)).reshape(1, out_pad)
    b1r = b1.reshape(1, hidden)
    dwbr = dw_b.reshape(1, hidden)
    dwk = dw_w.reshape(hidden, 9).T                    # (9, hidden), t = 3*dy+dx

    kernel = functools.partial(_leff_kernel, hh=hh, halo=halo, chunk=chunk)

    # VMEM budget: double-buffered x/out blocks + per-image conv staging
    # scratch + resident weights; keep under the 64 MiB v7x physical VMEM.
    est_bytes = 4 * (2 * block_b * HW * (in_pad + out_pad)
                     + block_b * 3 * R * hidden
                     + 2 * (in_pad * hidden + hidden * out_pad
                            + 12 * hidden + out_pad))
    vmem_limit = int(min(max(2 * est_bytes, 32 * 1024 * 1024), 64 * 1024 * 1024))

    cost = pl.CostEstimate(
        flops=2 * B * HW * hidden * (2 * dim) + 18 * B * HW * hidden,
        transcendentals=2 * B * HW * hidden,
        bytes_accessed=4 * (Bp * HW * (in_pad + out_pad) + in_pad * hidden
                            + hidden * out_pad + 12 * hidden + out_pad),
    )

    out = pl.pallas_call(
        kernel,
        out_shape=jax.ShapeDtypeStruct((Bp, HW, out_pad), x.dtype),
        grid_spec=pltpu.PrefetchScalarGridSpec(
            num_scalar_prefetch=0,
            grid=(Bp // block_b,),
            in_specs=[
                pl.BlockSpec((block_b, HW, in_pad), lambda g: (g, 0, 0)),   # x
                pl.BlockSpec((in_pad, hidden), lambda g: (0, 0)),           # W1
                pl.BlockSpec((1, hidden), lambda g: (0, 0)),                # b1
                pl.BlockSpec((9, hidden), lambda g: (0, 0)),                # dw W
                pl.BlockSpec((1, hidden), lambda g: (0, 0)),                # dw b
                pl.BlockSpec((hidden, out_pad), lambda g: (0, 0)),          # W2
                pl.BlockSpec((1, out_pad), lambda g: (0, 0)),               # b2
            ],
            out_specs=pl.BlockSpec((block_b, HW, out_pad), lambda g: (g, 0, 0)),
            scratch_shapes=[
                pltpu.VMEM((block_b * 3, R, hidden), jnp.float32),  # conv slabs
            ],
        ),
        compiler_params=pltpu.CompilerParams(
            dimension_semantics=("parallel",),
            vmem_limit_bytes=vmem_limit),
        cost_estimate=cost,
    )(xp, w1p, b1r, dwk, dwbr, w2p, b2p)

    return out[:B, :, :dim]


# ---------------------------------------------------------------------------
# Pure-JAX reference of the LeFF forward pass (for correctness checking)
# ---------------------------------------------------------------------------
def leff_reference(x, w1, b1, dw_w_torch, dw_b, w2, b2):
    B, HW, dim = x.shape
    hh = int(round(HW ** 0.5))
    hidden = w1.shape[1]
    h = jax.nn.gelu(
        jnp.dot(x, w1, precision=jax.lax.Precision.HIGHEST) + b1[None, None, :],
        approximate=True)
    img = jnp.transpose(h.reshape(B, hh, hh, hidden), (0, 3, 1, 2))   # NCHW
    out = jax.lax.conv_general_dilated(
        img, dw_w_torch, window_strides=(1, 1), padding=((1, 1), (1, 1)),
        feature_group_count=hidden,
        dimension_numbers=("NCHW", "OIHW", "NCHW"),
        precision=jax.lax.Precision.HIGHEST)
    out = out + dw_b[None, :, None, None]
    out = jax.nn.gelu(out, approximate=True)
    out = jnp.transpose(out, (0, 2, 3, 1)).reshape(B, HW, hidden)
    return jnp.dot(out, w2, precision=jax.lax.Precision.HIGHEST) + b2[None, None, :]


if __name__ == "__main__":
    # Module defaults: dim=32, hidden_dim=128. Small spatial size hh=16 -> 256 tokens.
    B, hh, dim, hidden = 2, 16, 32, 128
    HW = hh * hh

    key = jax.random.PRNGKey(0)
    ks = jax.random.split(key, 7)

    x = jax.random.normal(ks[0], (B, HW, dim), dtype=jnp.float32)

    # Parameters (same shapes as the PyTorch module, linears pre-transposed
    # to (in, out) so y = x @ W + b; conv weight kept in torch OIHW layout).
    w1 = jax.random.normal(ks[1], (dim, hidden), jnp.float32) * 0.1
    b1 = jax.random.normal(ks[2], (hidden,), jnp.float32) * 0.1
    dw_w = jax.random.normal(ks[3], (hidden, 1, 3, 3), jnp.float32) * 0.1
    dw_b = jax.random.normal(ks[4], (hidden,), jnp.float32) * 0.1
    w2 = jax.random.normal(ks[5], (hidden, dim), jnp.float32) * 0.1
    b2 = jax.random.normal(ks[6], (dim,), jnp.float32) * 0.1

    out = leff_forward(x, w1, b1, dw_w, dw_b, w2, b2)
    out = jax.block_until_ready(out)

    ref = leff_reference(x, w1, b1, dw_w, dw_b, w2, b2)
    assert out.shape == (B, HW, dim)
    max_err = float(jnp.max(jnp.abs(out - ref)))
    assert jnp.allclose(out, ref, atol=1e-4, rtol=1e-4), f"mismatch: {max_err}"

    print("KERNEL_OK")
</pallas_src>

<mosaic_0001>
module attributes {stable_mosaic.version = 11 : i64} {
  func.func @_leff_kernel(%arg0: i32, %arg1: memref<1x256x128xf32, #tpu.memory_space<vmem>>, %arg2: memref<128x128xf32, #tpu.memory_space<vmem>>, %arg3: memref<1x128xf32, #tpu.memory_space<vmem>>, %arg4: memref<9x128xf32, #tpu.memory_space<vmem>>, %arg5: memref<1x128xf32, #tpu.memory_space<vmem>>, %arg6: memref<128x128xf32, #tpu.memory_space<vmem>>, %arg7: memref<1x128xf32, #tpu.memory_space<vmem>>, %arg8: memref<1x256x128xf32, #tpu.memory_space<vmem>>, %arg9: memref<3x288x128xf32, #tpu.memory_space<vmem>>) attributes {dimension_semantics = [#tpu.dimension_semantics<parallel>], iteration_bounds = array<i64: 2>, scalar_prefetch = 0 : i64, scratch_operands = 1 : i64, tpu.core_type = #tpu.core_type<tc>, window_params = [{transform_indices = @transform_0, window_bounds = array<i64: 1, 256, 128>}, {pipeline_mode = #tpu.pipeline_mode<synchronous>, transform_indices = @transform_1, window_bounds = array<i64: 128, 128>}, {pipeline_mode = #tpu.pipeline_mode<synchronous>, transform_indices = @transform_2, window_bounds = array<i64: 1, 128>}, {pipeline_mode = #tpu.pipeline_mode<synchronous>, transform_indices = @transform_3, window_bounds = array<i64: 9, 128>}, {pipeline_mode = #tpu.pipeline_mode<synchronous>, transform_indices = @transform_4, window_bounds = array<i64: 1, 128>}, {pipeline_mode = #tpu.pipeline_mode<synchronous>, transform_indices = @transform_5, window_bounds = array<i64: 128, 128>}, {pipeline_mode = #tpu.pipeline_mode<synchronous>, transform_indices = @transform_6, window_bounds = array<i64: 1, 128>}, {transform_indices = @transform_7, window_bounds = array<i64: 1, 256, 128>}]} {
    %cst = arith.constant 0.000000e+00 : f32
    %0 = vector.broadcast %cst : f32 to vector<24x128xf32>
    %c0 = arith.constant 0 : index
    %c0_0 = arith.constant 0 : index
    %c0_1 = arith.constant 0 : index
    %1 = vector.load %arg9[%c0, %c0_0, %c0_1] : memref<3x288x128xf32, #tpu.memory_space<vmem>>, vector<1x24x128xf32>
    %2 = vector.shape_cast %1 : vector<1x24x128xf32> to vector<24x128xf32>
    %3 = vector.shape_cast %0 : vector<24x128xf32> to vector<1x24x128xf32>
    tpu.vector_store %arg9[%c0, %c0_0, %c0_1], %3 {strides = array<i32>} : memref<3x288x128xf32, #tpu.memory_space<vmem>>, vector<1x24x128xf32>,
    %cst_2 = arith.constant 0.000000e+00 : f32
    %4 = vector.broadcast %cst_2 : f32 to vector<24x128xf32>
    %c0_3 = arith.constant 0 : index
    %c264 = arith.constant 264 : index
    %c0_4 = arith.constant 0 : index
    %5 = vector.load %arg9[%c0_3, %c264, %c0_4] : memref<3x288x128xf32, #tpu.memory_space<vmem>>, vector<1x24x128xf32>
    %6 = vector.shape_cast %5 : vector<1x24x128xf32> to vector<24x128xf32>
    %7 = vector.shape_cast %4 : vector<24x128xf32> to vector<1x24x128xf32>
    tpu.vector_store %arg9[%c0_3, %c264, %c0_4], %7 {strides = array<i32>} : memref<3x288x128xf32, #tpu.memory_space<vmem>>, vector<1x24x128xf32>,
    %cst_5 = arith.constant 0.000000e+00 : f32
    %8 = vector.broadcast %cst_5 : f32 to vector<24x128xf32>
    %c1 = arith.constant 1 : index
    %c0_6 = arith.constant 0 : index
    %c0_7 = arith.constant 0 : index
    %9 = vector.load %arg9[%c1, %c0_6, %c0_7] : memref<3x288x128xf32, #tpu.memory_space<vmem>>, vector<1x24x128xf32>
    %10 = vector.shape_cast %9 : vector<1x24x128xf32> to vector<24x128xf32>
    %11 = vector.shape_cast %8 : vector<24x128xf32> to vector<1x24x128xf32>
    tpu.vector_store %arg9[%c1, %c0_6, %c0_7], %11 {strides = array<i32>} : memref<3x288x128xf32, #tpu.memory_space<vmem>>, vector<1x24x128xf32>,
    %cst_8 = arith.constant 0.000000e+00 : f32
    %12 = vector.broadcast %cst_8 : f32 to vector<24x128xf32>
    %c1_9 = arith.constant 1 : index
    %c264_10 = arith.constant 264 : index
    %c0_11 = arith.constant 0 : index
    %13 = vector.load %arg9[%c1_9, %c264_10, %c0_11] : memref<3x288x128xf32, #tpu.memory_space<vmem>>, vector<1x24x128xf32>
    %14 = vector.shape_cast %13 : vector<1x24x128xf32> to vector<24x128xf32>
    %15 = vector.shape_cast %12 : vector<24x128xf32> to vector<1x24x128xf32>
    tpu.vector_store %arg9[%c1_9, %c264_10, %c0_11], %15 {strides = array<i32>} : memref<3x288x128xf32, #tpu.memory_space<vmem>>, vector<1x24x128xf32>,
    %cst_12 = arith.constant 0.000000e+00 : f32
    %16 = vector.broadcast %cst_12 : f32 to vector<24x128xf32>
    %c2 = arith.constant 2 : index
    %c0_13 = arith.constant 0 : index
    %c0_14 = arith.constant 0 : index
    %17 = vector.load %arg9[%c2, %c0_13, %c0_14] : memref<3x288x128xf32, #tpu.memory_space<vmem>>, vector<1x24x128xf32>
    %18 = vector.shape_cast %17 : vector<1x24x128xf32> to vector<24x128xf32>
    %19 = vector.shape_cast %16 : vector<24x128xf32> to vector<1x24x128xf32>
    tpu.vector_store %arg9[%c2, %c0_13, %c0_14], %19 {strides = array<i32>} : memref<3x288x128xf32, #tpu.memory_space<vmem>>, vector<1x24x128xf32>,
    %cst_15 = arith.constant 0.000000e+00 : f32
    %20 = vector.broadcast %cst_15 : f32 to vector<24x128xf32>
    %c2_16 = arith.constant 2 : index
    %c264_17 = arith.constant 264 : index
    %c0_18 = arith.constant 0 : index
    %21 = vector.load %arg9[%c2_16, %c264_17, %c0_18] : memref<3x288x128xf32, #tpu.memory_space<vmem>>, vector<1x24x128xf32>
    %22 = vector.shape_cast %21 : vector<1x24x128xf32> to vector<24x128xf32>
    %23 = vector.shape_cast %20 : vector<24x128xf32> to vector<1x24x128xf32>
    tpu.vector_store %arg9[%c2_16, %c264_17, %c0_18], %23 {strides = array<i32>} : memref<3x288x128xf32, #tpu.memory_space<vmem>>, vector<1x24x128xf32>,
    %c0_i32 = arith.constant 0 : i32
    %c128_i32 = arith.constant 128 : i32
    %24 = arith.muli %c0_i32, %c128_i32 : i32
    %25 = tpu.assume_multiple %24, 8 : i32
    %c0_19 = arith.constant 0 : index
    %26 = arith.index_cast %25 : i32 to index
    %c0_20 = arith.constant 0 : index
    %27 = vector.load %arg1[%c0_19, %26, %c0_20] : memref<1x256x128xf32, #tpu.memory_space<vmem>>, vector<1x128x128xf32>
    %28 = vector.shape_cast %27 : vector<1x128x128xf32> to vector<128x128xf32>
    %c0_21 = arith.constant 0 : index
    %c0_22 = arith.constant 0 : index
    %29 = vector.load %arg2[%c0_21, %c0_22] : memref<128x128xf32, #tpu.memory_space<vmem>>, vector<128x128xf32>
    %cst_23 = arith.constant dense<0.000000e+00> : vector<128x128xf32>
    %30 = tpu.matmul %28, %29, %cst_23 {dimension_numbers = #tpu.dot_dimension_numbers<[1], [0], [0], [1], [0, 0, 1, 1], [], []>} : vector<128x128xf32>, vector<128x128xf32>, vector<128x128xf32> -> vector<128x128xf32>
    %c0_24 = arith.constant 0 : index
    %c0_25 = arith.constant 0 : index
    %31 = vector.load %arg3[%c0_24, %c0_25] : memref<1x128xf32, #tpu.memory_space<vmem>>, vector<1x128xf32>
    %32 = vector.broadcast %31 : vector<1x128xf32> to vector<128x128xf32>
    %33 = arith.addf %30, %32 : vector<128x128xf32>
    %34 = arith.mulf %33, %33 : vector<128x128xf32>
    %35 = arith.mulf %33, %34 : vector<128x128xf32>
    %cst_26 = arith.constant 4.471500e-02 : f32
    %36 = vector.broadcast %cst_26 : f32 to vector<128x128xf32>
    %37 = arith.mulf %36, %35 : vector<128x128xf32>
    %38 = arith.addf %33, %37 : vector<128x128xf32>
    %cst_27 = arith.constant 0.797884583 : f32
    %39 = vector.broadcast %cst_27 : f32 to vector<128x128xf32>
    %40 = arith.mulf %39, %38 : vector<128x128xf32>
    %41 = math.tanh %40 : vector<128x128xf32>
    %cst_28 = arith.constant 1.000000e+00 : f32
    %42 = vector.broadcast %cst_28 : f32 to vector<128x128xf32>
    %43 = arith.addf %42, %41 : vector<128x128xf32>
    %cst_29 = arith.constant 5.000000e-01 : f32
    %44 = vector.broadcast %cst_29 : f32 to vector<128x128xf32>
    %45 = arith.mulf %44, %43 : vector<128x128xf32>
    %46 = arith.mulf %33, %45 : vector<128x128xf32>
    %47 = tpu.iota {dimensions = array<i32: 0>} : vector<128x1xi32>
    %48 = vector.broadcast %24 : i32 to vector<128x1xi32>
    %49 = arith.addi %47, %48 : vector<128x1xi32>
    %c16_i32 = arith.constant 16 : i32
    %c0_i32_30 = arith.constant 0 : i32
    %50 = arith.cmpi eq, %c16_i32, %c0_i32_30 : i32
    %c1_i32 = arith.constant 1 : i32
    %51 = arith.select %50, %c1_i32, %c16_i32 : i32
    %52 = vector.broadcast %51 : i32 to vector<128x1xi32>
    %53 = arith.remsi %49, %52 : vector<128x1xi32>
    %c0_i32_31 = arith.constant 0 : i32
    %54 = vector.broadcast %c0_i32_31 : i32 to vector<128x1xi32>
    %55 = arith.cmpi ne, %53, %54 : vector<128x1xi32>
    %c0_i32_32 = arith.constant 0 : i32
    %56 = vector.broadcast %c0_i32_32 : i32 to vector<128x1xi32>
    %57 = arith.cmpi slt, %53, %56 : vector<128x1xi32>
    %c0_i32_33 = arith.constant 0 : i32
    %58 = arith.cmpi slt, %51, %c0_i32_33 : i32
    %59 = vector.broadcast %58 : i1 to vector<128x1xi1>
    %60 = vector.broadcast %59 : vector<128x1xi1> to vector<128x1xi1>
    %61 = arith.xori %57, %60 : vector<128x1xi1>
    %62 = arith.andi %61, %55 : vector<128x1xi1>
    %63 = vector.broadcast %51 : i32 to vector<128x1xi32>
    %64 = arith.addi %53, %63 : vector<128x1xi32>
    %65 = arith.select %62, %64, %53 : vector<128x1xi1>, vector<128x1xi32>
    %c16_i32_34 = arith.constant 16 : i32
    %66 = arith.addi %c16_i32_34, %24 : i32
    %67 = tpu.assume_multiple %66, 8 : i32
    %c1_35 = arith.constant 1 : index
    %68 = arith.index_cast %67 : i32 to index
    %c0_36 = arith.constant 0 : index
    %69 = vector.load %arg9[%c1_35, %68, %c0_36] : memref<3x288x128xf32, #tpu.memory_space<vmem>>, vector<1x128x128xf32>
    %70 = vector.shape_cast %69 : vector<1x128x128xf32> to vector<128x128xf32>
    %71 = vector.shape_cast %46 : vector<128x128xf32> to vector<1x128x128xf32>
    tpu.vector_store %arg9[%c1_35, %68, %c0_36], %71 {strides = array<i32>} : memref<3x288x128xf32, #tpu.memory_space<vmem>>, vector<1x128x128xf32>,
    %c15_i32 = arith.constant 15 : i32
    %72 = vector.broadcast %c15_i32 : i32 to vector<128x1xi32>
    %73 = arith.cmpi ne, %65, %72 : vector<128x1xi32>
    %cst_37 = arith.constant 0.000000e+00 : f32
    %74 = vector.shape_cast %73 : vector<128x1xi1> to vector<128x1xi1>
    %75 = vector.broadcast %74 : vector<128x1xi1> to vector<128x128xi1>
    %76 = vector.broadcast %cst_37 : f32 to vector<128x128xf32>
    %77 = arith.select %75, %46, %76 : vector<128x128xi1>, vector<128x128xf32>
    %c17_i32 = arith.constant 17 : i32
    %78 = arith.addi %c17_i32, %24 : i32
    %c0_38 = arith.constant 0 : index
    %79 = arith.index_cast %78 : i32 to index
    %c0_39 = arith.constant 0 : index
    %80 = vector.load %arg9[%c0_38, %79, %c0_39] : memref<3x288x128xf32, #tpu.memory_space<vmem>>, vector<1x128x128xf32>
    %81 = vector.shape_cast %80 : vector<1x128x128xf32> to vector<128x128xf32>
    %82 = vector.shape_cast %77 : vector<128x128xf32> to vector<1x128x128xf32>
    tpu.vector_store %arg9[%c0_38, %79, %c0_39], %82 {strides = array<i32>} : memref<3x288x128xf32, #tpu.memory_space<vmem>>, vector<1x128x128xf32>,
    %c0_i32_40 = arith.constant 0 : i32
    %83 = vector.broadcast %c0_i32_40 : i32 to vector<128x1xi32>
    %84 = arith.cmpi ne, %65, %83 : vector<128x1xi32>
    %cst_41 = arith.constant 0.000000e+00 : f32
    %85 = vector.shape_cast %84 : vector<128x1xi1> to vector<128x1xi1>
    %86 = vector.broadcast %85 : vector<128x1xi1> to vector<128x128xi1>
    %87 = vector.broadcast %cst_41 : f32 to vector<128x128xf32>
    %88 = arith.select %86, %46, %87 : vector<128x128xi1>, vector<128x128xf32>
    %c15_i32_42 = arith.constant 15 : i32
    %89 = arith.addi %c15_i32_42, %24 : i32
    %c2_43 = arith.constant 2 : index
    %90 = arith.index_cast %89 : i32 to index
    %c0_44 = arith.constant 0 : index
    %91 = vector.load %arg9[%c2_43, %90, %c0_44] : memref<3x288x128xf32, #tpu.memory_space<vmem>>, vector<1x128x128xf32>
    %92 = vector.shape_cast %91 : vector<1x128x128xf32> to vector<128x128xf32>
    %93 = vector.shape_cast %88 : vector<128x128xf32> to vector<1x128x128xf32>
    tpu.vector_store %arg9[%c2_43, %90, %c0_44], %93 {strides = array<i32>} : memref<3x288x128xf32, #tpu.memory_space<vmem>>, vector<1x128x128xf32>,
    %c1_i32_45 = arith.constant 1 : i32
    %c128_i32_46 = arith.constant 128 : i32
    %94 = arith.muli %c1_i32_45, %c128_i32_46 : i32
    %95 = tpu.assume_multiple %94, 8 : i32
    %c0_47 = arith.constant 0 : index
    %96 = arith.index_cast %95 : i32 to index
    %c0_48 = arith.constant 0 : index
    %97 = vector.load %arg1[%c0_47, %96, %c0_48] : memref<1x256x128xf32, #tpu.memory_space<vmem>>, vector<1x128x128xf32>
    %98 = vector.shape_cast %97 : vector<1x128x128xf32> to vector<128x128xf32>
    %c0_49 = arith.constant 0 : index
    %c0_50 = arith.constant 0 : index
    %99 = vector.load %arg2[%c0_49, %c0_50] : memref<128x128xf32, #tpu.memory_space<vmem>>, vector<128x128xf32>
    %cst_51 = arith.constant dense<0.000000e+00> : vector<128x128xf32>
    %100 = tpu.matmul %98, %99, %cst_51 {dimension_numbers = #tpu.dot_dimension_numbers<[1], [0], [0], [1], [0, 0, 1, 1], [], []>} : vector<128x128xf32>, vector<128x128xf32>, vector<128x128xf32> -> vector<128x128xf32>
    %c0_52 = arith.constant 0 : index
    %c0_53 = arith.constant 0 : index
    %101 = vector.load %arg3[%c0_52, %c0_53] : memref<1x128xf32, #tpu.memory_space<vmem>>, vector<1x128xf32>
    %102 = vector.broadcast %101 : vector<1x128xf32> to vector<128x128xf32>
    %103 = arith.addf %100, %102 : vector<128x128xf32>
    %104 = arith.mulf %103, %103 : vector<128x128xf32>
    %105 = arith.mulf %103, %104 : vector<128x128xf32>
    %cst_54 = arith.constant 4.471500e-02 : f32
    %106 = vector.broadcast %cst_54 : f32 to vector<128x128xf32>
    %107 = arith.mulf %106, %105 : vector<128x128xf32>
    %108 = arith.addf %103, %107 : vector<128x128xf32>
    %cst_55 = arith.constant 0.797884583 : f32
    %109 = vector.broadcast %cst_55 : f32 to vector<128x128xf32>
    %110 = arith.mulf %109, %108 : vector<128x128xf32>
    %111 = math.tanh %110 : vector<128x128xf32>
    %cst_56 = arith.constant 1.000000e+00 : f32
    %112 = vector.broadcast %cst_56 : f32 to vector<128x128xf32>
    %113 = arith.addf %112, %111 : vector<128x128xf32>
    %cst_57 = arith.constant 5.000000e-01 : f32
    %114 = vector.broadcast %cst_57 : f32 to vector<128x128xf32>
    %115 = arith.mulf %114, %113 : vector<128x128xf32>
    %116 = arith.mulf %103, %115 : vector<128x128xf32>
    %117 = tpu.iota {dimensions = array<i32: 0>} : vector<128x1xi32>
    %118 = vector.broadcast %94 : i32 to vector<128x1xi32>
    %119 = arith.addi %117, %118 : vector<128x1xi32>
    %c16_i32_58 = arith.constant 16 : i32
    %c0_i32_59 = arith.constant 0 : i32
    %120 = arith.cmpi eq, %c16_i32_58, %c0_i32_59 : i32
    %c1_i32_60 = arith.constant 1 : i32
    %121 = arith.select %120, %c1_i32_60, %c16_i32_58 : i32
    %122 = vector.broadcast %121 : i32 to vector<128x1xi32>
    %123 = arith.remsi %119, %122 : vector<128x1xi32>
    %c0_i32_61 = arith.constant 0 : i32
    %124 = vector.broadcast %c0_i32_61 : i32 to vector<128x1xi32>
    %125 = arith.cmpi ne, %123, %124 : vector<128x1xi32>
    %c0_i32_62 = arith.constant 0 : i32
    %126 = vector.broadcast %c0_i32_62 : i32 to vector<128x1xi32>
    %127 = arith.cmpi slt, %123, %126 : vector<128x1xi32>
    %c0_i32_63 = arith.constant 0 : i32
    %128 = arith.cmpi slt, %121, %c0_i32_63 : i32
    %129 = vector.broadcast %128 : i1 to vector<128x1xi1>
    %130 = vector.broadcast %129 : vector<128x1xi1> to vector<128x1xi1>
    %131 = arith.xori %127, %130 : vector<128x1xi1>
    %132 = arith.andi %131, %125 : vector<128x1xi1>
    %133 = vector.broadcast %121 : i32 to vector<128x1xi32>
    %134 = arith.addi %123, %133 : vector<128x1xi32>
    %135 = arith.select %132, %134, %123 : vector<128x1xi1>, vector<128x1xi32>
    %c16_i32_64 = arith.constant 16 : i32
    %136 = arith.addi %c16_i32_64, %94 : i32
    %137 = tpu.assume_multiple %136, 8 : i32
    %c1_65 = arith.constant 1 : index
    %138 = arith.index_cast %137 : i32 to index
    %c0_66 = arith.constant 0 : index
    %139 = vector.load %arg9[%c1_65, %138, %c0_66] : memref<3x288x128xf32, #tpu.memory_space<vmem>>, vector<1x128x128xf32>
    %140 = vector.shape_cast %139 : vector<1x128x128xf32> to vector<128x128xf32>
    %141 = vector.shape_cast %116 : vector<128x128xf32> to vector<1x128x128xf32>
    tpu.vector_store %arg9[%c1_65, %138, %c0_66], %141 {strides = array<i32>} : memref<3x288x128xf32, #tpu.memory_space<vmem>>, vector<1x128x128xf32>,
    %c15_i32_67 = arith.constant 15 : i32
    %142 = vector.broadcast %c15_i32_67 : i32 to vector<128x1xi32>
    %143 = arith.cmpi ne, %135, %142 : vector<128x1xi32>
    %cst_68 = arith.constant 0.000000e+00 : f32
    %144 = vector.shape_cast %143 : vector<128x1xi1> to vector<128x1xi1>
    %145 = vector.broadcast %144 : vector<128x1xi1> to vector<128x128xi1>
    %146 = vector.broadcast %cst_68 : f32 to vector<128x128xf32>
    %147 = arith.select %145, %116, %146 : vector<128x128xi1>, vector<128x128xf32>
    %c17_i32_69 = arith.constant 17 : i32
    %148 = arith.addi %c17_i32_69, %94 : i32
    %c0_70 = arith.constant 0 : index
    %149 = arith.index_cast %148 : i32 to index
    %c0_71 = arith.constant 0 : index
    %150 = vector.load %arg9[%c0_70, %149, %c0_71] : memref<3x288x128xf32, #tpu.memory_space<vmem>>, vector<1x128x128xf32>
    %151 = vector.shape_cast %150 : vector<1x128x128xf32> to vector<128x128xf32>
    %152 = vector.shape_cast %147 : vector<128x128xf32> to vector<1x128x128xf32>
    tpu.vector_store %arg9[%c0_70, %149, %c0_71], %152 {strides = array<i32>} : memref<3x288x128xf32, #tpu.memory_space<vmem>>, vector<1x128x128xf32>,
    %c0_i32_72 = arith.constant 0 : i32
    %153 = vector.broadcast %c0_i32_72 : i32 to vector<128x1xi32>
    %154 = arith.cmpi ne, %135, %153 : vector<128x1xi32>
    %cst_73 = arith.constant 0.000000e+00 : f32
    %155 = vector.shape_cast %154 : vector<128x1xi1> to vector<128x1xi1>
    %156 = vector.broadcast %155 : vector<128x1xi1> to vector<128x128xi1>
    %157 = vector.broadcast %cst_73 : f32 to vector<128x128xf32>
    %158 = arith.select %156, %116, %157 : vector<128x128xi1>, vector<128x128xf32>
    %c15_i32_74 = arith.constant 15 : i32
    %159 = arith.addi %c15_i32_74, %94 : i32
    %c2_75 = arith.constant 2 : index
    %160 = arith.index_cast %159 : i32 to index
    %c0_76 = arith.constant 0 : index
    %161 = vector.load %arg9[%c2_75, %160, %c0_76] : memref<3x288x128xf32, #tpu.memory_space<vmem>>, vector<1x128x128xf32>
    %162 = vector.shape_cast %161 : vector<1x128x128xf32> to vector<128x128xf32>
    %163 = vector.shape_cast %158 : vector<128x128xf32> to vector<1x128x128xf32>
    tpu.vector_store %arg9[%c2_75, %160, %c0_76], %163 {strides = array<i32>} : memref<3x288x128xf32, #tpu.memory_space<vmem>>, vector<1x128x128xf32>,
    %c2_i32 = arith.constant 2 : i32
    %c0_i32_77 = arith.constant 0 : i32
    %c128_i32_78 = arith.constant 128 : i32
    %164 = arith.muli %c0_i32_77, %c128_i32_78 : i32
    %cst_79 = arith.constant 0.000000e+00 : f32
    %165 = vector.broadcast %cst_79 : f32 to vector<128x128xf32>
    %c0_i32_80 = arith.constant 0 : i32
    %166 = arith.addi %c0_i32_80, %164 : i32
    %167 = tpu.assume_multiple %166, 8 : i32
    %c0_81 = arith.constant 0 : index
    %168 = arith.index_cast %167 : i32 to index
    %c0_82 = arith.constant 0 : index
    %169 = vector.load %arg9[%c0_81, %168, %c0_82] : memref<3x288x128xf32, #tpu.memory_space<vmem>>, vector<1x128x128xf32>
    %170 = vector.shape_cast %169 : vector<1x128x128xf32> to vector<128x128xf32>
    %c0_83 = arith.constant 0 : index
    %c0_84 = arith.constant 0 : index
    %171 = vector.load %arg4[%c0_83, %c0_84] : memref<9x128xf32, #tpu.memory_space<vmem>>, vector<1x128xf32>
    %172 = vector.broadcast %171 : vector<1x128xf32> to vector<128x128xf32>
    %173 = arith.mulf %170, %172 : vector<128x128xf32>
    %174 = arith.addf %165, %173 : vector<128x128xf32>
    %c0_i32_85 = arith.constant 0 : i32
    %175 = arith.addi %c0_i32_85, %164 : i32
    %176 = tpu.assume_multiple %175, 8 : i32
    %c1_86 = arith.constant 1 : index
    %177 = arith.index_cast %176 : i32 to index
    %c0_87 = arith.constant 0 : index
    %178 = vector.load %arg9[%c1_86, %177, %c0_87] : memref<3x288x128xf32, #tpu.memory_space<vmem>>, vector<1x128x128xf32>
    %179 = vector.shape_cast %178 : vector<1x128x128xf32> to vector<128x128xf32>
    %c1_88 = arith.constant 1 : index
    %c0_89 = arith.constant 0 : index
    %180 = vector.load %arg4[%c1_88, %c0_89] : memref<9x128xf32, #tpu.memory_space<vmem>>, vector<1x128xf32>
    %181 = vector.broadcast %180 : vector<1x128xf32> to vector<128x128xf32>
    %182 = arith.mulf %179, %181 : vector<128x128xf32>
    %183 = arith.addf %174, %182 : vector<128x128xf32>
    %c0_i32_90 = arith.constant 0 : i32
    %184 = arith.addi %c0_i32_90, %164 : i32
    %185 = tpu.assume_multiple %184, 8 : i32
    %c2_91 = arith.constant 2 : index
    %186 = arith.index_cast %185 : i32 to index
    %c0_92 = arith.constant 0 : index
    %187 = vector.load %arg9[%c2_91, %186, %c0_92] : memref<3x288x128xf32, #tpu.memory_space<vmem>>, vector<1x128x128xf32>
    %188 = vector.shape_cast %187 : vector<1x128x128xf32> to vector<128x128xf32>
    %c2_93 = arith.constant 2 : index
    %c0_94 = arith.constant 0 : index
    %189 = vector.load %arg4[%c2_93, %c0_94] : memref<9x128xf32, #tpu.memory_space<vmem>>, vector<1x128xf32>
    %190 = vector.broadcast %189 : vector<1x128xf32> to vector<128x128xf32>
    %191 = arith.mulf %188, %190 : vector<128x128xf32>
    %192 = arith.addf %183, %191 : vector<128x128xf32>
    %c16_i32_95 = arith.constant 16 : i32
    %193 = arith.addi %c16_i32_95, %164 : i32
    %194 = tpu.assume_multiple %193, 8 : i32
    %c0_96 = arith.constant 0 : index
    %195 = arith.index_cast %194 : i32 to index
    %c0_97 = arith.constant 0 : index
    %196 = vector.load %arg9[%c0_96, %195, %c0_97] : memref<3x288x128xf32, #tpu.memory_space<vmem>>, vector<1x128x128xf32>
    %197 = vector.shape_cast %196 : vector<1x128x128xf32> to vector<128x128xf32>
    %c3 = arith.constant 3 : index
    %c0_98 = arith.constant 0 : index
    %198 = vector.load %arg4[%c3, %c0_98] : memref<9x128xf32, #tpu.memory_space<vmem>>, vector<1x128xf32>
    %199 = vector.broadcast %198 : vector<1x128xf32> to vector<128x128xf32>
    %200 = arith.mulf %197, %199 : vector<128x128xf32>
    %201 = arith.addf %192, %200 : vector<128x128xf32>
    %c16_i32_99 = arith.constant 16 : i32
    %202 = arith.addi %c16_i32_99, %164 : i32
    %203 = tpu.assume_multiple %202, 8 : i32
    %c1_100 = arith.constant 1 : index
    %204 = arith.index_cast %203 : i32 to index
    %c0_101 = arith.constant 0 : index
    %205 = vector.load %arg9[%c1_100, %204, %c0_101] : memref<3x288x128xf32, #tpu.memory_space<vmem>>, vector<1x128x128xf32>
    %206 = vector.shape_cast %205 : vector<1x128x128xf32> to vector<128x128xf32>
    %c4 = arith.constant 4 : index
    %c0_102 = arith.constant 0 : index
    %207 = vector.load %arg4[%c4, %c0_102] : memref<9x128xf32, #tpu.memory_space<vmem>>, vector<1x128xf32>
    %208 = vector.broadcast %207 : vector<1x128xf32> to vector<128x128xf32>
    %209 = arith.mulf %206, %208 : vector<128x128xf32>
    %210 = arith.addf %201, %209 : vector<128x128xf32>
    %c16_i32_103 = arith.constant 16 : i32
    %211 = arith.addi %c16_i32_103, %164 : i32
    %212 = tpu.assume_multiple %211, 8 : i32
    %c2_104 = arith.constant 2 : index
    %213 = arith.index_cast %212 : i32 to index
    %c0_105 = arith.constant 0 : index
    %214 = vector.load %arg9[%c2_104, %213, %c0_105] : memref<3x288x128xf32, #tpu.memory_space<vmem>>, vector<1x128x128xf32>
    %215 = vector.shape_cast %214 : vector<1x128x128xf32> to vector<128x128xf32>
    %c5 = arith.constant 5 : index
    %c0_106 = arith.constant 0 : index
    %216 = vector.load %arg4[%c5, %c0_106] : memref<9x128xf32, #tpu.memory_space<vmem>>, vector<1x128xf32>
    %217 = vector.broadcast %216 : vector<1x128xf32> to vector<128x128xf32>
    %218 = arith.mulf %215, %217 : vector<128x128xf32>
    %219 = arith.addf %210, %218 : vector<128x128xf32>
    %c32_i32 = arith.constant 32 : i32
    %220 = arith.addi %c32_i32, %164 : i32
    %221 = tpu.assume_multiple %220, 8 : i32
    %c0_107 = arith.constant 0 : index
    %222 = arith.index_cast %221 : i32 to index
    %c0_108 = arith.constant 0 : index
    %223 = vector.load %arg9[%c0_107, %222, %c0_108] : memref<3x288x128xf32, #tpu.memory_space<vmem>>, vector<1x128x128xf32>
    %224 = vector.shape_cast %223 : vector<1x128x128xf32> to vector<128x128xf32>
    %c6 = arith.constant 6 : index
    %c0_109 = arith.constant 0 : index
    %225 = vector.load %arg4[%c6, %c0_109] : memref<9x128xf32, #tpu.memory_space<vmem>>, vector<1x128xf32>
    %226 = vector.broadcast %225 : vector<1x128xf32> to vector<128x128xf32>
    %227 = arith.mulf %224, %226 : vector<128x128xf32>
    %228 = arith.addf %219, %227 : vector<128x128xf32>
    %c32_i32_110 = arith.constant 32 : i32
    %229 = arith.addi %c32_i32_110, %164 : i32
    %230 = tpu.assume_multiple %229, 8 : i32
    %c1_111 = arith.constant 1 : index
    %231 = arith.index_cast %230 : i32 to index
    %c0_112 = arith.constant 0 : index
    %232 = vector.load %arg9[%c1_111, %231, %c0_112] : memref<3x288x128xf32, #tpu.memory_space<vmem>>, vector<1x128x128xf32>
    %233 = vector.shape_cast %232 : vector<1x128x128xf32> to vector<128x128xf32>
    %c7 = arith.constant 7 : index
    %c0_113 = arith.constant 0 : index
    %234 = vector.load %arg4[%c7, %c0_113] : memref<9x128xf32, #tpu.memory_space<vmem>>, vector<1x128xf32>
    %235 = vector.broadcast %234 : vector<1x128xf32> to vector<128x128xf32>
    %236 = arith.mulf %233, %235 : vector<128x128xf32>
    %237 = arith.addf %228, %236 : vector<128x128xf32>
    %c32_i32_114 = arith.constant 32 : i32
    %238 = arith.addi %c32_i32_114, %164 : i32
    %239 = tpu.assume_multiple %238, 8 : i32
    %c2_115 = arith.constant 2 : index
    %240 = arith.index_cast %239 : i32 to index
    %c0_116 = arith.constant 0 : index
    %241 = vector.load %arg9[%c2_115, %240, %c0_116] : memref<3x288x128xf32, #tpu.memory_space<vmem>>, vector<1x128x128xf32>
    %242 = vector.shape_cast %241 : vector<1x128x128xf32> to vector<128x128xf32>
    %c8 = arith.constant 8 : index
    %c0_117 = arith.constant 0 : index
    %243 = vector.load %arg4[%c8, %c0_117] : memref<9x128xf32, #tpu.memory_space<vmem>>, vector<1x128xf32>
    %244 = vector.broadcast %243 : vector<1x128xf32> to vector<128x128xf32>
    %245 = arith.mulf %242, %244 : vector<128x128xf32>
    %246 = arith.addf %237, %245 : vector<128x128xf32>
    %c0_118 = arith.constant 0 : index
    %c0_119 = arith.constant 0 : index
    %247 = vector.load %arg5[%c0_118, %c0_119] : memref<1x128xf32, #tpu.memory_space<vmem>>, vector<1x128xf32>
    %248 = vector.broadcast %247 : vector<1x128xf32> to vector<128x128xf32>
    %249 = arith.addf %246, %248 : vector<128x128xf32>
    %250 = arith.mulf %249, %249 : vector<128x128xf32>
    %251 = arith.mulf %249, %250 : vector<128x128xf32>
    %cst_120 = arith.constant 4.471500e-02 : f32
    %252 = vector.broadcast %cst_120 : f32 to vector<128x128xf32>
    %253 = arith.mulf %252, %251 : vector<128x128xf32>
    %254 = arith.addf %249, %253 : vector<128x128xf32>
    %cst_121 = arith.constant 0.797884583 : f32
    %255 = vector.broadcast %cst_121 : f32 to vector<128x128xf32>
    %256 = arith.mulf %255, %254 : vector<128x128xf32>
    %257 = math.tanh %256 : vector<128x128xf32>
    %cst_122 = arith.constant 1.000000e+00 : f32
    %258 = vector.broadcast %cst_122 : f32 to vector<128x128xf32>
    %259 = arith.addf %258, %257 : vector<128x128xf32>
    %cst_123 = arith.constant 5.000000e-01 : f32
    %260 = vector.broadcast %cst_123 : f32 to vector<128x128xf32>
    %261 = arith.mulf %260, %259 : vector<128x128xf32>
    %262 = arith.mulf %249, %261 : vector<128x128xf32>
    %c0_124 = arith.constant 0 : index
    %c0_125 = arith.constant 0 : index
    %263 = vector.load %arg6[%c0_124, %c0_125] : memref<128x128xf32, #tpu.memory_space<vmem>>, vector<128x128xf32>
    %cst_126 = arith.constant dense<0.000000e+00> : vector<128x128xf32>
    %264 = tpu.matmul %262, %263, %cst_126 {dimension_numbers = #tpu.dot_dimension_numbers<[1], [0], [0], [1], [0, 0, 1, 1], [], []>} : vector<128x128xf32>, vector<128x128xf32>, vector<128x128xf32> -> vector<128x128xf32>
    %c0_127 = arith.constant 0 : index
    %c0_128 = arith.constant 0 : index
    %265 = vector.load %arg7[%c0_127, %c0_128] : memref<1x128xf32, #tpu.memory_space<vmem>>, vector<1x128xf32>
    %266 = vector.broadcast %265 : vector<1x128xf32> to vector<128x128xf32>
    %267 = arith.addf %264, %266 : vector<128x128xf32>
    %268 = tpu.assume_multiple %164, 8 : i32
    %c0_129 = arith.constant 0 : index
    %269 = arith.index_cast %268 : i32 to index
    %c0_130 = arith.constant 0 : index
    %270 = vector.load %arg8[%c0_129, %269, %c0_130] : memref<1x256x128xf32, #tpu.memory_space<vmem>>, vector<1x128x128xf32>
    %271 = vector.shape_cast %270 : vector<1x128x128xf32> to vector<128x128xf32>
    %272 = vector.shape_cast %267 : vector<128x128xf32> to vector<1x128x128xf32>
    tpu.vector_store %arg8[%c0_129, %269, %c0_130], %272 {strides = array<i32>} : memref<1x256x128xf32, #tpu.memory_space<vmem>>, vector<1x128x128xf32>,
    %c1_i32_131 = arith.constant 1 : i32
    %c128_i32_132 = arith.constant 128 : i32
    %273 = arith.muli %c1_i32_131, %c128_i32_132 : i32
    %cst_133 = arith.constant 0.000000e+00 : f32
    %274 = vector.broadcast %cst_133 : f32 to vector<128x128xf32>
    %c0_i32_134 = arith.constant 0 : i32
    %275 = arith.addi %c0_i32_134, %273 : i32
    %276 = tpu.assume_multiple %275, 8 : i32
    %c0_135 = arith.constant 0 : index
    %277 = arith.index_cast %276 : i32 to index
    %c0_136 = arith.constant 0 : index
    %278 = vector.load %arg9[%c0_135, %277, %c0_136] : memref<3x288x128xf32, #tpu.memory_space<vmem>>, vector<1x128x128xf32>
    %279 = vector.shape_cast %278 : vector<1x128x128xf32> to vector<128x128xf32>
    %c0_137 = arith.constant 0 : index
    %c0_138 = arith.constant 0 : index
    %280 = vector.load %arg4[%c0_137, %c0_138] : memref<9x128xf32, #tpu.memory_space<vmem>>, vector<1x128xf32>
    %281 = vector.broadcast %280 : vector<1x128xf32> to vector<128x128xf32>
    %282 = arith.mulf %279, %281 : vector<128x128xf32>
    %283 = arith.addf %274, %282 : vector<128x128xf32>
    %c0_i32_139 = arith.constant 0 : i32
    %284 = arith.addi %c0_i32_139, %273 : i32
    %285 = tpu.assume_multiple %284, 8 : i32
    %c1_140 = arith.constant 1 : index
    %286 = arith.index_cast %285 : i32 to index
    %c0_141 = arith.constant 0 : index
    %287 = vector.load %arg9[%c1_140, %286, %c0_141] : memref<3x288x128xf32, #tpu.memory_space<vmem>>, vector<1x128x128xf32>
    %288 = vector.shape_cast %287 : vector<1x128x128xf32> to vector<128x128xf32>
    %c1_142 = arith.constant 1 : index
    %c0_143 = arith.constant 0 : index
    %289 = vector.load %arg4[%c1_142, %c0_143] : memref<9x128xf32, #tpu.memory_space<vmem>>, vector<1x128xf32>
    %290 = vector.broadcast %289 : vector<1x128xf32> to vector<128x128xf32>
    %291 = arith.mulf %288, %290 : vector<128x128xf32>
    %292 = arith.addf %283, %291 : vector<128x128xf32>
    %c0_i32_144 = arith.constant 0 : i32
    %293 = arith.addi %c0_i32_144, %273 : i32
    %294 = tpu.assume_multiple %293, 8 : i32
    %c2_145 = arith.constant 2 : index
    %295 = arith.index_cast %294 : i32 to index
    %c0_146 = arith.constant 0 : index
    %296 = vector.load %arg9[%c2_145, %295, %c0_146] : memref<3x288x128xf32, #tpu.memory_space<vmem>>, vector<1x128x128xf32>
    %297 = vector.shape_cast %296 : vector<1x128x128xf32> to vector<128x128xf32>
    %c2_147 = arith.constant 2 : index
    %c0_148 = arith.constant 0 : index
    %298 = vector.load %arg4[%c2_147, %c0_148] : memref<9x128xf32, #tpu.memory_space<vmem>>, vector<1x128xf32>
    %299 = vector.broadcast %298 : vector<1x128xf32> to vector<128x128xf32>
    %300 = arith.mulf %297, %299 : vector<128x128xf32>
    %301 = arith.addf %292, %300 : vector<128x128xf32>
    %c16_i32_149 = arith.constant 16 : i32
    %302 = arith.addi %c16_i32_149, %273 : i32
    %303 = tpu.assume_multiple %302, 8 : i32
    %c0_150 = arith.constant 0 : index
    %304 = arith.index_cast %303 : i32 to index
    %c0_151 = arith.constant 0 : index
    %305 = vector.load %arg9[%c0_150, %304, %c0_151] : memref<3x288x128xf32, #tpu.memory_space<vmem>>, vector<1x128x128xf32>
    %306 = vector.shape_cast %305 : vector<1x128x128xf32> to vector<128x128xf32>
    %c3_152 = arith.constant 3 : index
    %c0_153 = arith.constant 0 : index
    %307 = vector.load %arg4[%c3_152, %c0_153] : memref<9x128xf32, #tpu.memory_space<vmem>>, vector<1x128xf32>
    %308 = vector.broadcast %307 : vector<1x128xf32> to vector<128x128xf32>
    %309 = arith.mulf %306, %308 : vector<128x128xf32>
    %310 = arith.addf %301, %309 : vector<128x128xf32>
    %c16_i32_154 = arith.constant 16 : i32
    %311 = arith.addi %c16_i32_154, %273 : i32
    %312 = tpu.assume_multiple %311, 8 : i32
    %c1_155 = arith.constant 1 : index
    %313 = arith.index_cast %312 : i32 to index
    %c0_156 = arith.constant 0 : index
    %314 = vector.load %arg9[%c1_155, %313, %c0_156] : memref<3x288x128xf32, #tpu.memory_space<vmem>>, vector<1x128x128xf32>
    %315 = vector.shape_cast %314 : vector<1x128x128xf32> to vector<128x128xf32>
    %c4_157 = arith.constant 4 : index
    %c0_158 = arith.constant 0 : index
    %316 = vector.load %arg4[%c4_157, %c0_158] : memref<9x128xf32, #tpu.memory_space<vmem>>, vector<1x128xf32>
    %317 = vector.broadcast %316 : vector<1x128xf32> to vector<128x128xf32>
    %318 = arith.mulf %315, %317 : vector<128x128xf32>
    %319 = arith.addf %310, %318 : vector<128x128xf32>
    %c16_i32_159 = arith.constant 16 : i32
    %320 = arith.addi %c16_i32_159, %273 : i32
    %321 = tpu.assume_multiple %320, 8 : i32
    %c2_160 = arith.constant 2 : index
    %322 = arith.index_cast %321 : i32 to index
    %c0_161 = arith.constant 0 : index
    %323 = vector.load %arg9[%c2_160, %322, %c0_161] : memref<3x288x128xf32, #tpu.memory_space<vmem>>, vector<1x128x128xf32>
    %324 = vector.shape_cast %323 : vector<1x128x128xf32> to vector<128x128xf32>
    %c5_162 = arith.constant 5 : index
    %c0_163 = arith.constant 0 : index
    %325 = vector.load %arg4[%c5_162, %c0_163] : memref<9x128xf32, #tpu.memory_space<vmem>>, vector<1x128xf32>
    %326 = vector.broadcast %325 : vector<1x128xf32> to vector<128x128xf32>
    %327 = arith.mulf %324, %326 : vector<128x128xf32>
    %328 = arith.addf %319, %327 : vector<128x128xf32>
    %c32_i32_164 = arith.constant 32 : i32
    %329 = arith.addi %c32_i32_164, %273 : i32
    %330 = tpu.assume_multiple %329, 8 : i32
    %c0_165 = arith.constant 0 : index
    %331 = arith.index_cast %330 : i32 to index
    %c0_166 = arith.constant 0 : index
    %332 = vector.load %arg9[%c0_165, %331, %c0_166] : memref<3x288x128xf32, #tpu.memory_space<vmem>>, vector<1x128x128xf32>
    %333 = vector.shape_cast %332 : vector<1x128x128xf32> to vector<128x128xf32>
    %c6_167 = arith.constant 6 : index
    %c0_168 = arith.constant 0 : index
    %334 = vector.load %arg4[%c6_167, %c0_168] : memref<9x128xf32, #tpu.memory_space<vmem>>, vector<1x128xf32>
    %335 = vector.broadcast %334 : vector<1x128xf32> to vector<128x128xf32>
    %336 = arith.mulf %333, %335 : vector<128x128xf32>
    %337 = arith.addf %328, %336 : vector<128x128xf32>
    %c32_i32_169 = arith.constant 32 : i32
    %338 = arith.addi %c32_i32_169, %273 : i32
    %339 = tpu.assume_multiple %338, 8 : i32
    %c1_170 = arith.constant 1 : index
    %340 = arith.index_cast %339 : i32 to index
    %c0_171 = arith.constant 0 : index
    %341 = vector.load %arg9[%c1_170, %340, %c0_171] : memref<3x288x128xf32, #tpu.memory_space<vmem>>, vector<1x128x128xf32>
    %342 = vector.shape_cast %341 : vector<1x128x128xf32> to vector<128x128xf32>
    %c7_172 = arith.constant 7 : index
    %c0_173 = arith.constant 0 : index
    %343 = vector.load %arg4[%c7_172, %c0_173] : memref<9x128xf32, #tpu.memory_space<vmem>>, vector<1x128xf32>
    %344 = vector.broadcast %343 : vector<1x128xf32> to vector<128x128xf32>
    %345 = arith.mulf %342, %344 : vector<128x128xf32>
    %346 = arith.addf %337, %345 : vector<128x128xf32>
    %c32_i32_174 = arith.constant 32 : i32
    %347 = arith.addi %c32_i32_174, %273 : i32
    %348 = tpu.assume_multiple %347, 8 : i32
    %c2_175 = arith.constant 2 : index
    %349 = arith.index_cast %348 : i32 to index
    %c0_176 = arith.constant 0 : index
    %350 = vector.load %arg9[%c2_175, %349, %c0_176] : memref<3x288x128xf32, #tpu.memory_space<vmem>>, vector<1x128x128xf32>
    %351 = vector.shape_cast %350 : vector<1x128x128xf32> to vector<128x128xf32>
    %c8_177 = arith.constant 8 : index
    %c0_178 = arith.constant 0 : index
    %352 = vector.load %arg4[%c8_177, %c0_178] : memref<9x128xf32, #tpu.memory_space<vmem>>, vector<1x128xf32>
    %353 = vector.broadcast %352 : vector<1x128xf32> to vector<128x128xf32>
    %354 = arith.mulf %351, %353 : vector<128x128xf32>
    %355 = arith.addf %346, %354 : vector<128x128xf32>
    %c0_179 = arith.constant 0 : index
    %c0_180 = arith.constant 0 : index
    %356 = vector.load %arg5[%c0_179, %c0_180] : memref<1x128xf32, #tpu.memory_space<vmem>>, vector<1x128xf32>
    %357 = vector.broadcast %356 : vector<1x128xf32> to vector<128x128xf32>
    %358 = arith.addf %355, %357 : vector<128x128xf32>
    %359 = arith.mulf %358, %358 : vector<128x128xf32>
    %360 = arith.mulf %358, %359 : vector<128x128xf32>
    %cst_181 = arith.constant 4.471500e-02 : f32
    %361 = vector.broadcast %cst_181 : f32 to vector<128x128xf32>
    %362 = arith.mulf %361, %360 : vector<128x128xf32>
    %363 = arith.addf %358, %362 : vector<128x128xf32>
    %cst_182 = arith.constant 0.797884583 : f32
    %364 = vector.broadcast %cst_182 : f32 to vector<128x128xf32>
    %365 = arith.mulf %364, %363 : vector<128x128xf32>
    %366 = math.tanh %365 : vector<128x128xf32>
    %cst_183 = arith.constant 1.000000e+00 : f32
    %367 = vector.broadcast %cst_183 : f32 to vector<128x128xf32>
    %368 = arith.addf %367, %366 : vector<128x128xf32>
    %cst_184 = arith.constant 5.000000e-01 : f32
    %369 = vector.broadcast %cst_184 : f32 to vector<128x128xf32>
    %370 = arith.mulf %369, %368 : vector<128x128xf32>
    %371 = arith.mulf %358, %370 : vector<128x128xf32>
    %c0_185 = arith.constant 0 : index
    %c0_186 = arith.constant 0 : index
    %372 = vector.load %arg6[%c0_185, %c0_186] : memref<128x128xf32, #tpu.memory_space<vmem>>, vector<128x128xf32>
    %cst_187 = arith.constant dense<0.000000e+00> : vector<128x128xf32>
    %373 = tpu.matmul %371, %372, %cst_187 {dimension_numbers = #tpu.dot_dimension_numbers<[1], [0], [0], [1], [0, 0, 1, 1], [], []>} : vector<128x128xf32>, vector<128x128xf32>, vector<128x128xf32> -> vector<128x128xf32>
    %c0_188 = arith.constant 0 : index
    %c0_189 = arith.constant 0 : index
    %374 = vector.load %arg7[%c0_188, %c0_189] : memref<1x128xf32, #tpu.memory_space<vmem>>, vector<1x128xf32>
    %375 = vector.broadcast %374 : vector<1x128xf32> to vector<128x128xf32>
    %376 = arith.addf %373, %375 : vector<128x128xf32>
    %377 = tpu.assume_multiple %273, 8 : i32
    %c0_190 = arith.constant 0 : index
    %378 = arith.index_cast %377 : i32 to index
    %c0_191 = arith.constant 0 : index
    %379 = vector.load %arg8[%c0_190, %378, %c0_191] : memref<1x256x128xf32, #tpu.memory_space<vmem>>, vector<1x128x128xf32>
    %380 = vector.shape_cast %379 : vector<1x128x128xf32> to vector<128x128xf32>
    %381 = vector.shape_cast %376 : vector<128x128xf32> to vector<1x128x128xf32>
    tpu.vector_store %arg8[%c0_190, %378, %c0_191], %381 {strides = array<i32>} : memref<1x256x128xf32, #tpu.memory_space<vmem>>, vector<1x128x128xf32>,
    %c2_i32_192 = arith.constant 2 : i32
    return
  }
  func.func @transform_0(%arg0: i32) -> (i32, i32, i32) {
    %c0_i32 = arith.constant 0 : i32
    %c0_i32_0 = arith.constant 0 : i32
    %c0_i32_1 = arith.constant 0 : i32
    return %arg0, %c0_i32, %c0_i32_0 : i32, i32, i32
  }
  func.func @transform_1(%arg0: i32) -> (i32, i32) {
    %c0_i32 = arith.constant 0 : i32
    %c0_i32_0 = arith.constant 0 : i32
    %c0_i32_1 = arith.constant 0 : i32
    return %c0_i32, %c0_i32_0 : i32, i32
  }
  func.func @transform_2(%arg0: i32) -> (i32, i32) {
    %c0_i32 = arith.constant 0 : i32
    %c0_i32_0 = arith.constant 0 : i32
    %c0_i32_1 = arith.constant 0 : i32
    return %c0_i32, %c0_i32_0 : i32, i32
  }
  func.func @transform_3(%arg0: i32) -> (i32, i32) {
    %c0_i32 = arith.constant 0 : i32
    %c0_i32_0 = arith.constant 0 : i32
    %c0_i32_1 = arith.constant 0 : i32
    return %c0_i32, %c0_i32_0 : i32, i32
  }
  func.func @transform_4(%arg0: i32) -> (i32, i32) {
    %c0_i32 = arith.constant 0 : i32
    %c0_i32_0 = arith.constant 0 : i32
    %c0_i32_1 = arith.constant 0 : i32
    return %c0_i32, %c0_i32_0 : i32, i32
  }
  func.func @transform_5(%arg0: i32) -> (i32, i32) {
    %c0_i32 = arith.constant 0 : i32
    %c0_i32_0 = arith.constant 0 : i32
    %c0_i32_1 = arith.constant 0 : i32
    return %c0_i32, %c0_i32_0 : i32, i32
  }
  func.func @transform_6(%arg0: i32) -> (i32, i32) {
    %c0_i32 = arith.constant 0 : i32
    %c0_i32_0 = arith.constant 0 : i32
    %c0_i32_1 = arith.constant 0 : i32
    return %c0_i32, %c0_i32_0 : i32, i32
  }
  func.func @transform_7(%arg0: i32) -> (i32, i32, i32) {
    %c0_i32 = arith.constant 0 : i32
    %c0_i32_0 = arith.constant 0 : i32
    %c0_i32_1 = arith.constant 0 : i32
    return %arg0, %c0_i32, %c0_i32_0 : i32, i32, i32
  }
}

</mosaic_0001>

<bundles_post_ra>
// kernel: tpu_custom_call.1
= control target key start
LH: loop header
LB: loop body
LE: loop exit
PB: predicated region body
PF: predicated region fallthrough
CT: control target
= control target key end

     0   :  { %12 = vsyncpa [#allocation4], 0  ;;  %s6703_s0 = inlined_call_operand.hbm [shape: f32[2,256,128], index: 0, kind: input, shape index: {}]   ;;  %s6704_s1 = inlined_call_operand.hbm [shape: f32[128,128], index: 1, kind: input, shape index: {}]   ;;  %s6705_s2 = inlined_call_operand.vmem [shape: f32[1,128], index: 2, kind: input, shape index: {}]   ;;  %s6706_s3 = inlined_call_operand.hbm [shape: f32[9,128], index: 3, kind: input, shape index: {}]   ;;  %s6707_s4 = inlined_call_operand.vmem [shape: f32[1,128], index: 4, kind: input, shape index: {}]   ;;  %s6708_s5 = inlined_call_operand.hbm [shape: f32[128,128], index: 5, kind: input, shape index: {}]   ;;  %s6709_s6 = inlined_call_operand.vmem [shape: f32[1,128], index: 6, kind: input, shape index: {}]   ;;  %s6710_s7 = inlined_call_operand.hbm [shape: f32[2,256,128], index: 7, kind: output, shape index: {}]  }
   0x1   :  { %14 = vsyncpa [#allocation4 + $0x1], 0 }
   0x2   :  { %15 = vsyncpa [#allocation7], 0 }
   0x3   :  { %16 = vsyncpa [#allocation10], 0 }
   0x4   :  { %17 = vsyncpa [#allocation5], 0 }
   0x5   :  { %19 = vsyncpa [#allocation5 + $0x1], 0  ;;  %s4620_s24 = smov 0   ;;  %s4622_s25 = smov 0  }
   0x6   :  { %s4624_s26 = smov 0   ;;  %s4626_s27 = smov 0  }
   0x7 LB: > { %s4641_s28 = sadd.s32 4294967295, %s4568_s27   ;;  %s3601_s29 = sadd.s32 4294967294, %s4568_s27   ;;  %s4568_s27 = sphi %s4626_s27, %s6898_s27   ;;  %s4564_s26 = sphi %s4624_s26, %s6897_s26   ;;  %s4560_s25 = sphi %s4622_s25, %s6896_s25   ;;  %s4556_s24 = sphi %s4620_s24, %s6895_s24  }
   0x8   : > { %p45_p0 = scmp.ne.s32.totalorder %s4560_s25, %s4556_s24  ;;  %p6711_p1 = scmp.eq.s32.totalorder %s4641_s28, 0 }
   0x9   : > { %p201_p3 = scmp.eq.s32.totalorder %s3601_s29, 1  ;;  %p3602_p5 = scmp.ge.s32.totalorder %s4568_s27, 1 }
   0xa   : > { %p4650_p4 = por %p6711_p1, %p45_p0  ;;  %p208_p7 = scmp.lt.s32.totalorder %s4568_s27, 3 }
   0xb   : > { %p4655_p6 = por %p201_p3, %p45_p0  ;;  %s4570_s10 = smov [#allocation6]  }
   0xc   : > { %s6733_s30 = scalar_select %p4650_p4, 1, 0 }
   0xd   : > { %s6734_s8 = scalar_select %p4655_p6, 1, 0 }
   0xe   : > { %p4660_p8 = pnand %p3602_p5, %p208_p7  ;;  %s220_s11 = sshll.u32 %s4570_s10, 4  ;;  %s4664_s11 = int_to_ptr.vmem [resolvable:$true] %s220_s11 }
   0xf   : > { %6735 = sst [smem:[#allocation16_spill]] %s6734_s8  ;;  %s4571_s13 = smov [#allocation8]  }
  0x10   : > { %s6736_s9 = scalar_select %p4660_p8, 1, 0 }
  0x11   : > { %p4175_p9 = pneg %p4660_p8  ;;  %s236_s14 = sshll.u32 %s4571_s13, 4  ;;  %s4675_s14 = int_to_ptr.vmem [resolvable:$true] %s236_s14 }
  0x12   : > { %s4572_s15 = smov [#allocation9]   ;;  %s4380_s19 = scalar_lea.hbm %s6704_s1, 2048 }
  0x13   : > { %p4671_p11 = pnand %p4175_p9, %p6711_p1  ;;  %s4677_s16 = sshll.u32 %s4572_s15, 4  ;;  %s253_s16 = int_to_ptr.vmem [resolvable:$true] %s4677_s16 }
  0x14   : > { %p4381_p12 = scmp.ne.s32.totalorder %s6704_s1, %s4380_s19  ;;  %p4387_p5 = scmp.lt.u32.totalorder %s4380_s19, %s6704_s1 }
  0x15   : > { %p4687_p13 = pneg %p4671_p11 }
  0x17   : > { %p4383_p0 = pnand %p4687_p13, %p4381_p12 }
  0x19   : > { %p4384_p3 = pneg %p4383_p0 }
  0x1b   : > { %p4389_p7 = pnand %p4387_p5, %p4384_p3 }
  0x1d   : > { %4392 = shalt.err (!%p4389_p7)
}
  0x1e   : > { %s4393_s10 = scalar_lea.vmem %s4664_s11, 2048  ;;  %p4401_p2 = scmp.lt.s32.totalorder %s4664_s11, %s4664_s11 }
  0x1f   : > { %p4394_p9 = scmp.ne.s32.totalorder %s4664_s11, %s4393_s10  ;;  %p4402_p6 = scmp.lt.s32.totalorder %s4393_s10, %s4393_s10 }
  0x21   : > { %p4396_p10 = pnand %p4394_p9, %p4687_p13  ;;  %p4403_p12 = por %p4402_p6, %p4401_p2 }
  0x23   : > { %p4397_p1 = pneg %p4396_p10 }
  0x25   : > { %p4404_p0 = pnand %p4403_p12, %p4397_p1 }
  0x27   : > { %4407 = shalt.err (!%p4404_p0)
}
  0x28   : > { %s4573_s13 = smov 128   ;;  %s4574_s15 = smov 8  }
  0x29   : > { %4178 = dma.hbm_to_vmem [thread:$0]  (!%p4671_p11), %s6704_s1, 2048, %s4664_s11, [#allocation7], %s4573_s13, %s4573_s13, %s4574_s15  }
  0x2a   : > { %s4408_s21 = scalar_lea.hbm %s6706_s3, 256 }
  0x2b   : > { %p4409_p1 = scmp.ne.s32.totalorder %s6706_s3, %s4408_s21  ;;  %p4415_p10 = scmp.lt.u32.totalorder %s4408_s21, %s6706_s3 }
  0x2d   : > { %p4411_p2 = pnand %p4409_p1, %p4687_p13 }
  0x2f   : > { %p4412_p6 = pneg %p4411_p2 }
  0x31   : > { %p4417_p3 = pnand %p4415_p10, %p4412_p6 }
  0x33   : > { %4420 = shalt.err (!%p4417_p3)
}
  0x34   : > { %s4421_s11 = scalar_lea.vmem %s4675_s14, 256  ;;  %p4429_p12 = scmp.lt.s32.totalorder %s4675_s14, %s4675_s14 }
  0x35   : > { %p4422_p5 = scmp.ne.s32.totalorder %s4675_s14, %s4421_s11  ;;  %p4430_p0 = scmp.lt.s32.totalorder %s4421_s11, %s4421_s11 }
  0x37   : > { %p4424_p7 = pnand %p4422_p5, %p4687_p13  ;;  %p4431_p1 = por %p4430_p0, %p4429_p12 }
  0x39   : > { %p4425_p9 = pneg %p4424_p7 }
  0x3b   : > { %p4432_p2 = pnand %p4431_p1, %p4425_p9 }
  0x3d   : > { %4435 = shalt.err (!%p4432_p2)
}
  0x3e   : > { %4181 = dma.hbm_to_vmem [thread:$0]  (!%p4671_p11), %s6706_s3, 256, %s4675_s14, [#allocation7], %s4573_s13, %s4573_s13, %s4574_s15  }
  0x3f   : > { %s4436_s20 = scalar_lea.hbm %s6708_s5, 2048 }
  0x40   : > { %p4437_p6 = scmp.ne.s32.totalorder %s6708_s5, %s4436_s20  ;;  %p4443_p5 = scmp.lt.u32.totalorder %s4436_s20, %s6708_s5 }
  0x42   : > { %p4439_p10 = pnand %p4437_p6, %p4687_p13 }
  0x44   : > { %p4440_p3 = pneg %p4439_p10 }
  0x46   : > { %p4445_p7 = pnand %p4443_p5, %p4440_p3 }
  0x48   : > { %4448 = shalt.err (!%p4445_p7)
}
  0x49   : > { %s4449_s11 = scalar_lea.vmem %s253_s16, 2048  ;;  %p4457_p1 = scmp.lt.s32.totalorder %s253_s16, %s253_s16 }
  0x4a   : > { %p4450_p9 = scmp.ne.s32.totalorder %s253_s16, %s4449_s11  ;;  %p4458_p2 = scmp.lt.s32.totalorder %s4449_s11, %s4449_s11 }
  0x4c   : > { %p4452_p12 = pnand %p4450_p9, %p4687_p13  ;;  %p4459_p4 = por %p4458_p2, %p4457_p1 }
  0x4e   : > { %p4453_p0 = pneg %p4452_p12 }
  0x50   : > { %p4460_p8 = pnand %p4459_p4, %p4453_p0 }
  0x52   : > { %4463 = shalt.err (!%p4460_p8)
}
  0x53   : > { %4184 = dma.hbm_to_vmem [thread:$0]  (!%p4671_p11), %s6708_s5, 2048, %s253_s16, [#allocation10], %s4573_s13, %s4573_s13, %s4574_s15  }
  0x54   : > { %s4760_s22 = sadd.s32 1, %s4568_s27   ;;  %s32_s17 = sadd.s32 1, %s4564_s26 }
  0x55   : > { %s29_s12 = ssub.s32 %s4568_s27, %s4760_s22  ;;  %p39_p8 = scmp.ne.s32.totalorder %s4564_s26, %s4560_s25 }
  0x56   : > { %p30_p4 = scmp.eq.s32.totalorder %s29_s12, 0  ;;  %p40_p13 = scmp.eq.s32.totalorder %s4568_s27, 0 }
  0x57   : > { %p4196_p6 = scmp.lt.s32.totalorder %s4568_s27, 2  ;;  %p6739_p3 = scmp.eq.s32.totalorder %s4641_s28, 1 }
  0x58   : > { %s4770_s18 = scalar_select %p30_p4, %s4564_s26, %s32_s17  }
  0x59   : > { %p41_p10 = por %p40_p13, %p39_p8  ;;  %p4774_p5 = por %p6739_p3, %p39_p8 }
  0x5a   : > { %s269_s20 = sand.u32 1, %s4564_s26   ;;  %s3677_s21 = sshll.u32 %s4568_s27, 12 }
  0x5b   : > { %s3607_s16 = sshll.u32 %s269_s20, 8  ;;  %s4783_s10 = scalar_lea.hbm %s6703_s0, %s3677_s21 }
  0x5c   : > { %s273_s11 = scalar_lea.vmem [#allocation3], %s3607_s16  ;;  %p4785_p11 = pnand %p4196_p6, %p41_p10 }
  0x5d   : > { %s280_s14 = sshll.u32 %s273_s11, 4  ;;  %s4791_s12 = scalar_lea.sflag [#allocation4], %s269_s20  ;;  %s4789_s14 = int_to_ptr.vmem [resolvable:$true] %s280_s14 }
  0x5e   : > { %s4464_s17 = scalar_lea.hbm %s4783_s10, 4096  ;;  %p4466_p9 = pneg %p4785_p11 }
  0x5f   : > { %p4465_p7 = scmp.ne.s32.totalorder %s4783_s10, %s4464_s17  ;;  %s4469_s23 = scalar_lea.hbm %s6703_s0, 8192 }
  0x60   : > { %p4470_p1 = scmp.lt.u32.totalorder %s4783_s10, %s6703_s0  ;;  %p4471_p2 = scmp.lt.u32.totalorder %s4469_s23, %s4464_s17 }
  0x61   : > { %p4467_p12 = pnand %p4466_p9, %p4465_p7  ;;  %p4473_p8 = scmp.lt.u32.totalorder %s4464_s17, %s4783_s10 }
  0x62   : > { %p4472_p4 = por %p4471_p2, %p4470_p1 }
  0x63   : > { %p4468_p0 = pneg %p4467_p12 }
  0x64   : > { %p4474_p13 = por %p4473_p8, %p4472_p4 }
  0x66   : > { %p4475_p6 = pnand %p4474_p13, %p4468_p0 }
  0x68   : > { %4478 = shalt.err (!%p4475_p6)
}
  0x69   : > { %s4479_s20 = scalar_lea.vmem %s4789_s14, 4096  ;;  %s4575_s21 = smov [#allocation3]  }
  0x6a   : > { %p4480_p10 = scmp.ne.s32.totalorder %s4789_s14, %s4479_s20  ;;  %s4484_s16 = sshll.u32 %s4575_s21, 4  ;;  %s4485_s16 = int_to_ptr.vmem [resolvable:$false] %s4484_s16 }
  0x6b   : > { %s4486_s29 = scalar_lea.vmem %s4485_s16, 8192  ;;  %p4487_p12 = scmp.lt.s32.totalorder %s4789_s14, %s4485_s16 }
  0x6c   : > { %p4482_p3 = pnand %p4480_p10, %p4466_p9  ;;  %p4488_p1 = scmp.lt.s32.totalorder %s4486_s29, %s4479_s20 }
  0x6e   : > { %p4483_p7 = pneg %p4482_p3  ;;  %p4489_p2 = por %p4488_p1, %p4487_p12 }
  0x70   : > { %p4490_p4 = pnand %p4489_p2, %p4483_p7 }
  0x72   : > { %4493 = shalt.err (!%p4490_p4)
}
  0x73   : > { %4188 = dma.hbm_to_vmem [thread:$0]  (!%p4785_p11), %s4783_s10, 4096, %s4789_s14, %s4791_s12, %s4573_s13, %s4573_s13, %s4574_s15  }
  0x74   : > { %p6742_p9 = scmp.ne.s32.totalorder %s6736_s9, 0 }
  0x76   : > { %292 = sbr.rel (%p6742_p9) target bundleno = 961 (0x3c1), region = 48 }
  0x7d   : > { %s4825_s17 = sand.u32 1, %s4560_s25   ;;  %p6743_p0 = scmp.ne.s32.totalorder %s6733_s30, 0 }
  0x7e   : > { %s3611_s23 = sshll.u32 %s4825_s17, 8  ;;  %s295_s11 = scalar_lea.sflag [#allocation4], %s4825_s17 }
  0x7f   : > { %s4831_s8 = scalar_lea.vmem [#allocation3], %s3611_s23 }
  0x80   : > { %4539 = dma.done.wait (%p6743_p0), %s295_s11, 4096  }
  0x81   : > { %4541 = vsyncadd (%p6743_p0), %s295_s11, 4294963200  ;;  %p6744_p11 = scmp.eq.s32.totalorder %s4641_s28, 0 }
  0x83   : > { %4543 = dma.done.wait (%p6744_p11), [#allocation7], 2304   ;;  %p6745_p8 = pmov %p6744_p11 }
  0x85   : > { %4545 = vsyncadd (%p6745_p8), [#allocation7], 4294964992  ;;  %p6746_p13 = pmov %p6745_p8 }
  0x86   : > { %p6747_p6 = pmov %p6745_p8 }
  0x87   : > { %4547 = dma.done.wait (%p6746_p13), [#allocation10], 2048  }
  0x88   : > { %4549 = vsyncadd (%p6747_p6), [#allocation10], 4294965248  ;;  %v4576_v0 = vmov 0.0   ;;  %v377_v1 = vld [vmem:[#allocation6] sm:$0xff]  ;;  %v378_v2 = vld [vmem:[#allocation6 + $0x8] sm:$0xff]  ;;  %v689_v57 = vlaneseq  ;;  %s6588_s29 = scalar_lea.vmem [#allocation11], %s3611_s23 }
  0x89   : > { %357 = vst [vmem:[#allocation2 + $0x250] sm:$0xff] %v4576_v0  ;;  %341 = vst [vmem:[#allocation2] sm:$0xff] %v4576_v0  ;;  %v379_v3 = vld [vmem:[#allocation6 + $0x10] sm:$0xff]  ;;  %v4031_v4 = vpack.c.bf16 %v378_v2, %v377_v1  ;;  %v380_v5 = vld [vmem:[#allocation6 + $0x18] sm:$0xff]  ;;  %s3678_s23 = sshll.u32 %s4641_s28, 12  ;;  %s3487_s11 = sshll.u32 %s6588_s29, 4  ;;  %s6656_s11 = int_to_ptr.vmem [resolvable:$true] %s3487_s11 }
  0x8a   : > { %343 = vst [vmem:[#allocation2 + $0x10] sm:$0xff] %v4576_v0  ;;  %344 = vst [vmem:[#allocation2 + $0x108] sm:$0xff] %v4576_v0  ;;  %v4035_v6 = vpack.c.bf16 %v380_v5, %v379_v3  ;;  %v381_v7 = vld [vmem:[#allocation6 + $0x20] sm:$0xff]  ;;  %v382_v8 = vld [vmem:[#allocation6 + $0x28] sm:$0xff]  ;;  %v4877_v61 = vshrl.u32 %v689_v57, 7  ;;  %s6654_s9 = scalar_lea.hbm %s6710_s7, %s3678_s23  ;;  %s3474_s28 = scalar_lea.sflag [#allocation5], %s4825_s17 }
  0x8b   : > { %345 = vst [vmem:[#allocation2 + $0x110] sm:$0xff] %v4576_v0  ;;  %356 = vst [vmem:[#allocation2 + $0x248] sm:$0xff] %v4576_v0  ;;  %4032 = vmatprep.subr.bf16.mxu0 %v4031_v4  ;;  %4064 = vmatprep.subr.bf16.mxu1 %v4031_v4  ;;  %v4039_v9 = vpack.c.bf16 %v382_v8, %v381_v7  ;;  %v361_v10 = vld [vmem:[%s4831_s8] sm:$0xff]  ;;  %v383_v12 = vld [vmem:[#allocation6 + $0x30] sm:$0xff]  ;;  %s4494_s13 = scalar_lea.vmem %s6656_s11, 4096  ;;  %s4577_s15 = smov [#allocation11]  }
  0x8c   : > { %358 = vst [vmem:[#allocation2 + $0x348] sm:$0xff] %v4576_v0  ;;  %4034 = vmatpush3.bf16.msra.mxu0 %v4031_v4  ;;  %4066 = vmatpush3.bf16.msra.mxu1 %v4031_v4  ;;  %v3617_v11 = vld [vmem:[%s4831_s8 + $0x80] sm:$0xff]  ;;  %v384_v13 = vld [vmem:[#allocation6 + $0x38] sm:$0xff]  ;;  %v386_v16 = vld [vmem:[#allocation6 + $0x48] sm:$0xff]  ;;  %v4880_v1 = vadd.s32 8, %v4877_v61  ;;  %v4883_v5 = vadd.s32 24, %v4877_v61  ;;  %p4495_p10 = scmp.ne.s32.totalorder %s6656_s11, %s4494_s13 }
  0x8d   : > { %4036 = vmatprep.subr.bf16.mxu0 %v4035_v6  ;;  %4068 = vmatprep.subr.bf16.mxu1 %v4035_v6  ;;  %v4043_v14 = vpack.c.bf16 %v384_v13, %v383_v12  ;;  %v385_v15 = vld [vmem:[#allocation6 + $0x40] sm:$0xff]  ;;  %v387_v18 = vld [vmem:[#allocation6 + $0x50] sm:$0xff]  ;;  %v388_v19 = vld [vmem:[#allocation6 + $0x58] sm:$0xff]  ;;  %v4892_v13 = vadd.s32 128, %v4877_v61  ;;  %s4498_s10 = sshll.u32 %s4577_s15, 4  ;;  %s4499_s10 = int_to_ptr.vmem [resolvable:$false] %s4498_s10 }
  0x8e   : > { %3839 = vmatprep.mubr.f32.mxu0 %v361_v10  ;;  %3895 = vmatprep.mubr.f32.mxu1 %v3617_v11  ;;  %v4047_v17 = vpack.c.bf16 %v386_v16, %v385_v15  ;;  %v4051_v20 = vpack.c.bf16 %v388_v19, %v387_v18  ;;  %v389_v21 = vld [vmem:[#allocation6 + $0x60] sm:$0xff]  ;;  %v390_v22 = vld [vmem:[#allocation6 + $0x68] sm:$0xff]  ;;  %v391_v24 = vld [vmem:[#allocation6 + $0x70] sm:$0xff]  ;;  %v4889_v12 = vadd.s32 128, %v4880_v1  ;;  %v4898_v16 = vadd.s32 128, %v4883_v5  ;;  %p4496_p3 = pnand %p4495_p10, %p4774_p5  ;;  %s4500_s14 = scalar_lea.vmem %s4499_s10, 8192 }
  0x8f   : > { %v4055_v23 = vpack.c.bf16 %v390_v22, %v389_v21  ;;  %v392_v25 = vld [vmem:[#allocation6 + $0x78] sm:$0xff]  ;;  %v362_v27 = vld [vmem:[%s4831_s8 + $0x8] sm:$0xff]  ;;  %v363_v29 = vld [vmem:[%s4831_s8 + $0x10] sm:$0xff]  ;;  %v4904_v18 = vadd.s32 32, %v4877_v61  ;;  %p4501_p12 = scmp.lt.s32.totalorder %s6656_s11, %s4499_s10  ;;  %p4502_p1 = scmp.lt.s32.totalorder %s4500_s14, %s4494_s13 }
  0x90   : > { %4038 = vmatpush3.bf16.msra.mxu0 %v4035_v6  ;;  %4070 = vmatpush3.bf16.msra.mxu1 %v4035_v6  ;;  %v4059_v26 = vpack.c.bf16 %v392_v25, %v391_v24  ;;  %v3618_v28 = vld [vmem:[%s4831_s8 + $0x88] sm:$0xff]  ;;  %v3619_v30 = vld [vmem:[%s4831_s8 + $0x90] sm:$0xff]  ;;  %v364_v31 = vld [vmem:[%s4831_s8 + $0x18] sm:$0xff]  ;;  %v4886_v6 = vadd.s32 16, %v4877_v61  ;;  %p4497_p7 = pneg %p4496_p3 }
  0x91   : > { %4040 = vmatprep.subr.bf16.mxu0 %v4039_v9  ;;  %4072 = vmatprep.subr.bf16.mxu1 %v4039_v9  ;;  %v3620_v32 = vld [vmem:[%s4831_s8 + $0x98] sm:$0xff]  ;;  %v365_v33 = vld [vmem:[%s4831_s8 + $0x20] sm:$0xff]  ;;  %v366_v35 = vld [vmem:[%s4831_s8 + $0x28] sm:$0xff]  ;;  %p4503_p2 = por %p4502_p1, %p4501_p12 }
  0x92   : > { %v3621_v34 = vld [vmem:[%s4831_s8 + $0xa0] sm:$0xff]  ;;  %v3622_v36 = vld [vmem:[%s4831_s8 + $0xa8] sm:$0xff]  ;;  %v367_v37 = vld [vmem:[%s4831_s8 + $0x30] sm:$0xff] }
  0x93   : > { %v3623_v38 = vld [vmem:[%s4831_s8 + $0xb0] sm:$0xff]  ;;  %v368_v39 = vld [vmem:[%s4831_s8 + $0x38] sm:$0xff]  ;;  %v369_v41 = vld [vmem:[%s4831_s8 + $0x40] sm:$0xff]  ;;  %p4504_p4 = pnand %p4503_p2, %p4497_p7 }
  0x94   : > { %4042 = vmatpush3.bf16.msra.mxu0 %v4039_v9  ;;  %4074 = vmatpush3.bf16.msra.mxu1 %v4039_v9  ;;  %v3624_v40 = vld [vmem:[%s4831_s8 + $0xb8] sm:$0xff]  ;;  %v3625_v42 = vld [vmem:[%s4831_s8 + $0xc0] sm:$0xff]  ;;  %v370_v43 = vld [vmem:[%s4831_s8 + $0x48] sm:$0xff] }
  0x95   : > { %4044 = vmatprep.subr.bf16.mxu0 %v4043_v14  ;;  %4076 = vmatprep.subr.bf16.mxu1 %v4043_v14  ;;  %v3626_v44 = vld [vmem:[%s4831_s8 + $0xc8] sm:$0xff]  ;;  %v371_v45 = vld [vmem:[%s4831_s8 + $0x50] sm:$0xff]  ;;  %v372_v47 = vld [vmem:[%s4831_s8 + $0x58] sm:$0xff] }
  0x96   : > { %v3627_v46 = vld [vmem:[%s4831_s8 + $0xd0] sm:$0xff]  ;;  %v3628_v48 = vld [vmem:[%s4831_s8 + $0xd8] sm:$0xff]  ;;  %v373_v49 = vld [vmem:[%s4831_s8 + $0x60] sm:$0xff] }
  0x97   : > { %v3629_v50 = vld [vmem:[%s4831_s8 + $0xe0] sm:$0xff]  ;;  %v374_v51 = vld [vmem:[%s4831_s8 + $0x68] sm:$0xff]  ;;  %v375_v53 = vld [vmem:[%s4831_s8 + $0x70] sm:$0xff] }
  0x98   : > { %4046 = vmatpush3.bf16.msra.mxu0 %v4043_v14  ;;  %4078 = vmatpush3.bf16.msra.mxu1 %v4043_v14  ;;  %v3630_v52 = vld [vmem:[%s4831_s8 + $0xe8] sm:$0xff]  ;;  %v3631_v54 = vld [vmem:[%s4831_s8 + $0xf0] sm:$0xff]  ;;  %v376_v55 = vld [vmem:[%s4831_s8 + $0x78] sm:$0xff]  ;;  %v4895_v14 = vadd.s32 40, %v4877_v61 }
  0x99   : > { %4048 = vmatprep.subr.bf16.mxu0 %v4047_v17  ;;  %4080 = vmatprep.subr.bf16.mxu1 %v4047_v17  ;;  %v3632_v56 = vld [vmem:[%s4831_s8 + $0xf8] sm:$0xff]  ;;  %v2447_v58 = vld [vmem:[#allocation9] sm:$0xff]  ;;  %v2449_v62 = vld [vmem:[#allocation9 + $0x10] sm:$0xff] }
  0x9a   : > { %v2448_v59 = vld [vmem:[#allocation9 + $0x8] sm:$0xff]  ;;  %v2450_v63 = vld [vmem:[#allocation9 + $0x18] sm:$0xff]  ;;  %v2451_v2 = vld [vmem:[#allocation9 + $0x20] sm:$0xff]  ;;  %v4911_v25 = vadd.s32 128, %v4895_v14 }
  0x9b   : > { %v4095_v60 = vpack.c.bf16 %v2448_v59, %v2447_v58  ;;  %v4099_v0 = vpack.c.bf16 %v2450_v63, %v2449_v62  ;;  %v2452_v3 = vld [vmem:[#allocation9 + $0x28] sm:$0xff]  ;;  %v2453_v7 = vld [vmem:[#allocation9 + $0x30] sm:$0xff]  ;;  %v2454_v8 = vld [vmem:[#allocation9 + $0x38] sm:$0xff]  ;;  %v4962_v58 = vadd.s32 96, %v4877_v61 }
  0x9c   : > { %4050 = vmatpush3.bf16.msra.mxu0 %v4047_v17  ;;  %4082 = vmatpush3.bf16.msra.mxu1 %v4047_v17  ;;  %v4103_v4 = vpack.c.bf16 %v2452_v3, %v2451_v2  ;;  %v2455_v9 = vld [vmem:[#allocation9 + $0x40] sm:$0xff]  ;;  %v4107_v10 = vpack.c.bf16 %v2454_v8, %v2453_v7  ;;  %v2456_v11 = vld [vmem:[#allocation9 + $0x48] sm:$0xff]  ;;  %v4901_v17 = vadd.s32 128, %v4886_v6  ;;  %v2457_v19 = vld [vmem:[#allocation9 + $0x50] sm:$0xff] }
  0x9d   : > { %4052 = vmatprep.subr.bf16.mxu0 %v4051_v20  ;;  %4084 = vmatprep.subr.bf16.mxu1 %v4051_v20  ;;  %v4111_v15 = vpack.c.bf16 %v2456_v11, %v2455_v9  ;;  %6757 = vst [vmem:[#allocation26_spill] sm:$0xff] %v4962_v58  ;;  %v3636_v59 = vld [vmem:[#allocation8 + $0x2] ss:$0 sm:$0xff]  ;;  %v4980_v8 = vld [vmem:[%s6705_s2] ss:$0 sm:$0xff] }
  0xa0   : > { %4054 = vmatpush3.bf16.msra.mxu0 %v4051_v20  ;;  %4086 = vmatpush3.bf16.msra.mxu1 %v4051_v20  ;;  %v2458_v20 = vld [vmem:[#allocation9 + $0x58] sm:$0xff] }
  0xa1   : > { %4056 = vmatprep.subr.bf16.mxu0 %v4055_v23  ;;  %4088 = vmatprep.subr.bf16.mxu1 %v4055_v23 }
  0xa4   : > { %4058 = vmatpush3.bf16.msra.mxu0 %v4055_v23  ;;  %4090 = vmatpush3.bf16.msra.mxu1 %v4055_v23 }
  0xa5   : > { %4060 = vmatprep.subr.bf16.mxu0 %v4059_v26  ;;  %4092 = vmatprep.subr.bf16.mxu1 %v4059_v26 }
  0xa8   : > { %4062 = vmatpush3.bf16.msra.mxu0 %v4059_v26  ;;  %4094 = vmatpush3.bf16.msra.mxu1 %v4059_v26  ;;  %v4914_v26 = vadd.s32 56, %v4877_v61 }
  0xa9   : > { %4096 = vmatprep.subr.bf16.mxu0 %v4095_v60  ;;  %4128 = vmatprep.subr.bf16.mxu1 %v4095_v60 }
  0xab   : > { %3840 = vmatmul.mubr.f32.vlgmr.msra.gmra.mrb[0].mxu0 %v362_v27  ;;  %3896 = vmatmul.mubr.f32.vlgmr.msra.gmra.mrb[0].mxu1 %v3618_v28 }
  0xac   : > { %3842 = vmatprep.mubr.f32.mxu0 %v363_v29  ;;  %3898 = vmatprep.mubr.f32.mxu1 %v3619_v30  ;;  %v4919_v29 = vadd.s32 48, %v4877_v61  ;;  %v4115_v30 = vpack.c.bf16 %v2458_v20, %v2457_v19 }
  0xad   : > { %4098 = vmatpush3.bf16.msra.mxu0 %v4095_v60  ;;  %4130 = vmatpush3.bf16.msra.mxu1 %v4095_v60 }
  0xae   : > { %4100 = vmatprep.subr.bf16.mxu0 %v4099_v0  ;;  %4132 = vmatprep.subr.bf16.mxu1 %v4099_v0 }
  0xaf   : > { %3843 = vmatmul.mubr.f32.gmra.mrb[2].mxu0 %v364_v31  ;;  %3899 = vmatmul.mubr.f32.gmra.mrb[2].mxu1 %v3620_v32 }
  0xb0   : > { %3845 = vmatprep.mubr.f32.mxu0 %v365_v33  ;;  %3901 = vmatprep.mubr.f32.mxu1 %v3621_v34  ;;  %v4924_v33 = vadd.s32 128, %v4904_v18  ;;  %v4927_v34 = vadd.s32 72, %v4877_v61 }
  0xb1   : > { %4102 = vmatpush3.bf16.msra.mxu0 %v4099_v0  ;;  %4134 = vmatpush3.bf16.msra.mxu1 %v4099_v0  ;;  %v4970_v0 = vadd.s32 120, %v4877_v61 }
  0xb2   : > { %4104 = vmatprep.subr.bf16.mxu0 %v4103_v4  ;;  %4136 = vmatprep.subr.bf16.mxu1 %v4103_v4  ;;  %6748 = vst [vmem:[#allocation17_spill] sm:$0xff] %v4927_v34 }
  0xb3   : > { %3846 = vmatmul.mubr.f32.gmra.mrb[4].mxu0 %v366_v35  ;;  %3902 = vmatmul.mubr.f32.gmra.mrb[4].mxu1 %v3622_v36  ;;  %v2459_v35 = vld [vmem:[#allocation9 + $0x60] sm:$0xff]  ;;  %v2460_v36 = vld [vmem:[#allocation9 + $0x68] sm:$0xff]  ;;  %6759 = vst [vmem:[#allocation28_spill] sm:$0xff] %v4970_v0 }
  0xb4   : > { %3848 = vmatprep.mubr.f32.mxu0 %v367_v37  ;;  %3904 = vmatprep.mubr.f32.mxu1 %v3623_v38  ;;  %v4930_v37 = vadd.s32 64, %v4877_v61  ;;  %v4933_v38 = vadd.s32 88, %v4877_v61 }
  0xb5   : > { %4106 = vmatpush3.bf16.msra.mxu0 %v4103_v4  ;;  %4138 = vmatpush3.bf16.msra.mxu1 %v4103_v4 }
  0xb6   : > { %4108 = vmatprep.subr.bf16.mxu0 %v4107_v10  ;;  %4140 = vmatprep.subr.bf16.mxu1 %v4107_v10  ;;  %6749 = vst [vmem:[#allocation18_spill] sm:$0xff] %v4930_v37  ;;  %6750 = vst [vmem:[#allocation19_spill] sm:$0xff] %v4933_v38  ;;  %v4959_v57 = vadd.s32 128, %v4933_v38 }
  0xb7   : > { %3849 = vmatmul.mubr.f32.gmra.mrb[6].mxu0 %v368_v39  ;;  %3905 = vmatmul.mubr.f32.gmra.mrb[6].mxu1 %v3624_v40  ;;  %v3634_v39 = vld [vmem:[#allocation8] ss:$0 sm:$0xff]  ;;  %v3635_v40 = vld [vmem:[#allocation8 + $0x1] ss:$0 sm:$0xff] }
  0xb8   : > { %3851 = vmatprep.mubr.f32.mxu0 %v369_v41  ;;  %3907 = vmatprep.mubr.f32.mxu1 %v3625_v42  ;;  %6756 = vst [vmem:[#allocation25_spill] sm:$0xff] %v4959_v57 }
  0xb9   : > { %4110 = vmatpush3.bf16.msra.mxu0 %v4107_v10  ;;  %4142 = vmatpush3.bf16.msra.mxu1 %v4107_v10 }
  0xba   : > { %4112 = vmatprep.subr.bf16.mxu0 %v4111_v15  ;;  %4144 = vmatprep.subr.bf16.mxu1 %v4111_v15 }
  0xbb   : > { %3852 = vmatmul.mubr.f32.gmra.mrb[8].mxu0 %v370_v43  ;;  %3908 = vmatmul.mubr.f32.gmra.mrb[8].mxu1 %v3626_v44  ;;  %v4938_v43 = vadd.s32 128, %v4914_v26  ;;  %v4941_v44 = vadd.s32 80, %v4877_v61 }
  0xbc   : > { %3854 = vmatprep.mubr.f32.mxu0 %v371_v45  ;;  %3910 = vmatprep.mubr.f32.mxu1 %v3627_v46  ;;  %v4945_v46 = vadd.s32 128, %v4919_v29 }
  0xbd   : > { %6751 = vst [vmem:[#allocation20_spill] sm:$0xff] %v4941_v44  ;;  %4114 = vmatpush3.bf16.msra.mxu0 %v4111_v15  ;;  %4146 = vmatpush3.bf16.msra.mxu1 %v4111_v15  ;;  %v4967_v63 = vadd.s32 128, %v4941_v44  ;;  %v1922_v15 = vmul.f32 0.0, %v3636_v59 }
  0xbe   : > { %6752 = vst [vmem:[#allocation21_spill] sm:$0xff] %v4945_v46  ;;  %4116 = vmatprep.subr.bf16.mxu0 %v4115_v30  ;;  %4148 = vmatprep.subr.bf16.mxu1 %v4115_v30 }
  0xbf   : > { %3855 = vmatmul.mubr.f32.gmra.mrb[10].mxu0 %v372_v47  ;;  %3911 = vmatmul.mubr.f32.gmra.mrb[10].mxu1 %v3628_v48  ;;  %v4948_v47 = vadd.s32 104, %v4877_v61  ;;  %v4119_v48 = vpack.c.bf16 %v2460_v36, %v2459_v35  ;;  %6758 = vst [vmem:[#allocation27_spill] sm:$0xff] %v4967_v63  ;;  %v4990_v35 = vadd.s32 128, %v4962_v58 }
  0xc0   : > { %3857 = vmatprep.mubr.f32.mxu0 %v373_v49  ;;  %3913 = vmatprep.mubr.f32.mxu1 %v3629_v50  ;;  %v4952_v50 = vadd.s32 128, %v4927_v34 }
  0xc1   : > { %6753 = vst [vmem:[#allocation22_spill] sm:$0xff] %v4948_v47  ;;  %4118 = vmatpush3.bf16.msra.mxu0 %v4115_v30  ;;  %4150 = vmatpush3.bf16.msra.mxu1 %v4115_v30  ;;  %v4975_v4 = vadd.s32 128, %v4948_v47  ;;  %6762 = vst [vmem:[#allocation31_spill] sm:$0xff] %v4990_v35  ;;  %v6803_v47 = vand.u32 15, %v4904_v18 }
  0xc2   : > { %6754 = vst [vmem:[#allocation23_spill] sm:$0xff] %v4952_v50  ;;  %4120 = vmatprep.subr.bf16.mxu0 %v4119_v48 }
  0xc3   : > { %3858 = vmatmul.mubr.f32.gmra.mrb[12].mxu0 %v374_v51  ;;  %3914 = vmatmul.mubr.f32.gmra.mrb[12].mxu1 %v3630_v52  ;;  %v2461_v51 = vld [vmem:[#allocation9 + $0x70] sm:$0xff]  ;;  %v2462_v52 = vld [vmem:[#allocation9 + $0x78] sm:$0xff]  ;;  %6760 = vst [vmem:[#allocation29_spill] sm:$0xff] %v4975_v4  ;;  %vm5240_vm10 = vcmp.ne.s32.totalorder %v6803_v47, 0 }
  0xc4   : > { %3860 = vmatprep.mubr.f32.mxu0 %v375_v53  ;;  %3916 = vmatprep.mubr.f32.mxu1 %v3631_v54  ;;  %v1812_v53 = vmul.f32 0.0, %v3634_v39  ;;  %v1867_v54 = vmul.f32 0.0, %v3635_v40  ;;  %v4123_v7 = vpack.c.bf16 %v2462_v52, %v2461_v51  ;;  %v4995_v52 = vadd.s32 128, %v4970_v0 }
  0xc5   : > { %4122 = vmatpush3.bf16.msra.mxu0 %v4119_v48 }
  0xc6   : > { %v4984_v11 = vadd.f32 %v1867_v54, %v1812_v53  ;;  %6763 = vst [vmem:[#allocation32_spill] sm:$0xff] %v4995_v52  ;;  %v4998_v53 = vadd.s32 112, %v4877_v61  ;;  %4124 = vmatprep.subr.bf16.mxu0 %v4123_v7 }
  0xc7   : > { %3861 = vmatmul.mubr.f32.gmra.mrb[14].mxu0 %v376_v55  ;;  %3917 = vmatmul.mubr.f32.gmra.mrb[14].mxu1 %v3632_v56  ;;  %v4956_v56 = vadd.s32 128, %v4930_v37 }
  0xc8   : > { %6761 = vst [vmem:[#allocation30_spill] sm:$0xff] %v4984_v11  ;;  %6764 = vst [vmem:[#allocation33_spill] sm:$0xff] %v4998_v53  ;;  %v5030_v2 = vadd.s32 128, %v4998_v53 }
  0xc9   : > { %6755 = vst [vmem:[#allocation24_spill] sm:$0xff] %v4956_v56  ;;  %4126 = vmatpush3.bf16.msra.mxu0 %v4123_v7 }
  0xca   : > { %6766 = vst [vmem:[#allocation35_spill] sm:$0xff] %v5030_v2 }
 0x17e   : > { %v3841_v36 = vpop.f32.mrb[0].mxu0  ;;  %v3897_v39 = vpop.f32.mrb[0].mxu1 }
 0x17f   : > { %v5001_v54 = vadd.f32 %v3841_v36, %v4980_v8  ;;  %v466_v59 = vpop.f32.mrb[1].mxu0  ;;  %v5004_v30 = vadd.f32 %v3897_v39, %v4980_v8  ;;  %v1182_v20 = vpop.f32.mrb[1].mxu1  ;;  %v5016_v36 = vadd.f32 %v1922_v15, %v4984_v11 }
 0x180   : > { %v5009_v51 = vadd.f32 %v4980_v8, %v466_v59  ;;  %v5012_v10 = vadd.f32 %v4980_v8, %v1182_v20 }
 0x181   : > { %6765 = vst [vmem:[#allocation34_spill] sm:$0xff] %v5016_v36  ;;  %v546_v39 = vmul.f32 %v5001_v54, %v5001_v54  ;;  %v1262_v19 = vmul.f32 %v5004_v30, %v5004_v30 }
 0x182   : > { %v545_v59 = vmul.f32 %v5009_v51, %v5009_v51  ;;  %v1261_v20 = vmul.f32 %v5012_v10, %v5012_v10  ;;  %v3844_v48 = vpop.f32.mrb[2].mxu0  ;;  %v3900_v3 = vpop.f32.mrb[2].mxu1 }
 0x183   : > { %v562_v62 = vmul.f32 %v546_v39, %v5001_v54  ;;  %v1278_v40 = vmul.f32 %v1262_v19, %v5004_v30  ;;  %v5035_v9 = vadd.f32 %v3844_v48, %v4980_v8  ;;  %v5038_v60 = vadd.f32 %v3900_v3, %v4980_v8  ;;  %v476_v55 = vpop.f32.mrb[3].mxu0  ;;  %v1192_v49 = vpop.f32.mrb[3].mxu1 }
 0x184   : > { %v561_v45 = vmul.f32 %v545_v59, %v5009_v51  ;;  %v1277_v15 = vmul.f32 %v1261_v20, %v5012_v10  ;;  %v5043_v42 = vadd.f32 %v4980_v8, %v476_v55  ;;  %v5046_v7 = vadd.f32 %v4980_v8, %v1192_v49 }
 0x185   : > { %v578_v39 = vmul.f32 0.044715, %v562_v62  ;;  %v1294_v19 = vmul.f32 0.044715, %v1278_v40  ;;  %v548_v48 = vmul.f32 %v5035_v9, %v5035_v9  ;;  %v1264_v3 = vmul.f32 %v5038_v60, %v5038_v60 }
 0x186   : > { %v577_v41 = vmul.f32 0.044715, %v561_v45  ;;  %v1293_v32 = vmul.f32 0.044715, %v1277_v15  ;;  %v547_v59 = vmul.f32 %v5043_v42, %v5043_v42  ;;  %v1263_v55 = vmul.f32 %v5046_v7, %v5046_v7  ;;  %v3847_v20 = vpop.f32.mrb[4].mxu0  ;;  %v3903_v28 = vpop.f32.mrb[4].mxu1 }
 0x187   : > { %v594_v49 = vadd.f32 %v578_v39, %v5001_v54  ;;  %v1310_v62 = vadd.f32 %v1294_v19, %v5004_v30  ;;  %v564_v40 = vmul.f32 %v548_v48, %v5035_v9  ;;  %v1280_v31 = vmul.f32 %v1264_v3, %v5038_v60  ;;  %v486_v27 = vpop.f32.mrb[5].mxu0  ;;  %v1202_v24 = vpop.f32.mrb[5].mxu1 }
 0x188   : > { %v593_v45 = vadd.f32 %v577_v41, %v5009_v51  ;;  %v1309_v15 = vadd.f32 %v1293_v32, %v5012_v10  ;;  %v563_v23 = vmul.f32 %v547_v59, %v5043_v42  ;;  %v1279_v22 = vmul.f32 %v1263_v55, %v5046_v7 }
 0x189   : > { %v610_v21 = vmul.f32 0.7978846, %v594_v49  ;;  %v1326_v11 = vmul.f32 0.7978846, %v1310_v62  ;;  %v580_v52 = vmul.f32 0.044715, %v564_v40  ;;  %v5065_v39 = vadd.f32 %v3847_v20, %v4980_v8 }
 0x18a   : > { %v609_v19 = vmul.f32 0.7978846, %v593_v45  ;;  %v1325_v48 = vmul.f32 0.7978846, %v1309_v15  ;;  %v1296_v0 = vmul.f32 0.044715, %v1280_v31  ;;  %v5068_v3 = vadd.f32 %v3903_v28, %v4980_v8 }
 0x18b   : > { %4241 = vtanh.f32 %v610_v21  ;;  %v596_v41 = vadd.f32 %v580_v52, %v5035_v9  ;;  %v579_v32 = vmul.f32 0.044715, %v563_v23  ;;  %v1295_v35 = vmul.f32 0.044715, %v1279_v22  ;;  %v3850_v59 = vpop.f32.mrb[6].mxu0  ;;  %v3906_v2 = vpop.f32.mrb[6].mxu1 }
 0x18c   : > { %4243 = vtanh.f32 %v609_v19  ;;  %v1312_v55 = vadd.f32 %v1296_v0, %v5038_v60  ;;  %v550_v20 = vmul.f32 %v5065_v39, %v5065_v39  ;;  %v1266_v49 = vmul.f32 %v5068_v3, %v5068_v3  ;;  %v496_v31 = vpop.f32.mrb[7].mxu0  ;;  %v1212_v62 = vpop.f32.mrb[7].mxu1 }
 0x18d   : > { %4245 = vtanh.f32 %v1326_v11  ;;  %v612_v28 = vmul.f32 0.7978846, %v596_v41  ;;  %v595_v21 = vadd.f32 %v579_v32, %v5043_v42  ;;  %v1311_v23 = vadd.f32 %v1295_v35, %v5046_v7 }
 0x18e   : > { %4247 = vtanh.f32 %v1325_v48  ;;  %v1328_v22 = vmul.f32 0.7978846, %v1312_v55  ;;  %v566_v52 = vmul.f32 %v550_v20, %v5065_v39  ;;  %v1282_v0 = vmul.f32 %v1266_v49, %v5068_v3  ;;  %v5080_v40 = vpop.f32.mrb[8].mxu0  ;;  %v5082_v45 = vpop.f32.mrb[8].mxu1 }
 0x18f   : > { %4249 = vtanh.f32 %v612_v28  ;;  %v611_v15 = vmul.f32 0.7978846, %v595_v21  ;;  %v1327_v19 = vmul.f32 0.7978846, %v1311_v23  ;;  %v5085_v11 = vadd.f32 %v4980_v8, %v486_v27  ;;  %v5087_v41 = vpop.f32.mrb[9].mxu0  ;;  %v5089_v32 = vpop.f32.mrb[9].mxu1 }
 0x190   : > { %4251 = vtanh.f32 %v1328_v22  ;;  %v582_v35 = vmul.f32 0.044715, %v566_v52  ;;  %v1298_v48 = vmul.f32 0.044715, %v1282_v0  ;;  %v5092_v55 = vadd.f32 %v4980_v8, %v1202_v24 }
 0x191   : > { %v6767_v20 = vand.u32 15, %v4880_v1  ;;  %4253 = vtanh.f32 %v611_v15  ;;  %v549_v27 = vmul.f32 %v5085_v11, %v5085_v11  ;;  %v5103_v28 = vadd.f32 %v3850_v59, %v4980_v8 }
 0x192   : > { %v5106_v21 = vadd.f32 %v3906_v2, %v4980_v8  ;;  %v6770_v23 = vand.u32 15, %v4877_v61  ;;  %4255 = vtanh.f32 %v1327_v19  ;;  %v598_v1 = vadd.f32 %v582_v35, %v5065_v39  ;;  %v5118_v0 = vpop.f32.mrb[10].mxu0  ;;  %v5120_v59 = vpop.f32.mrb[10].mxu1 }
 0x193   : > { %vm5096_vm0 = vcmp.ne.s32.totalorder %v6767_v20, 15  ;;  %v1314_v22 = vadd.f32 %v1298_v48, %v5068_v3  ;;  %v1265_v52 = vmul.f32 %v5092_v55, %v5092_v55  ;;  %v6773_v2 = vand.u32 15, %v4889_v12  ;;  %v5136_v20 = vpop.f32.mrb[11].mxu0 }
 0x194   : > { %vm5110_vm1 = vcmp.ne.s32.totalorder %v6770_v23, 0  ;;  %v565_v15 = vmul.f32 %v549_v27, %v5085_v11  ;;  %v552_v19 = vmul.f32 %v5103_v28, %v5103_v28  ;;  %v1268_v35 = vmul.f32 %v5106_v21, %v5106_v21  ;;  %6776 = vst [vmem:[#allocation36_spill] sm:$0xff] %v5136_v20  ;;  %v5138_v23 = vpop.f32.mrb[11].mxu1 }
 0x195   : > { %vm5124_vm2 = vcmp.ne.s32.totalorder %v6773_v2, 15  ;;  %v5134_v48 = vadd.f32 %v4980_v8, %v496_v31  ;;  %6777 = vst [vmem:[#allocation37_spill] sm:$0xff] %v5138_v23  ;;  %v6778_v12 = vand.u32 15, %v4892_v13  ;;  %v614_v27 = vmul.f32 0.7978846, %v598_v1  ;;  %v4242_v4 = vpop.eup %4241 }
 0x196   : > { %v1330_v53 = vmul.f32 0.7978846, %v1314_v22  ;;  %v1281_v36 = vmul.f32 %v1265_v52, %v5092_v55  ;;  %v5148_v58 = vadd.f32 %v4980_v8, %v1212_v62  ;;  %v6781_v31 = vand.u32 15, %v4883_v5  ;;  %v4244_v22 = vpop.eup %4243 }
 0x197   : > { %vm5142_vm3 = vcmp.ne.s32.totalorder %v6778_v12, 0  ;;  %v581_v63 = vmul.f32 0.044715, %v565_v15  ;;  %v568_v13 = vmul.f32 %v552_v19, %v5103_v28  ;;  %v1284_v12 = vmul.f32 %v1268_v35, %v5106_v21  ;;  %v5172_v19 = vpop.f32.mrb[12].mxu0  ;;  %v5174_v35 = vpop.f32.mrb[12].mxu1 }
 0x198   : > { %vm5152_vm4 = vcmp.ne.s32.totalorder %v6781_v31, 15  ;;  %v5160_v1 = vmul.f32 %v5134_v48, %v5134_v48  ;;  %v642_v52 = vadd.f32 1.0, %v4242_v4  ;;  %v6784_v62 = vand.u32 15, %v4898_v16  ;;  %6787 = vst [vmem:[#allocation38_spill] sm:$0xff] %v5172_v19  ;;  %6788 = vst [vmem:[#allocation39_spill] sm:$0xff] %v5174_v35  ;;  %v4246_v31 = vpop.eup %4245  ;;  %v5185_v38 = vpop.f32.mrb[13].mxu1 }
 0x199   : > { %4257 = vtanh.f32 %v614_v27  ;;  %v1297_v5 = vmul.f32 0.044715, %v1281_v36  ;;  %v5170_v15 = vmul.f32 %v5148_v58, %v5148_v58  ;;  %v641_v57 = vadd.f32 1.0, %v4244_v22  ;;  %6793 = vst [vmem:[#allocation41_spill] sm:$0xff] %v5185_v38  ;;  %v4248_v56 = vpop.eup %4247 }
 0x19a   : > { %vm5164_vm5 = vcmp.ne.s32.totalorder %v6784_v62, 15  ;;  %v6789_v4 = vand.u32 15, %v4886_v6  ;;  %4259 = vtanh.f32 %v1330_v53  ;;  %v597_v27 = vadd.f32 %v581_v63, %v5085_v11  ;;  %v5183_v62 = vpop.f32.mrb[13].mxu0  ;;  %v4250_v53 = vpop.eup %4249 }
 0x19b   : > { %v584_v36 = vmul.f32 0.044715, %v568_v13  ;;  %6792 = vst [vmem:[#allocation40_spill] sm:$0xff] %v5183_v62  ;;  %v658_v37 = vmul.f32 0.5, %v642_v52  ;;  %v1358_v50 = vadd.f32 1.0, %v4246_v31  ;;  %v6794_v35 = vand.u32 15, %v4901_v17  ;;  %v4252_v19 = vpop.eup %4251 }
 0x19c   : > { %vm5178_vm6 = vcmp.ne.s32.totalorder %v6789_v4, 0  ;;  %v1313_v6 = vadd.f32 %v1297_v5, %v5092_v55  ;;  %v1300_v4 = vmul.f32 0.044715, %v1284_v12  ;;  %v657_v34 = vmul.f32 0.5, %v641_v57  ;;  %v5196_v17 = vpop.f32.mrb[14].mxu0  ;;  %v4254_v20 = vpop.eup %4253 }
 0x19d   : > { %vm5189_vm7 = vcmp.ne.s32.totalorder %v6794_v35, 0  ;;  %v1357_v63 = vadd.f32 1.0, %v4248_v56  ;;  %v613_v13 = vmul.f32 0.7978846, %v597_v27  ;;  %v600_v62 = vadd.f32 %v584_v36, %v5103_v28  ;;  %v5198_v35 = vpop.f32.mrb[14].mxu1  ;;  %v5201_v56 = vpop.f32.mrb[15].mxu0 }
 0x19e   : > { %v674_v38 = vmul.f32 %v658_v37, %v5001_v54  ;;  %v1374_v52 = vmul.f32 0.5, %v1358_v50  ;;  %v644_v31 = vadd.f32 1.0, %v4250_v53  ;;  %v1329_v23 = vmul.f32 0.7978846, %v1313_v6  ;;  %v5203_v57 = vpop.f32.mrb[15].mxu1  ;;  %v4256_v27 = vpop.eup %4255 }
 0x19f   : > { %v673_v5 = vmul.f32 %v657_v34, %v5009_v51  ;;  %v1373_v12 = vmul.f32 0.5, %v1357_v63  ;;  %v1360_v46 = vadd.f32 1.0, %v4252_v19  ;;  %4261 = vtanh.f32 %v613_v13 }
 0x1a0   : > { %901 = vst [vmem:[#allocation2 + $0x138] sm:$0xff] %v674_v38  ;;  %v965_v37 = vsel %vm5096_vm0, %v674_v38, 0.0  ;;  %1061 = vst [vmem:[#allocation2 + $0x257] sm:$0xff] %v674_v38  ;;  %v1390_v50 = vmul.f32 %v1374_v52, %v5004_v30  ;;  %v660_v54 = vmul.f32 0.5, %v644_v31  ;;  %v643_v36 = vadd.f32 1.0, %v4254_v20 }
 0x1a1   : > { %v6797_v6 = vand.u32 15, %v4895_v14  ;;  %981 = vst [vmem:[#allocation2 + $0x19] sm:$0xff] %v965_v37  ;;  %900 = vst [vmem:[#allocation2 + $0x130] sm:$0xff] %v673_v5  ;;  %v1044_v51 = vsel %vm5110_vm1, %v673_v5, 0.0  ;;  %v1389_v49 = vmul.f32 %v1373_v12, %v5012_v10  ;;  %v1376_v19 = vmul.f32 0.5, %v1360_v46 }
 0x1a2   : > { %980 = vst [vmem:[#allocation2 + $0x11] sm:$0xff] %v673_v5  ;;  %v1359_v38 = vadd.f32 1.0, %v4256_v27  ;;  %v6800_v30 = vand.u32 15, %v4911_v25  ;;  %1060 = vst [vmem:[#allocation2 + $0x24f] sm:$0xff] %v1044_v51  ;;  %v1680_v14 = vsel %vm5124_vm2, %v1390_v50, 0.0  ;;  %v676_v53 = vmul.f32 %v660_v54, %v5035_v9 }
 0x1a3   : > { %vm5210_vm8 = vcmp.ne.s32.totalorder %v6797_v6, 15  ;;  %1616 = vst [vmem:[#allocation2 + $0x1b8] sm:$0xff] %v1390_v50  ;;  %1776 = vst [vmem:[#allocation2 + $0x2d7] sm:$0xff] %v1390_v50  ;;  %v659_v24 = vmul.f32 0.5, %v643_v36  ;;  %4263 = vtanh.f32 %v1329_v23  ;;  %v1759_v25 = vsel %vm5142_vm3, %v1389_v49, 0.0  ;;  %v4258_v13 = vpop.eup %4257 }
 0x1a4   : > { %vm5219_vm9 = vcmp.ne.s32.totalorder %v6800_v30, 15  ;;  %1696 = vst [vmem:[#allocation2 + $0x99] sm:$0xff] %v1680_v14  ;;  %1615 = vst [vmem:[#allocation2 + $0x1b0] sm:$0xff] %v1389_v49  ;;  %v1392_v46 = vmul.f32 %v1376_v19, %v5038_v60  ;;  %v1375_v10 = vmul.f32 0.5, %v1359_v38  ;;  %v616_v63 = vmul.f32 0.7978846, %v600_v62  ;;  %v4260_v2 = vpop.eup %4259 }
 0x1a5   : > { %1695 = vst [vmem:[#allocation2 + $0x91] sm:$0xff] %v1389_v49  ;;  %1775 = vst [vmem:[#allocation2 + $0x2cf] sm:$0xff] %v1759_v25  ;;  %v967_v61 = vsel %vm5152_vm4, %v676_v53, 0.0  ;;  %v675_v9 = vmul.f32 %v659_v24, %v5043_v42  ;;  %v1316_v23 = vadd.f32 %v1300_v4, %v5106_v21  ;;  %v567_v52 = vmul.f32 %v5160_v1, %v5134_v48 }
 0x1a6   : > { %903 = vst [vmem:[#allocation2 + $0x148] sm:$0xff] %v676_v53  ;;  %1063 = vst [vmem:[#allocation2 + $0x267] sm:$0xff] %v676_v53  ;;  %v1682_v60 = vsel %vm5164_vm5, %v1392_v46, 0.0  ;;  %v1391_v62 = vmul.f32 %v1375_v10, %v5046_v7  ;;  %v646_v31 = vadd.f32 1.0, %v4258_v13  ;;  %4265 = vtanh.f32 %v616_v63 }
 0x1a7   : > { %983 = vst [vmem:[#allocation2 + $0x29] sm:$0xff] %v967_v61  ;;  %1618 = vst [vmem:[#allocation2 + $0x1c8] sm:$0xff] %v1392_v46  ;;  %v1046_v42 = vsel %vm5178_vm6, %v675_v9, 0.0  ;;  %v1362_v1 = vadd.f32 1.0, %v4260_v2  ;;  %v1332_v44 = vmul.f32 0.7978846, %v1316_v23  ;;  %v1283_v12 = vmul.f32 %v5170_v15, %v5148_v58 }
 0x1a8   : > { %1778 = vst [vmem:[#allocation2 + $0x2e7] sm:$0xff] %v1392_v46  ;;  %1698 = vst [vmem:[#allocation2 + $0xa9] sm:$0xff] %v1682_v60  ;;  %v583_v4 = vmul.f32 0.044715, %v567_v52  ;;  %v1761_v18 = vsel %vm5189_vm7, %v1391_v62, 0.0  ;;  %v662_v7 = vmul.f32 0.5, %v646_v31  ;;  %v5252_v27 = vadd.f32 %v5080_v40, %v4980_v8 }
 0x1a9   : > { %902 = vst [vmem:[#allocation2 + $0x140] sm:$0xff] %v675_v9  ;;  %982 = vst [vmem:[#allocation2 + $0x21] sm:$0xff] %v675_v9  ;;  %v1378_v16 = vmul.f32 0.5, %v1362_v1  ;;  %v6806_v37 = vand.u32 15, %v4924_v33  ;;  %4267 = vtanh.f32 %v1332_v44  ;;  %v5263_v54 = vadd.f32 %v5082_v45, %v4980_v8  ;;  %v4262_v15 = vpop.eup %4261 }
 0x1aa   : > { %1062 = vst [vmem:[#allocation2 + $0x25f] sm:$0xff] %v1046_v42  ;;  %1617 = vst [vmem:[#allocation2 + $0x1c0] sm:$0xff] %v1391_v62  ;;  %v599_v22 = vadd.f32 %v583_v4, %v5134_v48  ;;  %v678_v36 = vmul.f32 %v662_v7, %v5065_v39  ;;  %v1299_v40 = vmul.f32 0.044715, %v1283_v12  ;;  %v554_v6 = vmul.f32 %v5252_v27, %v5252_v27 }
 0x1ab   : > { %1697 = vst [vmem:[#allocation2 + $0xa1] sm:$0xff] %v1391_v62  ;;  %1777 = vst [vmem:[#allocation2 + $0x2df] sm:$0xff] %v1761_v18  ;;  %vm5256_vm11 = vcmp.ne.s32.totalorder %v6806_v37, 0  ;;  %v5270_v33 = vadd.f32 %v4980_v8, %v5087_v41  ;;  %v1394_v51 = vmul.f32 %v1378_v16, %v5068_v3  ;;  %v645_v49 = vadd.f32 1.0, %v4262_v15 }
 0x1ac   : > { %v615_v19 = vmul.f32 0.7978846, %v599_v22  ;;  %v1270_v38 = vmul.f32 %v5263_v54, %v5263_v54  ;;  %905 = vst [vmem:[#allocation2 + $0x158] sm:$0xff] %v678_v36  ;;  %v969_v45 = vsel %vm5210_vm8, %v678_v36, 0.0  ;;  %1065 = vst [vmem:[#allocation2 + $0x277] sm:$0xff] %v678_v36  ;;  %v6809_v39 = vand.u32 15, %v4914_v26 }
 0x1ad   : > { %v1315_v41 = vadd.f32 %v1299_v40, %v5148_v58  ;;  %v570_v3 = vmul.f32 %v554_v6, %v5252_v27  ;;  %v553_v14 = vmul.f32 %v5270_v33, %v5270_v33  ;;  %v4264_v53 = vpop.eup %4263  ;;  %985 = vst [vmem:[#allocation2 + $0x39] sm:$0xff] %v969_v45  ;;  %1620 = vst [vmem:[#allocation2 + $0x1d8] sm:$0xff] %v1394_v51  ;;  %v1684_v34 = vsel %vm5219_vm9, %v1394_v51, 0.0 }
 0x1ae   : > { %vm5279_vm12 = vcmp.ne.s32.totalorder %v6809_v39, 15  ;;  %1780 = vst [vmem:[#allocation2 + $0x2f7] sm:$0xff] %v1394_v51  ;;  %v661_v24 = vmul.f32 0.5, %v645_v49  ;;  %4269 = vtanh.f32 %v615_v19  ;;  %v1286_v26 = vmul.f32 %v1270_v38, %v5263_v54  ;;  %1700 = vst [vmem:[#allocation2 + $0xb9] sm:$0xff] %v1684_v34  ;;  %v6818_v51 = vld [vmem:[#allocation21_spill] sm:$0xff]  ;;  %v6822_v19 = vld [vmem:[#allocation36_spill] sm:$0xff] }
 0x1af   : > { %v1361_v25 = vadd.f32 1.0, %v4264_v53  ;;  %v1331_v46 = vmul.f32 0.7978846, %v1315_v41  ;;  %v586_v10 = vmul.f32 0.044715, %v570_v3  ;;  %v569_v63 = vmul.f32 %v553_v14, %v5270_v33  ;;  %v6823_v3 = vld [vmem:[#allocation37_spill] sm:$0xff] }
 0x1b0   : > { %v677_v13 = vmul.f32 %v661_v24, %v5085_v11  ;;  %v6812_v61 = vand.u32 15, %v4938_v43  ;;  %v1302_v20 = vmul.f32 0.044715, %v1286_v26  ;;  %v5300_v23 = vadd.f32 %v4980_v8, %v5089_v32  ;;  %v4266_v2 = vpop.eup %4265 }
 0x1b1   : > { %v5304_v52 = vadd.f32 %v5118_v0, %v4980_v8  ;;  %v1377_v60 = vmul.f32 0.5, %v1361_v25  ;;  %4271 = vtanh.f32 %v1331_v46  ;;  %v602_v11 = vadd.f32 %v586_v10, %v5252_v27  ;;  %v6824_v10 = vld [vmem:[#allocation38_spill] sm:$0xff] }
 0x1b2   : > { %vm5294_vm13 = vcmp.ne.s32.totalorder %v6812_v61, 15  ;;  %v585_v62 = vmul.f32 0.044715, %v569_v63  ;;  %904 = vst [vmem:[#allocation2 + $0x150] sm:$0xff] %v677_v13  ;;  %984 = vst [vmem:[#allocation2 + $0x31] sm:$0xff] %v677_v13  ;;  %v1048_v43 = vsel %vm5240_vm10, %v677_v13, 0.0  ;;  %v1318_v47 = vadd.f32 %v1302_v20, %v5263_v54 }
 0x1b3   : > { %v648_v31 = vadd.f32 1.0, %v4266_v2  ;;  %v1269_v32 = vmul.f32 %v5300_v23, %v5300_v23  ;;  %1064 = vst [vmem:[#allocation2 + $0x26f] sm:$0xff] %v1048_v43  ;;  %v1393_v0 = vmul.f32 %v1377_v60, %v5092_v55  ;;  %v618_v42 = vmul.f32 0.7978846, %v602_v11  ;;  %v4268_v4 = vpop.eup %4267  ;;  %v6825_v20 = vld [vmem:[#allocation17_spill] sm:$0xff] }
 0x1b4   : > { %v601_v1 = vadd.f32 %v585_v62, %v5270_v33  ;;  %v556_v44 = vmul.f32 %v5304_v52, %v5304_v52  ;;  %v6815_v5 = vand.u32 15, %v4919_v29  ;;  %v1334_v12 = vmul.f32 0.7978846, %v1318_v47 }
 0x1b5   : > { %v664_v18 = vmul.f32 0.5, %v648_v31  ;;  %v1285_v16 = vmul.f32 %v1269_v32, %v5300_v23  ;;  %v5325_v55 = vadd.f32 %v5120_v59, %v4980_v8  ;;  %1619 = vst [vmem:[#allocation2 + $0x1d0] sm:$0xff] %v1393_v0  ;;  %1699 = vst [vmem:[#allocation2 + $0xb1] sm:$0xff] %v1393_v0  ;;  %v1763_v37 = vsel %vm5256_vm11, %v1393_v0, 0.0  ;;  %v6829_v31 = vld [vmem:[#allocation23_spill] sm:$0xff] }
 0x1b6   : > { %vm5318_vm14 = vcmp.ne.s32.totalorder %v6815_v5, 0  ;;  %v1364_v22 = vadd.f32 1.0, %v4268_v4  ;;  %4273 = vtanh.f32 %v618_v42  ;;  %v617_v15 = vmul.f32 0.7978846, %v601_v1  ;;  %1779 = vst [vmem:[#allocation2 + $0x2ef] sm:$0xff] %v1763_v37  ;;  %v6833_v1 = vld [vmem:[#allocation18_spill] sm:$0xff] }
 0x1b7   : > { %v680_v29 = vmul.f32 %v664_v18, %v5103_v28  ;;  %4275 = vtanh.f32 %v1334_v12  ;;  %v1301_v36 = vmul.f32 0.044715, %v1285_v16  ;;  %v572_v40 = vmul.f32 %v556_v44, %v5304_v52 }
 0x1b8   : > { %v1380_v6 = vmul.f32 0.5, %v1364_v22  ;;  %v6819_v49 = vand.u32 15, %v6818_v51  ;;  %4277 = vtanh.f32 %v617_v15  ;;  %v1272_v50 = vmul.f32 %v5325_v55, %v5325_v55  ;;  %v4270_v28 = vpop.eup %4269  ;;  %v6837_v22 = vld [vmem:[#allocation39_spill] sm:$0xff] }
 0x1b9   : > { %v5341_v38 = vadd.f32 %v4980_v8, %v6822_v19  ;;  %907 = vst [vmem:[#allocation2 + $0x168] sm:$0xff] %v680_v29  ;;  %v971_v45 = vsel %vm5279_vm12, %v680_v29, 0.0  ;;  %1067 = vst [vmem:[#allocation2 + $0x287] sm:$0xff] %v680_v29  ;;  %v1317_v39 = vadd.f32 %v1301_v36, %v5300_v23  ;;  %v588_v41 = vmul.f32 0.044715, %v572_v40 }
 0x1ba   : > { %vm5333_vm15 = vcmp.ne.s32.totalorder %v6819_v49, 0  ;;  %v5348_v14 = vadd.f32 %v4980_v8, %v6823_v3  ;;  %987 = vst [vmem:[#allocation2 + $0x49] sm:$0xff] %v971_v45  ;;  %v1396_v53 = vmul.f32 %v1380_v6, %v5106_v21  ;;  %v647_v34 = vadd.f32 1.0, %v4270_v28 }
 0x1bb   : > { %v1288_v24 = vmul.f32 %v1272_v50, %v5325_v55  ;;  %v555_v26 = vmul.f32 %v5341_v38, %v5341_v38  ;;  %v1333_v25 = vmul.f32 0.7978846, %v1317_v39  ;;  %v604_v30 = vadd.f32 %v588_v41, %v5304_v52  ;;  %v4272_v13 = vpop.eup %4271 }
 0x1bc   : > { %v1271_v46 = vmul.f32 %v5348_v14, %v5348_v14  ;;  %v5359_v63 = vadd.f32 %v6824_v10, %v4980_v8  ;;  %1622 = vst [vmem:[#allocation2 + $0x1e8] sm:$0xff] %v1396_v53  ;;  %v1686_v21 = vsel %vm5294_vm13, %v1396_v53, 0.0  ;;  %1782 = vst [vmem:[#allocation2 + $0x307] sm:$0xff] %v1396_v53  ;;  %v663_v61 = vmul.f32 0.5, %v647_v34 }
 0x1bd   : > { %v6826_v2 = vand.u32 15, %v6825_v20  ;;  %v1304_v11 = vmul.f32 0.044715, %v1288_v24  ;;  %v571_v62 = vmul.f32 %v555_v26, %v5341_v38  ;;  %1702 = vst [vmem:[#allocation2 + $0xc9] sm:$0xff] %v1686_v21  ;;  %v1363_v43 = vadd.f32 1.0, %v4272_v13  ;;  %v6838_v24 = vld [vmem:[#allocation24_spill] sm:$0xff] }
 0x1be   : > { %v6830_v47 = vand.u32 15, %v6829_v31  ;;  %4279 = vtanh.f32 %v1333_v25  ;;  %v620_v9 = vmul.f32 0.7978846, %v604_v30  ;;  %v1287_v0 = vmul.f32 %v1271_v46, %v5348_v14  ;;  %v6842_v21 = vld [vmem:[#allocation19_spill] sm:$0xff] }
 0x1bf   : > { %vm5365_vm0 = vcmp.ne.s32.totalorder %v6826_v2, 15  ;;  %v679_v42 = vmul.f32 %v663_v61, %v5134_v48  ;;  %v6834_v44 = vand.u32 15, %v6833_v1  ;;  %v1320_v18 = vadd.f32 %v1304_v11, %v5325_v55  ;;  %v6846_v2 = vld [vmem:[#allocation40_spill] sm:$0xff] }
 0x1c0   : > { %vm5372_vm1 = vcmp.ne.s32.totalorder %v6830_v47, 15  ;;  %v587_v5 = vmul.f32 0.044715, %v571_v62  ;;  %v558_v12 = vmul.f32 %v5359_v63, %v5359_v63  ;;  %v1379_v16 = vmul.f32 0.5, %v1363_v43  ;;  %v4274_v48 = vpop.eup %4273  ;;  %v6847_v47 = vld [vmem:[#allocation41_spill] sm:$0xff] }
 0x1c1   : > { %vm5380_vm2 = vcmp.ne.s32.totalorder %v6834_v44, 0  ;;  %4281 = vtanh.f32 %v620_v9  ;;  %v1303_v37 = vmul.f32 0.044715, %v1287_v0  ;;  %v5389_v15 = vadd.f32 %v6837_v22, %v4980_v8  ;;  %906 = vst [vmem:[#allocation2 + $0x160] sm:$0xff] %v679_v42  ;;  %986 = vst [vmem:[#allocation2 + $0x41] sm:$0xff] %v679_v42  ;;  %v4276_v51 = vpop.eup %4275 }
 0x1c2   : > { %v1050_v29 = vsel %vm5318_vm14, %v679_v42, 0.0  ;;  %v1336_v36 = vmul.f32 0.7978846, %v1320_v18  ;;  %v603_v40 = vadd.f32 %v587_v5, %v5341_v38  ;;  %v574_v6 = vmul.f32 %v558_v12, %v5359_v63  ;;  %v4278_v45 = vpop.eup %4277  ;;  %v6848_v5 = vld [vmem:[#allocation25_spill] sm:$0xff] }
 0x1c3   : > { %1066 = vst [vmem:[#allocation2 + $0x27f] sm:$0xff] %v1050_v29  ;;  %v1395_v49 = vmul.f32 %v1379_v16, %v5148_v58  ;;  %v650_v50 = vadd.f32 1.0, %v4274_v48  ;;  %v1319_v19 = vadd.f32 %v1303_v37, %v5348_v14  ;;  %v1274_v28 = vmul.f32 %v5389_v15, %v5389_v15 }
 0x1c4   : > { %v1366_v39 = vadd.f32 1.0, %v4276_v51  ;;  %4283 = vtanh.f32 %v1336_v36  ;;  %v619_v7 = vmul.f32 0.7978846, %v603_v40  ;;  %v590_v41 = vmul.f32 0.044715, %v574_v6  ;;  %v6852_v36 = vld [vmem:[#allocation20_spill] sm:$0xff] }
 0x1c5   : > { %1621 = vst [vmem:[#allocation2 + $0x1e0] sm:$0xff] %v1395_v49  ;;  %1701 = vst [vmem:[#allocation2 + $0xc1] sm:$0xff] %v1395_v49  ;;  %v1765_v3 = vsel %vm5333_vm15, %v1395_v49, 0.0  ;;  %v666_v53 = vmul.f32 0.5, %v650_v50  ;;  %v649_v34 = vadd.f32 1.0, %v4278_v45  ;;  %v6839_v58 = vand.u32 15, %v6838_v24 }
 0x1c6   : > { %v1335_v25 = vmul.f32 0.7978846, %v1319_v19  ;;  %1781 = vst [vmem:[#allocation2 + $0x2ff] sm:$0xff] %v1765_v3  ;;  %v1382_v30 = vmul.f32 0.5, %v1366_v39  ;;  %4285 = vtanh.f32 %v619_v7  ;;  %v606_v46 = vadd.f32 %v590_v41, %v5359_v63  ;;  %v6856_v49 = vld [vmem:[#allocation27_spill] sm:$0xff] }
 0x1c7   : > { %vm5403_vm3 = vcmp.ne.s32.totalorder %v6839_v58, 0  ;;  %v1290_v10 = vmul.f32 %v1274_v28, %v5389_v15  ;;  %v682_v13 = vmul.f32 %v666_v53, %v5252_v27  ;;  %v665_v59 = vmul.f32 0.5, %v649_v34 }
 0x1c8   : > { %v6843_v61 = vand.u32 15, %v6842_v21  ;;  %4287 = vtanh.f32 %v1335_v25  ;;  %v5418_v11 = vadd.f32 %v4980_v8, %v6846_v2  ;;  %v1398_v62 = vmul.f32 %v1382_v30, %v5263_v54  ;;  %v4280_v27 = vpop.eup %4279 }
 0x1c9   : > { %v622_v43 = vmul.f32 0.7978846, %v606_v46  ;;  %v1306_v31 = vmul.f32 0.044715, %v1290_v10  ;;  %v5423_v9 = vadd.f32 %v4980_v8, %v6847_v47  ;;  %909 = vst [vmem:[#allocation2 + $0x178] sm:$0xff] %v682_v13  ;;  %v973_v0 = vsel %vm5365_vm0, %v682_v13, 0.0 }
 0x1ca   : > { %vm5412_vm4 = vcmp.ne.s32.totalorder %v6843_v61, 15  ;;  %1069 = vst [vmem:[#allocation2 + $0x297] sm:$0xff] %v682_v13  ;;  %v681_v42 = vmul.f32 %v665_v59, %v5270_v33  ;;  %v557_v1 = vmul.f32 %v5418_v11, %v5418_v11  ;;  %v5432_v54 = vadd.f32 %v5196_v17, %v4980_v8  ;;  %989 = vst [vmem:[#allocation2 + $0x59] sm:$0xff] %v973_v0  ;;  %v6860_v10 = vld [vmem:[#allocation22_spill] sm:$0xff] }
 0x1cb   : > { %1624 = vst [vmem:[#allocation2 + $0x1f8] sm:$0xff] %v1398_v62  ;;  %v1688_v44 = vsel %vm5372_vm1, %v1398_v62, 0.0  ;;  %1784 = vst [vmem:[#allocation2 + $0x317] sm:$0xff] %v1398_v62  ;;  %v1365_v18 = vadd.f32 1.0, %v4280_v27  ;;  %v6849_v60 = vand.u32 15, %v6848_v5  ;;  %4289 = vtanh.f32 %v622_v43  ;;  %v4282_v16 = vpop.eup %4281  ;;  %v6864_v5 = vld [vmem:[#allocation29_spill] sm:$0xff] }
 0x1cc   : > { %v1322_v33 = vadd.f32 %v1306_v31, %v5389_v15  ;;  %1704 = vst [vmem:[#allocation2 + $0xd9] sm:$0xff] %v1688_v44  ;;  %908 = vst [vmem:[#allocation2 + $0x170] sm:$0xff] %v681_v42  ;;  %v1052_v17 = vsel %vm5380_vm2, %v681_v42, 0.0  ;;  %v573_v32 = vmul.f32 %v557_v1, %v5418_v11  ;;  %v1273_v37 = vmul.f32 %v5423_v9, %v5423_v9 }
 0x1cd   : > { %vm5438_vm5 = vcmp.ne.s32.totalorder %v6849_v60, 15  ;;  %988 = vst [vmem:[#allocation2 + $0x51] sm:$0xff] %v681_v42  ;;  %v560_v22 = vmul.f32 %v5432_v54, %v5432_v54  ;;  %1068 = vst [vmem:[#allocation2 + $0x28f] sm:$0xff] %v1052_v17  ;;  %v1381_v48 = vmul.f32 0.5, %v1365_v18  ;;  %v652_v29 = vadd.f32 1.0, %v4282_v16 }
 0x1ce   : > { %v6853_v40 = vand.u32 15, %v6852_v36  ;;  %v1338_v51 = vmul.f32 0.7978846, %v1322_v33  ;;  %v5458_v4 = vadd.f32 %v5198_v35, %v4980_v8  ;;  %v6857_v50 = vand.u32 15, %v6856_v49  ;;  %v4284_v41 = vpop.eup %4283  ;;  %v5510_v36 = vld [vmem:[#allocation8 + $0x4] ss:$0 sm:$0xff] }
 0x1cf   : > { %v589_v28 = vmul.f32 0.044715, %v573_v32  ;;  %v1289_v45 = vmul.f32 %v1273_v37, %v5423_v9  ;;  %v576_v39 = vmul.f32 %v560_v22, %v5432_v54  ;;  %v5470_v7 = vadd.f32 %v4980_v8, %v5201_v56  ;;  %v5501_v32 = vld [vmem:[#allocation2 + $0x10] sm:$0xff]  ;;  %v5503_v37 = vld [vmem:[#allocation8 + $0x3] ss:$0 sm:$0xff] }
 0x1d0   : > { %vm5452_vm6 = vcmp.ne.s32.totalorder %v6853_v40, 0  ;;  %vm5462_vm7 = vcmp.ne.s32.totalorder %v6857_v50, 0  ;;  %v1397_v3 = vmul.f32 %v1381_v48, %v5300_v23  ;;  %v668_v35 = vmul.f32 0.5, %v652_v29  ;;  %v4286_v30 = vpop.eup %4285  ;;  %v5508_v29 = vld [vmem:[#allocation2 + $0x130] sm:$0xff]  ;;  %v5513_v50 = vld [vmem:[#allocation8 + $0x5] ss:$0 sm:$0xff] }
 0x1d1   : > { %4291 = vtanh.f32 %v1338_v51  ;;  %v1276_v53 = vmul.f32 %v5458_v4, %v5458_v4  ;;  %v1368_v34 = vadd.f32 1.0, %v4284_v41  ;;  %v605_v24 = vadd.f32 %v589_v28, %v5418_v11  ;;  %v5607_v33 = vld [vmem:[#allocation8] ss:$0 sm:$0xff] }
 0x1d2   : > { %v1305_v58 = vmul.f32 0.044715, %v1289_v45  ;;  %v592_v25 = vmul.f32 0.044715, %v576_v39  ;;  %1623 = vst [vmem:[#allocation2 + $0x1f0] sm:$0xff] %v1397_v3  ;;  %1703 = vst [vmem:[#allocation2 + $0xd1] sm:$0xff] %v1397_v3  ;;  %v684_v46 = vmul.f32 %v668_v35, %v5304_v52  ;;  %v559_v21 = vmul.f32 %v5470_v7, %v5470_v7  ;;  %v4288_v61 = vpop.eup %4287 }
 0x1d3   : > { %v1767_v56 = vsel %vm5403_vm3, %v1397_v3, 0.0  ;;  %v6861_v23 = vand.u32 15, %v6860_v10  ;;  %v1292_v59 = vmul.f32 %v1276_v53, %v5458_v4  ;;  %v1384_v2 = vmul.f32 0.5, %v1368_v34  ;;  %v5523_v39 = vld [vmem:[#allocation2 + $0x250] sm:$0xff]  ;;  %v5534_v35 = vld [vmem:[#allocation8 + $0x8] ss:$0 sm:$0xff] }
 0x1d4   : > { %1783 = vst [vmem:[#allocation2 + $0x30f] sm:$0xff] %v1767_v56  ;;  %v651_v62 = vadd.f32 1.0, %v4286_v30  ;;  %v621_v43 = vmul.f32 0.7978846, %v605_v24  ;;  %v1321_v26 = vadd.f32 %v1305_v58, %v5423_v9  ;;  %911 = vst [vmem:[#allocation2 + $0x188] sm:$0xff] %v684_v46  ;;  %v975_v52 = vsel %vm5412_vm4, %v684_v46, 0.0 }
 0x1d5   : > { %vm5481_vm8 = vcmp.ne.s32.totalorder %v6861_v23, 15  ;;  %1071 = vst [vmem:[#allocation2 + $0x2a7] sm:$0xff] %v684_v46  ;;  %v1367_v31 = vadd.f32 1.0, %v4288_v61  ;;  %v608_v47 = vadd.f32 %v592_v25, %v5432_v54  ;;  %v1308_v27 = vmul.f32 0.044715, %v1292_v59  ;;  %991 = vst [vmem:[#allocation2 + $0x69] sm:$0xff] %v975_v52  ;;  %v4290_v44 = vpop.eup %4289 }
 0x1d6   : > { %v1400_v0 = vmul.f32 %v1384_v2, %v5325_v55  ;;  %v667_v42 = vmul.f32 0.5, %v651_v62  ;;  %4293 = vtanh.f32 %v621_v43  ;;  %v1337_v1 = vmul.f32 0.7978846, %v1321_v26  ;;  %v6868_v24 = vld [vmem:[#allocation26_spill] sm:$0xff]  ;;  %v5546_v46 = vld [vmem:[#allocation2 + $0x20] sm:$0xff]  ;;  %v1902_v23 = vld [vmem:[#allocation2 + $0x248] sm:$0xff] }
 0x1d7   : > { %v1383_v18 = vmul.f32 0.5, %v1367_v31  ;;  %v6865_v60 = vand.u32 15, %v6864_v5  ;;  %v624_v20 = vmul.f32 0.7978846, %v608_v47  ;;  %v1324_v16 = vadd.f32 %v1308_v27, %v5458_v4  ;;  %v6872_v30 = vld [vmem:[#allocation34_spill] sm:$0xff]  ;;  %v5548_v10 = vld [vmem:[#allocation2 + $0x140] sm:$0xff] }
 0x1d8   : > { %v575_v17 = vmul.f32 %v559_v21, %v5470_v7  ;;  %1626 = vst [vmem:[#allocation2 + $0x208] sm:$0xff] %v1400_v0  ;;  %v1690_v55 = vsel %vm5438_vm5, %v1400_v0, 0.0  ;;  %1786 = vst [vmem:[#allocation2 + $0x327] sm:$0xff] %v1400_v0  ;;  %v683_v22 = vmul.f32 %v667_v42, %v5341_v38  ;;  %v654_v48 = vadd.f32 1.0, %v4290_v44  ;;  %v6873_v21 = vld [vmem:[#allocation33_spill] sm:$0xff]  ;;  %v6874_v61 = vld [vmem:[#allocation35_spill] sm:$0xff] }
 0x1d9   : > { %vm5495_vm9 = vcmp.ne.s32.totalorder %v6865_v60, 15  ;;  %4295 = vtanh.f32 %v1337_v1  ;;  %1706 = vst [vmem:[#allocation2 + $0xe9] sm:$0xff] %v1690_v55  ;;  %v1399_v40 = vmul.f32 %v1383_v18, %v5348_v14  ;;  %v1340_v51 = vmul.f32 0.7978846, %v1324_v16  ;;  %v5525_v14 = vld [vmem:[#allocation8 + $0x7] ss:$0 sm:$0xff] }
 0x1da   : > { %4297 = vtanh.f32 %v624_v20  ;;  %v591_v49 = vmul.f32 0.044715, %v575_v17  ;;  %910 = vst [vmem:[#allocation2 + $0x180] sm:$0xff] %v683_v22  ;;  %990 = vst [vmem:[#allocation2 + $0x61] sm:$0xff] %v683_v22  ;;  %v1054_v12 = vsel %vm5452_vm6, %v683_v22, 0.0  ;;  %v670_v38 = vmul.f32 0.5, %v654_v48 }
 0x1db   : > { %v5519_v28 = vadd.f32 %v4980_v8, %v5203_v57  ;;  %v1976_v45 = vmul.f32 %v5503_v37, %v5501_v32  ;;  %v4292_v41 = vpop.eup %4291  ;;  %1070 = vst [vmem:[#allocation2 + $0x29f] sm:$0xff] %v1054_v12  ;;  %1625 = vst [vmem:[#allocation2 + $0x200] sm:$0xff] %v1399_v40  ;;  %v1769_v6 = vsel %vm5462_vm7, %v1399_v40, 0.0  ;;  %4299 = vtanh.f32 %v1340_v51  ;;  %v5532_v57 = vld [vmem:[#allocation8 + $0x6] ss:$0 sm:$0xff]  ;;  %v5565_v1 = vld [vmem:[#allocation2 + $0x18] sm:$0xff] }
 0x1dc   : > { %1705 = vst [vmem:[#allocation2 + $0xe1] sm:$0xff] %v1399_v40  ;;  %v607_v3 = vadd.f32 %v591_v49, %v5470_v7  ;;  %v2029_v8 = vmul.f32 %v5510_v36, %v5508_v29  ;;  %1785 = vst [vmem:[#allocation2 + $0x31f] sm:$0xff] %v1769_v6  ;;  %v686_v53 = vmul.f32 %v670_v38, %v5359_v63  ;;  %v1370_v34 = vadd.f32 1.0, %v4292_v41  ;;  %v5554_v43 = vld [vmem:[#allocation2 + $0x260] sm:$0xff]  ;;  %v5567_v44 = vld [vmem:[#allocation2 + $0x138] sm:$0xff] }
 0x1dd   : > { %v6869_v58 = vand.u32 15, %v6868_v24  ;;  %v1275_v19 = vmul.f32 %v5519_v28, %v5519_v28  ;;  %v1992_v56 = vadd.f32 %v1976_v45, %v6872_v30  ;;  %v808_v63 = vand.u32 15, %v6873_v21  ;;  %v6875_v31 = vld [vmem:[#allocation31_spill] sm:$0xff]  ;;  %v6879_v18 = vld [vmem:[#allocation28_spill] sm:$0xff]  ;;  %v5582_v55 = vld [vmem:[#allocation2 + $0x258] sm:$0xff] }
 0x1de   : > { %v623_v59 = vmul.f32 0.7978846, %v607_v3  ;;  %v1523_v2 = vand.u32 15, %v6874_v61  ;;  %v2084_v62 = vmul.f32 %v5513_v50, %v5523_v39  ;;  %913 = vst [vmem:[#allocation2 + $0x198] sm:$0xff] %v686_v53  ;;  %v977_v26 = vsel %vm5481_vm8, %v686_v53, 0.0  ;;  %1073 = vst [vmem:[#allocation2 + $0x2b7] sm:$0xff] %v686_v53 }
 0x1df   : > { %vm5539_vm10 = vcmp.ne.s32.totalorder %v6869_v58, 0  ;;  %v1386_v52 = vmul.f32 0.5, %v1370_v34  ;;  %v6876_v47 = vand.u32 15, %v6875_v31  ;;  %v1291_v0 = vmul.f32 %v1275_v19, %v5519_v28  ;;  %993 = vst [vmem:[#allocation2 + $0x79] sm:$0xff] %v977_v26  ;;  %v5579_v16 = vld [vmem:[#allocation8 + $0x2] ss:$0 sm:$0xff] }
 0x1e0   : > { %v2045_v42 = vadd.f32 %v2029_v8, %v1992_v56  ;;  %v6880_v5 = vand.u32 15, %v6879_v18  ;;  %4301 = vtanh.f32 %v623_v59  ;;  %v2138_v60 = vmul.f32 %v5532_v57, %v5546_v46  ;;  %v4294_v22 = vpop.eup %4293  ;;  %v5587_v12 = vld [vmem:[#allocation2 + $0x28] sm:$0xff]  ;;  %v6887_v3 = vld [vmem:[#allocation30_spill] sm:$0xff] }
 0x1e1   : > { %vm5560_vm11 = vcmp.ne.s32.totalorder %v6876_v47, 0  ;;  %v2193_v20 = vmul.f32 %v5525_v14, %v5548_v10  ;;  %v1923_v17 = vmul.f32 %v5579_v16, %v1902_v23  ;;  %v1402_v48 = vmul.f32 %v1386_v52, %v5389_v15  ;;  %v6883_v45 = vld [vmem:[#allocation32_spill] sm:$0xff] }
 0x1e2   : > { %vm5571_vm12 = vcmp.ne.s32.totalorder %v6880_v5, 15  ;;  %v1307_v40 = vmul.f32 0.044715, %v1291_v0  ;;  %v2100_v51 = vadd.f32 %v2084_v62, %v2045_v42  ;;  %v2248_v49 = vmul.f32 %v5534_v35, %v5554_v43 }
 0x1e3   : > { %v653_v38 = vadd.f32 1.0, %v4294_v22  ;;  %v6884_v41 = vand.u32 15, %v6883_v45  ;;  %v1939_v8 = vadd.f32 %v1923_v17, %v6887_v3  ;;  %v1977_v53 = vmul.f32 %v5503_v37, %v5565_v1  ;;  %v4296_v34 = vpop.eup %4295  ;;  %1628 = vst [vmem:[#allocation2 + $0x218] sm:$0xff] %v1402_v48  ;;  %1788 = vst [vmem:[#allocation2 + $0x337] sm:$0xff] %v1402_v48 }
 0x1e4   : > { %v2030_v15 = vmul.f32 %v5510_v36, %v5567_v44  ;;  %v1692_v24 = vsel %vm5495_vm9, %v1402_v48, 0.0  ;;  %v1323_v58 = vadd.f32 %v1307_v40, %v5519_v28  ;;  %v2154_v19 = vadd.f32 %v2138_v60, %v2100_v51  ;;  %v4298_v56 = vpop.eup %4297  ;;  %v5619_v60 = vld [vmem:[%s6707_s4] ss:$0 sm:$0xff]  ;;  %v5625_v40 = vld [vmem:[#allocation2 + $0x148] sm:$0xff] }
 0x1e5   : > { %vm5591_vm13 = vcmp.ne.s32.totalorder %v6884_v41, 15  ;;  %v2085_v30 = vmul.f32 %v5513_v50, %v5582_v55  ;;  %1708 = vst [vmem:[#allocation2 + $0xf9] sm:$0xff] %v1692_v24  ;;  %v669_v23 = vmul.f32 0.5, %v653_v38  ;;  %v1369_v59 = vadd.f32 1.0, %v4296_v34  ;;  %v4300_v0 = vpop.eup %4299 }
 0x1e6   : > { %v1993_v21 = vadd.f32 %v1977_v53, %v1939_v8  ;;  %v2139_v62 = vmul.f32 %v5532_v57, %v5587_v12  ;;  %v656_v26 = vadd.f32 1.0, %v4298_v56  ;;  %v1339_v52 = vmul.f32 0.7978846, %v1323_v58  ;;  %v5634_v8 = vld [vmem:[#allocation2 + $0x268] sm:$0xff]  ;;  %v5649_v58 = vld [vmem:[#allocation2 + $0x30] sm:$0xff] }
 0x1e7   : > { %v2209_v31 = vadd.f32 %v2193_v20, %v2154_v19  ;;  %v1814_v47 = vmul.f32 %v5607_v33, %v5501_v32  ;;  %v685_v42 = vmul.f32 %v669_v23, %v5418_v11  ;;  %v1385_v18 = vmul.f32 0.5, %v1369_v59  ;;  %v5621_v20 = vld [vmem:[#allocation8 + $0x1] ss:$0 sm:$0xff] }
 0x1e8   : > { %vm5612_vm14 = vcmp.ne.s32.totalorder %v808_v63, 0  ;;  %v2046_v17 = vadd.f32 %v2030_v15, %v1993_v21  ;;  %v1869_v22 = vmul.f32 %v5621_v20, %v5508_v29  ;;  %v672_v32 = vmul.f32 0.5, %v656_v26  ;;  %v5666_v26 = vld [vmem:[#allocation2 + $0x150] sm:$0xff] }
 0x1e9   : > { %v1372_v48 = vadd.f32 1.0, %v4300_v0  ;;  %4303 = vtanh.f32 %v1339_v52  ;;  %v2264_v11 = vadd.f32 %v2248_v49, %v2209_v31  ;;  %912 = vst [vmem:[#allocation2 + $0x190] sm:$0xff] %v685_v42  ;;  %992 = vst [vmem:[#allocation2 + $0x71] sm:$0xff] %v685_v42  ;;  %v1056_v63 = vsel %vm5539_vm10, %v685_v42, 0.0  ;;  %v5668_v52 = vld [vmem:[#allocation2 + $0x270] sm:$0xff] }
 0x1ea   : > { %v1401_v51 = vmul.f32 %v1385_v18, %v5423_v9  ;;  %v2101_v38 = vadd.f32 %v2085_v30, %v2046_v17  ;;  %v1885_v45 = vadd.f32 %v1869_v22, %v1814_v47  ;;  %1072 = vst [vmem:[#allocation2 + $0x2af] sm:$0xff] %v1056_v63  ;;  %v688_v41 = vmul.f32 %v672_v32, %v5432_v54  ;;  %v4302_v53 = vpop.eup %4301 }
 0x1eb   : > { %v1388_v3 = vmul.f32 0.5, %v1372_v48  ;;  %v5632_v29 = vadd.f32 %v5619_v60, %v2264_v11  ;;  %v1924_v49 = vmul.f32 %v5579_v16, %v5523_v39  ;;  %v2194_v15 = vmul.f32 %v5525_v14, %v5625_v40 }
 0x1ec   : > { %1627 = vst [vmem:[#allocation2 + $0x210] sm:$0xff] %v1401_v51  ;;  %1707 = vst [vmem:[#allocation2 + $0xf1] sm:$0xff] %v1401_v51  ;;  %v1771_v9 = vsel %vm5560_vm11, %v1401_v51, 0.0  ;;  %v2155_v25 = vadd.f32 %v2139_v62, %v2101_v38  ;;  %v1978_v54 = vmul.f32 %v5503_v37, %v5546_v46  ;;  %v979_v34 = vsel %vm5571_vm12, %v688_v41, 0.0 }
 0x1ed   : > { %1787 = vst [vmem:[#allocation2 + $0x32f] sm:$0xff] %v1771_v9  ;;  %915 = vst [vmem:[#allocation2 + $0x1a8] sm:$0xff] %v688_v41  ;;  %v1404_v39 = vmul.f32 %v1388_v3, %v5458_v4  ;;  %v655_v24 = vadd.f32 1.0, %v4302_v53  ;;  %v2303_v27 = vmul.f32 %v5632_v29, %v5632_v29  ;;  %v2249_v30 = vmul.f32 %v5534_v35, %v5634_v8  ;;  %v5701_v9 = vld [vmem:[#allocation2 + $0x158] sm:$0xff] }
 0x1ee   : > { %1075 = vst [vmem:[#allocation2 + $0x2c7] sm:$0xff] %v688_v41  ;;  %995 = vst [vmem:[#allocation2 + $0x89] sm:$0xff] %v979_v34  ;;  %v2210_v19 = vadd.f32 %v2194_v15, %v2155_v25  ;;  %v1940_v56 = vadd.f32 %v1924_v49, %v1885_v45  ;;  %v2031_v23 = vmul.f32 %v5510_v36, %v5548_v10  ;;  %vm5659_vm15 = vcmp.ne.s32.totalorder %v1523_v2, 0  ;;  %v5704_v34 = vld [vmem:[#allocation2 + $0x278] sm:$0xff] }
 0x1ef   : > { %1630 = vst [vmem:[#allocation2 + $0x228] sm:$0xff] %v1404_v39  ;;  %v1694_v13 = vsel %vm5591_vm13, %v1404_v39, 0.0  ;;  %1790 = vst [vmem:[#allocation2 + $0x347] sm:$0xff] %v1404_v39  ;;  %v671_v4 = vmul.f32 0.5, %v655_v24  ;;  %v2319_v21 = vmul.f32 %v2303_v27, %v5632_v29  ;;  %v2086_v62 = vmul.f32 %v5513_v50, %v5554_v43 }
 0x1f0   : > { %1710 = vst [vmem:[#allocation2 + $0x109] sm:$0xff] %v1694_v13  ;;  %v2265_v6 = vadd.f32 %v2249_v30, %v2210_v19  ;;  %v1994_v31 = vadd.f32 %v1978_v54, %v1940_v56  ;;  %v2140_v47 = vmul.f32 %v5532_v57, %v5649_v58  ;;  %v1815_v61 = vmul.f32 %v5607_v33, %v5565_v1  ;;  %v5686_v1 = vld [vmem:[#allocation2 + $0x38] sm:$0xff] }
 0x1f1   : > { %v687_v2 = vmul.f32 %v671_v4, %v5470_v7  ;;  %v2335_v0 = vmul.f32 0.044715, %v2319_v21  ;;  %v1870_v42 = vmul.f32 %v5621_v20, %v5567_v44  ;;  %v1925_v18 = vmul.f32 %v5579_v16, %v5582_v55  ;;  %v5715_v4 = vld [vmem:[#allocation2 + $0x40] sm:$0xff] }
 0x1f2   : > { %v5680_v17 = vadd.f32 %v5619_v60, %v2265_v6  ;;  %v2047_v22 = vadd.f32 %v2031_v23, %v1994_v31  ;;  %v2195_v32 = vmul.f32 %v5525_v14, %v5666_v26  ;;  %v2250_v48 = vmul.f32 %v5534_v35, %v5668_v52 }
 0x1f3   : > { %v4304_v7 = vpop.eup %4303  ;;  %914 = vst [vmem:[#allocation2 + $0x1a0] sm:$0xff] %v687_v2  ;;  %994 = vst [vmem:[#allocation2 + $0x81] sm:$0xff] %v687_v2  ;;  %v1058_v44 = vsel %vm5612_vm14, %v687_v2, 0.0  ;;  %v2351_v55 = vadd.f32 %v2335_v0, %v5632_v29  ;;  %v1886_v11 = vadd.f32 %v1870_v42, %v1815_v61  ;;  %v1979_v63 = vmul.f32 %v5503_v37, %v5587_v12 }
 0x1f4   : > { %1074 = vst [vmem:[#allocation2 + $0x2bf] sm:$0xff] %v1058_v44  ;;  %v1371_v51 = vadd.f32 1.0, %v4304_v7  ;;  %v2304_v38 = vmul.f32 %v5680_v17, %v5680_v17  ;;  %v2102_v45 = vadd.f32 %v2086_v62, %v2047_v22  ;;  %v2032_v41 = vmul.f32 %v5510_v36, %v5625_v40 }
 0x1f5   : > { %v2367_v3 = vmul.f32 0.7978846, %v2351_v55  ;;  %v1941_v49 = vadd.f32 %v1925_v18, %v1886_v11  ;;  %v2087_v5 = vmul.f32 %v5513_v50, %v5634_v8  ;;  %v2141_v53 = vmul.f32 %v5532_v57, %v5686_v1  ;;  %v5732_v18 = vld [vmem:[#allocation2 + $0x280] sm:$0xff] }
 0x1f6   : > { %v1387_v25 = vmul.f32 0.5, %v1371_v51  ;;  %v2320_v15 = vmul.f32 %v2304_v38, %v5680_v17  ;;  %v2156_v54 = vadd.f32 %v2140_v47, %v2102_v45  ;;  %v1816_v39 = vmul.f32 %v5607_v33, %v5546_v46  ;;  %v5726_v47 = vld [vmem:[#allocation2 + $0x160] sm:$0xff] }
 0x1f7   : > { %4305 = vtanh.f32 %v2367_v3  ;;  %v1995_v24 = vadd.f32 %v1979_v63, %v1941_v49  ;;  %v1871_v27 = vmul.f32 %v5621_v20, %v5548_v10  ;;  %v1926_v19 = vmul.f32 %v5579_v16, %v5554_v43  ;;  %v5745_v63 = vld [vmem:[#allocation2 + $0x48] sm:$0xff] }
 0x1f8   : > { %v1403_v30 = vmul.f32 %v1387_v25, %v5519_v28  ;;  %v2336_v56 = vmul.f32 0.044715, %v2320_v15  ;;  %v2211_v23 = vadd.f32 %v2195_v32, %v2156_v54  ;;  %v2196_v13 = vmul.f32 %v5525_v14, %v5701_v9 }
 0x1f9   : > { %v2048_v21 = vadd.f32 %v2032_v41, %v1995_v24  ;;  %v2251_v46 = vmul.f32 %v5534_v35, %v5704_v34  ;;  %v1887_v62 = vadd.f32 %v1871_v27, %v1816_v39  ;;  %v1980_v10 = vmul.f32 %v5503_v37, %v5649_v58  ;;  %v5760_v39 = vld [vmem:[#allocation2 + $0x168] sm:$0xff] }
 0x1fa   : > { %1629 = vst [vmem:[#allocation2 + $0x220] sm:$0xff] %v1403_v30  ;;  %1709 = vst [vmem:[#allocation2 + $0x101] sm:$0xff] %v1403_v30  ;;  %v1773_v28 = vsel %vm5659_vm15, %v1403_v30, 0.0  ;;  %v2352_v43 = vadd.f32 %v2336_v56, %v5680_v17  ;;  %v2266_v6 = vadd.f32 %v2250_v48, %v2211_v23  ;;  %v2033_v31 = vmul.f32 %v5510_v36, %v5666_v26  ;;  %v5766_v23 = vld [vmem:[#allocation2 + $0x288] sm:$0xff] }
 0x1fb   : > { %1789 = vst [vmem:[#allocation2 + $0x33f] sm:$0xff] %v1773_v28  ;;  %v2103_v61 = vadd.f32 %v2087_v5, %v2048_v21  ;;  %v1942_v2 = vadd.f32 %v1926_v19, %v1887_v62  ;;  %v2088_v0 = vmul.f32 %v5513_v50, %v5668_v52  ;;  %v2142_v42 = vmul.f32 %v5532_v57, %v5715_v4 }
 0x1fc   : > { %v2368_v59 = vmul.f32 0.7978846, %v2352_v43  ;;  %v5735_v22 = vadd.f32 %v5619_v60, %v2266_v6  ;;  %v1817_v32 = vmul.f32 %v5607_v33, %v5587_v12  ;;  %v1872_v48 = vmul.f32 %v5621_v20, %v5625_v40 }
 0x1fd   : > { %v2157_v7 = vadd.f32 %v2141_v53, %v2103_v61  ;;  %v1996_v44 = vadd.f32 %v1980_v10, %v1942_v2  ;;  %v2197_v55 = vmul.f32 %v5525_v14, %v5726_v47  ;;  %v1927_v11 = vmul.f32 %v5579_v16, %v5634_v8  ;;  %v5782_v2 = vld [vmem:[#allocation2 + $0x50] sm:$0xff] }
 0x1fe   : > { %4307 = vtanh.f32 %v2368_v59  ;;  %v2305_v51 = vmul.f32 %v5735_v22, %v5735_v22  ;;  %v2252_v12 = vmul.f32 %v5534_v35, %v5732_v18  ;;  %v1888_v38 = vadd.f32 %v1872_v48, %v1817_v32 }
 0x1ff   : > { %v2212_v45 = vadd.f32 %v2196_v13, %v2157_v7  ;;  %v2049_v40 = vadd.f32 %v2033_v31, %v1996_v44  ;;  %v1981_v41 = vmul.f32 %v5503_v37, %v5686_v1  ;;  %v2034_v3 = vmul.f32 %v5510_v36, %v5701_v9 }
 0x200   : > { %v2321_v8 = vmul.f32 %v2305_v51, %v5735_v22  ;;  %v1943_v49 = vadd.f32 %v1927_v11, %v1888_v38  ;;  %v2089_v5 = vmul.f32 %v5513_v50, %v5704_v34  ;;  %v2143_v53 = vmul.f32 %v5532_v57, %v5745_v63  ;;  %v5790_v11 = vld [vmem:[#allocation2 + $0x170] sm:$0xff] }
 0x201   : > { %v4306_v25 = vpop.eup %4305  ;;  %v2267_v15 = vadd.f32 %v2251_v46, %v2212_v45  ;;  %v2104_v54 = vadd.f32 %v2088_v0, %v2049_v40  ;;  %v1818_v24 = vmul.f32 %v5607_v33, %v5649_v58  ;;  %v1873_v27 = vmul.f32 %v5621_v20, %v5666_v26 }
 0x202   : > { %v2399_v19 = vadd.f32 1.0, %v4306_v25  ;;  %v2337_v30 = vmul.f32 0.044715, %v2321_v8  ;;  %v1997_v56 = vadd.f32 %v1981_v41, %v1943_v49  ;;  %v1928_v13 = vmul.f32 %v5579_v16, %v5668_v52  ;;  %v5799_v8 = vld [vmem:[#allocation2 + $0x290] sm:$0xff] }
 0x203   : > { %v5771_v21 = vadd.f32 %v5619_v60, %v2267_v15  ;;  %v2158_v46 = vadd.f32 %v2142_v42, %v2104_v54  ;;  %v1889_v62 = vadd.f32 %v1873_v27, %v1818_v24  ;;  %v1982_v10 = vmul.f32 %v5503_v37, %v5715_v4 }
 0x204   : > { %v2415_v58 = vmul.f32 0.5, %v2399_v19  ;;  %v2353_v28 = vadd.f32 %v2337_v30, %v5735_v22  ;;  %v2050_v26 = vadd.f32 %v2034_v3, %v1997_v56  ;;  %v2198_v43 = vmul.f32 %v5525_v14, %v5760_v39 }
 0x205   : > { %v2306_v6 = vmul.f32 %v5771_v21, %v5771_v21  ;;  %v2213_v31 = vadd.f32 %v2197_v55, %v2158_v46  ;;  %v2253_v52 = vmul.f32 %v5534_v35, %v5766_v23  ;;  %v1944_v61 = vadd.f32 %v1928_v13, %v1889_v62  ;;  %v5814_v13 = vld [vmem:[#allocation2 + $0x58] sm:$0xff] }
 0x206   : > { %v2431_v0 = vmul.f32 %v2415_v58, %v5632_v29  ;;  %v2369_v42 = vmul.f32 0.7978846, %v2353_v28  ;;  %v2105_v59 = vadd.f32 %v2089_v5, %v2050_v26  ;;  %v2035_v32 = vmul.f32 %v5510_v36, %v5726_v47 }
 0x207   : > { %v2322_v48 = vmul.f32 %v2306_v6, %v5771_v21  ;;  %v2268_v7 = vadd.f32 %v2252_v12, %v2213_v31  ;;  %v1998_v44 = vadd.f32 %v1982_v10, %v1944_v61  ;;  %v2090_v55 = vmul.f32 %v5513_v50, %v5732_v18 }
 0x208   : > { %v4308_v51 = vpop.eup %4307  ;;  %3951 = vmatprep.mubr.f32.mxu0 %v2431_v0  ;;  %4309 = vtanh.f32 %v2369_v42  ;;  %v2159_v38 = vadd.f32 %v2143_v53, %v2105_v59  ;;  %v2144_v29 = vmul.f32 %v5532_v57, %v5782_v2  ;;  %v1819_v45 = vmul.f32 %v5607_v33, %v5686_v1  ;;  %v5831_v0 = vld [vmem:[#allocation2 + $0x298] sm:$0xff] }
 0x209   : > { %v2400_v40 = vadd.f32 1.0, %v4308_v51  ;;  %v2338_v41 = vmul.f32 0.044715, %v2322_v48  ;;  %v5797_v12 = vadd.f32 %v5619_v60, %v2268_v7  ;;  %v2051_v3 = vadd.f32 %v2035_v32, %v1998_v44 }
 0x20a   : > { %v2214_v49 = vadd.f32 %v2198_v43, %v2159_v38  ;;  %v2199_v5 = vmul.f32 %v5525_v14, %v5790_v11  ;;  %v1874_v53 = vmul.f32 %v5621_v20, %v5701_v9  ;;  %v1929_v25 = vmul.f32 %v5579_v16, %v5704_v34  ;;  %v5825_v43 = vld [vmem:[#allocation2 + $0x178] sm:$0xff] }
 0x20b   : > { %v2416_v15 = vmul.f32 0.5, %v2400_v40  ;;  %v2354_v1 = vadd.f32 %v2338_v41, %v5771_v21  ;;  %v2307_v54 = vmul.f32 %v5797_v12, %v5797_v12  ;;  %v2106_v24 = vadd.f32 %v2090_v55, %v2051_v3  ;;  %v5850_v3 = vld [vmem:[#allocation2 + $0x60] sm:$0xff] }
 0x20c   : > { %v2269_v27 = vadd.f32 %v2253_v52, %v2214_v49  ;;  %v2254_v19 = vmul.f32 %v5534_v35, %v5799_v8  ;;  %v1890_v30 = vadd.f32 %v1874_v53, %v1819_v45  ;;  %v1983_v56 = vmul.f32 %v5503_v37, %v5745_v63 }
 0x20d   : > { %v2432_v9 = vmul.f32 %v2416_v15, %v5680_v17  ;;  %v2370_v34 = vmul.f32 0.7978846, %v2354_v1  ;;  %v2323_v46 = vmul.f32 %v2307_v54, %v5797_v12  ;;  %v2160_v62 = vadd.f32 %v2144_v29, %v2106_v24 }
 0x20e   : > { %v5819_v10 = vadd.f32 %v5619_v60, %v2269_v27  ;;  %v1945_v58 = vadd.f32 %v1929_v25, %v1890_v30  ;;  %v2036_v28 = vmul.f32 %v5510_v36, %v5760_v39  ;;  %v2091_v26 = vmul.f32 %v5513_v50, %v5766_v23  ;;  %v5861_v30 = vld [vmem:[#allocation2 + $0x180] sm:$0xff] }
 0x20f   : > { %3952 = vmatmul.mubr.f32.vlgmr.msra.gmra.mrb[16].mxu0 %v2432_v9  ;;  %4311 = vtanh.f32 %v2370_v34  ;;  %v2339_v6 = vmul.f32 0.044715, %v2323_v46  ;;  %v2215_v17 = vadd.f32 %v2199_v5, %v2160_v62  ;;  %v2145_v31 = vmul.f32 %v5532_v57, %v5814_v13 }
 0x210   : > { %v2308_v52 = vmul.f32 %v5819_v10, %v5819_v10  ;;  %v1999_v61 = vadd.f32 %v1983_v56, %v1945_v58  ;;  %v1820_v42 = vmul.f32 %v5607_v33, %v5715_v4  ;;  %v1875_v59 = vmul.f32 %v5621_v20, %v5726_v47  ;;  %v5863_v56 = vld [vmem:[#allocation2 + $0x2a0] sm:$0xff] }
 0x211   : > { %v2355_v32 = vadd.f32 %v2339_v6, %v5797_v12  ;;  %v2270_v48 = vadd.f32 %v2254_v19, %v2215_v17  ;;  %v2200_v7 = vmul.f32 %v5525_v14, %v5825_v43  ;;  %v1930_v44 = vmul.f32 %v5579_v16, %v5732_v18 }
 0x212   : > { %v4310_v55 = vpop.eup %4309  ;;  %v2324_v51 = vmul.f32 %v2308_v52, %v5819_v10  ;;  %v2052_v38 = vadd.f32 %v2036_v28, %v1999_v61  ;;  %v1891_v29 = vadd.f32 %v1875_v59, %v1820_v42  ;;  %v1984_v4 = vmul.f32 %v5503_v37, %v5782_v2  ;;  %v5877_v59 = vld [vmem:[#allocation2 + $0x68] sm:$0xff] }
 0x213   : > { %v2401_v45 = vadd.f32 1.0, %v4310_v55  ;;  %v2371_v40 = vmul.f32 0.7978846, %v2355_v32  ;;  %v5846_v47 = vadd.f32 %v5619_v60, %v2270_v48  ;;  %v2255_v41 = vmul.f32 %v5534_v35, %v5831_v0 }
 0x214   : > { %v2340_v49 = vmul.f32 0.044715, %v2324_v51  ;;  %v2107_v18 = vadd.f32 %v2091_v26, %v2052_v38  ;;  %v1946_v5 = vadd.f32 %v1930_v44, %v1891_v29  ;;  %v2037_v53 = vmul.f32 %v5510_v36, %v5790_v11 }
 0x215   : > { %v2417_v25 = vmul.f32 0.5, %v2401_v45  ;;  %4313 = vtanh.f32 %v2371_v40  ;;  %v2309_v15 = vmul.f32 %v5846_v47, %v5846_v47  ;;  %v2092_v1 = vmul.f32 %v5513_v50, %v5799_v8 }
 0x216   : > { %v2356_v54 = vadd.f32 %v2340_v49, %v5819_v10  ;;  %v2161_v24 = vadd.f32 %v2145_v31, %v2107_v18  ;;  %v2000_v27 = vadd.f32 %v1984_v4, %v1946_v5  ;;  %v2146_v19 = vmul.f32 %v5532_v57, %v5850_v3  ;;  %v5896_v5 = vld [vmem:[#allocation2 + $0x188] sm:$0xff] }
 0x217   : > { %v2433_v9 = vmul.f32 %v2417_v25, %v5735_v22  ;;  %v2325_v34 = vmul.f32 %v2309_v15, %v5846_v47  ;;  %v1821_v46 = vmul.f32 %v5607_v33, %v5745_v63  ;;  %v1876_v62 = vmul.f32 %v5621_v20, %v5760_v39 }
 0x218   : > { %v2372_v58 = vmul.f32 0.7978846, %v2356_v54  ;;  %v2216_v28 = vadd.f32 %v2200_v7, %v2161_v24  ;;  %v2053_v26 = vadd.f32 %v2037_v53, %v2000_v27  ;;  %v1931_v6 = vmul.f32 %v5579_v16, %v5766_v23  ;;  %v5898_v53 = vld [vmem:[#allocation2 + $0x2a8] sm:$0xff] }
 0x219   : > { %v4312_v17 = vpop.eup %4311  ;;  %3954 = vmatprep.mubr.f32.mxu0 %v2433_v9  ;;  %v2341_v31 = vmul.f32 0.044715, %v2325_v34  ;;  %v2201_v22 = vmul.f32 %v5525_v14, %v5861_v30  ;;  %v2256_v52 = vmul.f32 %v5534_v35, %v5863_v56  ;;  %v1892_v61 = vadd.f32 %v1876_v62, %v1821_v46  ;;  %v5907_v9 = vld [vmem:[#allocation2 + $0x70] sm:$0xff] }
 0x21a   : > { %v2402_v63 = vadd.f32 1.0, %v4312_v17  ;;  %4315 = vtanh.f32 %v2372_v58  ;;  %v2271_v42 = vadd.f32 %v2255_v41, %v2216_v28  ;;  %v2108_v39 = vadd.f32 %v2092_v1, %v2053_v26 }
 0x21b   : > { %v2357_v32 = vadd.f32 %v2341_v31, %v5846_v47  ;;  %v1947_v48 = vadd.f32 %v1931_v6, %v1892_v61  ;;  %v1985_v23 = vmul.f32 %v5503_v37, %v5814_v13  ;;  %v2038_v7 = vmul.f32 %v5510_v36, %v5825_v43 }
 0x21c   : > { %v2418_v44 = vmul.f32 0.5, %v2402_v63  ;;  %v5885_v55 = vadd.f32 %v5619_v60, %v2271_v42  ;;  %v2162_v51 = vadd.f32 %v2146_v19, %v2108_v39  ;;  %v2093_v38 = vmul.f32 %v5513_v50, %v5831_v0 }
 0x21d   : > { %v2373_v29 = vmul.f32 0.7978846, %v2357_v32  ;;  %v2001_v4 = vadd.f32 %v1985_v23, %v1947_v48  ;;  %v2147_v45 = vmul.f32 %v5532_v57, %v5877_v59  ;;  %v1822_v40 = vmul.f32 %v5607_v33, %v5782_v2  ;;  %v5930_v48 = vld [vmem:[#allocation2 + $0x2b0] sm:$0xff] }
 0x21e   : > { %v2434_v41 = vmul.f32 %v2418_v44, %v5771_v21  ;;  %v2310_v49 = vmul.f32 %v5885_v55, %v5885_v55  ;;  %v2217_v18 = vadd.f32 %v2201_v22, %v2162_v51  ;;  %v1877_v25 = vmul.f32 %v5621_v20, %v5790_v11  ;;  %v5922_v22 = vld [vmem:[#allocation2 + $0x190] sm:$0xff] }
 0x21f   : > { %v4314_v15 = vpop.eup %4313  ;;  %4317 = vtanh.f32 %v2373_v29  ;;  %v2054_v1 = vadd.f32 %v2038_v7, %v2001_v4  ;;  %v1932_v54 = vmul.f32 %v5579_v16, %v5799_v8  ;;  %v1986_v21 = vmul.f32 %v5503_v37, %v5850_v3 }
 0x220   : > { %3955 = vmatmul.mubr.f32.gmra.mrb[18].mxu0 %v2434_v41  ;;  %v2403_v2 = vadd.f32 1.0, %v4314_v15  ;;  %v2326_v24 = vmul.f32 %v2310_v49, %v5885_v55  ;;  %v2272_v27 = vadd.f32 %v2256_v52, %v2217_v18  ;;  %v1893_v19 = vadd.f32 %v1877_v25, %v1822_v40  ;;  %v5943_v18 = vld [vmem:[#allocation2 + $0x78] sm:$0xff] }
 0x221   : > { %v2109_v34 = vadd.f32 %v2093_v38, %v2054_v1  ;;  %v2202_v11 = vmul.f32 %v5525_v14, %v5896_v5  ;;  %v2257_v46 = vmul.f32 %v5534_v35, %v5898_v53  ;;  %v2039_v8 = vmul.f32 %v5510_v36, %v5861_v30 }
 0x222   : > { %v2419_v62 = vmul.f32 0.5, %v2403_v2  ;;  %v2342_v58 = vmul.f32 0.044715, %v2326_v24  ;;  %v5916_v28 = vadd.f32 %v5619_v60, %v2272_v27  ;;  %v1948_v26 = vadd.f32 %v1932_v54, %v1893_v19 }
 0x223   : > { %v2163_v6 = vadd.f32 %v2147_v45, %v2109_v34  ;;  %v2094_v17 = vmul.f32 %v5513_v50, %v5863_v56  ;;  %v2148_v31 = vmul.f32 %v5532_v57, %v5907_v9  ;;  %v1823_v52 = vmul.f32 %v5607_v33, %v5814_v13 }
 0x224   : > { %v4316_v61 = vpop.eup %4315  ;;  %v2435_v63 = vmul.f32 %v2419_v62, %v5797_v12  ;;  %v2358_v42 = vadd.f32 %v2342_v58, %v5885_v55  ;;  %v2311_v39 = vmul.f32 %v5916_v28, %v5916_v28  ;;  %v2002_v32 = vadd.f32 %v1986_v21, %v1948_v26  ;;  %v5960_v26 = vld [vmem:[#allocation2 + $0x198] sm:$0xff] }
 0x225   : > { %v2404_v23 = vadd.f32 1.0, %v4316_v61  ;;  %v2218_v7 = vadd.f32 %v2202_v11, %v2163_v6  ;;  %v1878_v44 = vmul.f32 %v5621_v20, %v5825_v43  ;;  %v1933_v51 = vmul.f32 %v5579_v16, %v5831_v0  ;;  %v5962_v6 = vld [vmem:[#allocation2 + $0x2b8] sm:$0xff] }
 0x226   : > { %3957 = vmatprep.mubr.f32.mxu0 %v2435_v63  ;;  %v2374_v13 = vmul.f32 0.7978846, %v2358_v42  ;;  %v2327_v12 = vmul.f32 %v2311_v39, %v5916_v28  ;;  %v2055_v38 = vadd.f32 %v2039_v8, %v2002_v32  ;;  %v2203_v29 = vmul.f32 %v5525_v14, %v5922_v22  ;;  %v5972_v32 = vld [vmem:[#allocation2 + $0x80] sm:$0xff] }
 0x227   : > { %v2420_v4 = vmul.f32 0.5, %v2404_v23  ;;  %v2273_v45 = vadd.f32 %v2257_v46, %v2218_v7  ;;  %v2258_v40 = vmul.f32 %v5534_v35, %v5930_v48  ;;  %v1894_v41 = vadd.f32 %v1878_v44, %v1823_v52  ;;  %v3300_v23 = vld [vmem:[#allocation9 + $0x60] sm:$0xff]  ;;  %v3301_v7 = vld [vmem:[#allocation9 + $0x68] sm:$0xff] }
 0x228   : > { %4319 = vtanh.f32 %v2374_v13  ;;  %v2343_v49 = vmul.f32 0.044715, %v2327_v12  ;;  %v2110_v43 = vadd.f32 %v2094_v17, %v2055_v38  ;;  %v1987_v0 = vmul.f32 %v5503_v37, %v5877_v59 }
 0x229   : > { %v4318_v25 = vpop.eup %4317  ;;  %v2436_v15 = vmul.f32 %v2420_v4, %v5819_v10  ;;  %v5947_v1 = vadd.f32 %v5619_v60, %v2273_v45  ;;  %v1949_v54 = vadd.f32 %v1933_v51, %v1894_v41  ;;  %v2040_v21 = vmul.f32 %v5510_v36, %v5896_v5 }
 0x22a   : > { %v2405_v2 = vadd.f32 1.0, %v4318_v25  ;;  %v2359_v24 = vadd.f32 %v2343_v49, %v5916_v28  ;;  %v2164_v27 = vadd.f32 %v2148_v31, %v2110_v43  ;;  %v2095_v19 = vmul.f32 %v5513_v50, %v5898_v53  ;;  %v5992_v25 = vld [vmem:[#allocation2 + $0x2c0] sm:$0xff] }
 0x22b   : > { %3958 = vmatmul.mubr.f32.gmra.mrb[20].mxu0 %v2436_v15  ;;  %v2312_v34 = vmul.f32 %v5947_v1, %v5947_v1  ;;  %v2003_v11 = vadd.f32 %v1987_v0, %v1949_v54  ;;  %v2149_v10 = vmul.f32 %v5532_v57, %v5943_v18  ;;  %v1824_v46 = vmul.f32 %v5607_v33, %v5850_v3 }
 0x22c   : > { %v2421_v8 = vmul.f32 0.5, %v2405_v2  ;;  %v2375_v62 = vmul.f32 0.7978846, %v2359_v24  ;;  %v2219_v58 = vadd.f32 %v2203_v29, %v2164_v27  ;;  %v1879_v17 = vmul.f32 %v5621_v20, %v5861_v30 }
 0x22d   : > { %v2328_v31 = vmul.f32 %v2312_v34, %v5947_v1  ;;  %v2056_v52 = vadd.f32 %v2040_v21, %v2003_v11  ;;  %v1934_v61 = vmul.f32 %v5579_v16, %v5863_v56  ;;  %v1988_v63 = vmul.f32 %v5503_v37, %v5907_v9 }
 0x22e   : > { %v2437_v3 = vmul.f32 %v2421_v8, %v5846_v47  ;;  %4321 = vtanh.f32 %v2375_v62  ;;  %v2274_v42 = vadd.f32 %v2258_v40, %v2219_v58  ;;  %v1895_v39 = vadd.f32 %v1879_v17, %v1824_v46  ;;  %v5988_v40 = vld [vmem:[#allocation2 + $0x1a0] sm:$0xff]  ;;  %v6005_v8 = vld [vmem:[#allocation2 + $0x88] sm:$0xff] }
 0x22f   : > { %v2344_v44 = vmul.f32 0.044715, %v2328_v31  ;;  %v2111_v30 = vadd.f32 %v2095_v19, %v2056_v52  ;;  %v2204_v51 = vmul.f32 %v5525_v14, %v5960_v26  ;;  %v2259_v56 = vmul.f32 %v5534_v35, %v5962_v6 }
 0x230   : > { %3960 = vmatprep.mubr.f32.mxu0 %v2437_v3  ;;  %v5979_v13 = vadd.f32 %v5619_v60, %v2274_v42  ;;  %v1950_v47 = vadd.f32 %v1934_v61, %v1895_v39  ;;  %v2041_v12 = vmul.f32 %v5510_v36, %v5922_v22  ;;  %v2096_v38 = vmul.f32 %v5513_v50, %v5930_v48 }
 0x231   : > { %v2360_v29 = vadd.f32 %v2344_v44, %v5947_v1  ;;  %v2165_v4 = vadd.f32 %v2149_v10, %v2111_v30  ;;  %v2150_v45 = vmul.f32 %v5532_v57, %v5972_v32  ;;  %v4151_v41 = vpack.c.bf16 %v3301_v7, %v3300_v23  ;;  %v6022_v30 = vld [vmem:[#allocation2 + $0x1a8] sm:$0xff] }
 0x232   : > { %v4320_v49 = vpop.eup %4319  ;;  %v2313_v43 = vmul.f32 %v5979_v13, %v5979_v13  ;;  %v2004_v0 = vadd.f32 %v1988_v63, %v1950_v47  ;;  %v1825_v15 = vmul.f32 %v5607_v33, %v5877_v59  ;;  %v1880_v54 = vmul.f32 %v5621_v20, %v5896_v5 }
 0x233   : > { %v2406_v21 = vadd.f32 1.0, %v4320_v49  ;;  %v2376_v2 = vmul.f32 0.7978846, %v2360_v29  ;;  %v2220_v24 = vadd.f32 %v2204_v51, %v2165_v4  ;;  %4152 = vmatprep.subr.bf16.mxu1 %v4151_v41  ;;  %v1935_v27 = vmul.f32 %v5579_v16, %v5898_v53 }
 0x234   : > { %v2329_v19 = vmul.f32 %v2313_v43, %v5979_v13  ;;  %v2057_v34 = vadd.f32 %v2041_v12, %v2004_v0  ;;  %v2205_v11 = vmul.f32 %v5525_v14, %v5988_v40  ;;  %4154 = vmatpush3.bf16.msra.mxu1 %v4151_v41  ;;  %v1896_v10 = vadd.f32 %v1880_v54, %v1825_v15  ;;  %v6037_v0 = vld [vmem:[#allocation2 + $0x90] sm:$0xff]  ;;  %v3302_v15 = vld [vmem:[#allocation9 + $0x70] sm:$0xff]  ;;  %v3303_v54 = vld [vmem:[#allocation9 + $0x78] sm:$0xff] }
 0x235   : > { %v2422_v46 = vmul.f32 0.5, %v2406_v21  ;;  %4323 = vtanh.f32 %v2376_v2  ;;  %v2275_v59 = vadd.f32 %v2259_v56, %v2220_v24  ;;  %v2260_v5 = vmul.f32 %v5534_v35, %v5992_v25 }
 0x236   : > { %v2345_v62 = vmul.f32 0.044715, %v2329_v19  ;;  %v2112_v58 = vadd.f32 %v2096_v38, %v2057_v34  ;;  %v1951_v17 = vadd.f32 %v1935_v27, %v1896_v10  ;;  %v1989_v53 = vmul.f32 %v5503_v37, %v5943_v18  ;;  %v6028_v38 = vld [vmem:[#allocation2 + $0x2c8] sm:$0xff]  ;;  %v4372_v19 = vld [vmem:[#allocation8 + $0x4] ss:$0 sm:$0xff] }
 0x237   : > { %v2438_v31 = vmul.f32 %v2422_v46, %v5885_v55  ;;  %v6011_v52 = vadd.f32 %v5619_v60, %v2275_v59  ;;  %v2042_v61 = vmul.f32 %v5510_v36, %v5960_v26  ;;  %v2097_v63 = vmul.f32 %v5513_v50, %v5962_v6 }
 0x238   : > { %v4322_v3 = vpop.eup %4321  ;;  %v2361_v42 = vadd.f32 %v2345_v62, %v5979_v13  ;;  %v2166_v39 = vadd.f32 %v2150_v45, %v2112_v58  ;;  %v2005_v23 = vadd.f32 %v1989_v53, %v1951_v17  ;;  %v2151_v7 = vmul.f32 %v5532_v57, %v6005_v8  ;;  %v6055_v17 = vld [vmem:[#allocation2 + $0x2d0] sm:$0xff] }
 0x239   : > { %3961 = vmatmul.mubr.f32.gmra.mrb[22].mxu0 %v2438_v31  ;;  %v2407_v44 = vadd.f32 1.0, %v4322_v3  ;;  %v2314_v55 = vmul.f32 %v6011_v52, %v6011_v52  ;;  %v1826_v36 = vmul.f32 %v5607_v33, %v5907_v9  ;;  %v1881_v51 = vmul.f32 %v5621_v20, %v5922_v22 }
 0x23a   : > { %v2377_v56 = vmul.f32 0.7978846, %v2361_v42  ;;  %v2221_v47 = vadd.f32 %v2205_v11, %v2166_v39  ;;  %v2058_v12 = vadd.f32 %v2042_v61, %v2005_v23  ;;  %v1936_v29 = vmul.f32 %v5579_v16, %v5930_v48  ;;  %v4373_v39 = vld [vmem:[#allocation8 + $0x7] ss:$0 sm:$0xff] }
 0x23b   : > { %v2423_v4 = vmul.f32 0.5, %v2407_v44  ;;  %v2330_v45 = vmul.f32 %v2314_v55, %v6011_v52  ;;  %v1897_v41 = vadd.f32 %v1881_v51, %v1826_v36  ;;  %v1990_v49 = vmul.f32 %v5503_v37, %v5972_v32  ;;  %v6066_v55 = vld [vmem:[#allocation2 + $0x98] sm:$0xff] }
 0x23c   : > { %4325 = vtanh.f32 %v2377_v56  ;;  %v2276_v9 = vadd.f32 %v2260_v5, %v2221_v47  ;;  %v2113_v43 = vadd.f32 %v2097_v63, %v2058_v12  ;;  %v2206_v22 = vmul.f32 %v5525_v14, %v6022_v30  ;;  %v4376_v12 = vld [vmem:[#allocation8 + $0x5] ss:$0 sm:$0xff] }
 0x23d   : > { %v2439_v21 = vmul.f32 %v2423_v4, %v5916_v28  ;;  %v2346_v48 = vmul.f32 0.044715, %v2330_v45  ;;  %v2261_v2 = vmul.f32 %v5534_v35, %v6028_v38  ;;  %v1952_v24 = vadd.f32 %v1936_v29, %v1897_v41  ;;  %v6051_v35 = vld [vmem:[#allocation2 + $0x1b0] sm:$0xff]  ;;  %v6075_v4 = vld [vmem:[#allocation2 + $0x1b8] sm:$0xff]  ;;  %v6077_v45 = vld [vmem:[#allocation8] ss:$0 sm:$0xff] }
 0x23e   : > { %v6043_v27 = vadd.f32 %v5619_v60, %v2276_v9  ;;  %v2167_v37 = vadd.f32 %v2151_v7, %v2113_v43  ;;  %v2043_v34 = vmul.f32 %v4372_v19, %v5988_v40  ;;  %v2098_v14 = vmul.f32 %v5513_v50, %v5992_v25  ;;  %v4377_v9 = vld [vmem:[#allocation8 + $0x6] ss:$0 sm:$0xff] }
 0x23f   : > { %v4324_v11 = vpop.eup %4323  ;;  %3963 = vmatprep.mubr.f32.mxu0 %v2439_v21  ;;  %v2362_v10 = vadd.f32 %v2346_v48, %v6011_v52  ;;  %v2006_v28 = vadd.f32 %v1990_v49, %v1952_v24  ;;  %v2152_v46 = vmul.f32 %v5532_v57, %v6037_v0  ;;  %v4155_v59 = vpack.c.bf16 %v3303_v54, %v3302_v15  ;;  %v6085_v15 = vld [vmem:[#allocation8 + $0x1] ss:$0 sm:$0xff] }
 0x240   : > { %v2408_v5 = vadd.f32 1.0, %v4324_v11  ;;  %v2315_v62 = vmul.f32 %v6043_v27, %v6043_v27  ;;  %v2222_v58 = vadd.f32 %v2206_v22, %v2167_v37  ;;  %v1827_v50 = vmul.f32 %v5607_v33, %v5943_v18  ;;  %v4374_v33 = vld [vmem:[#allocation8 + $0x8] ss:$0 sm:$0xff]  ;;  %v6091_v37 = vld [vmem:[#allocation8 + $0x2] ss:$0 sm:$0xff] }
 0x241   : > { %v2378_v53 = vmul.f32 0.7978846, %v2362_v10  ;;  %v2059_v31 = vadd.f32 %v2043_v34, %v2006_v28  ;;  %4156 = vmatprep.subr.bf16.mxu1 %v4155_v59  ;;  %v1882_v61 = vmul.f32 %v5621_v20, %v5960_v26  ;;  %v1937_v57 = vmul.f32 %v5579_v16, %v5962_v6  ;;  %v4375_v6 = vld [vmem:[#allocation8 + $0x3] ss:$0 sm:$0xff]  ;;  %v6099_v10 = vld [vmem:[#allocation8 + $0x4] ss:$0 sm:$0xff] }
 0x242   : > { %v2424_v63 = vmul.f32 0.5, %v2408_v5  ;;  %v2331_v3 = vmul.f32 %v2315_v62, %v6043_v27  ;;  %v2277_v42 = vadd.f32 %v2261_v2, %v2222_v58  ;;  %v2207_v23 = vmul.f32 %v4373_v39, %v6051_v35  ;;  %4158 = vmatpush3.bf16.msra.mxu1 %v4155_v59  ;;  %v6087_v2 = vld [vmem:[#allocation2 + $0x2d8] sm:$0xff]  ;;  %v6097_v11 = vld [vmem:[#allocation8 + $0x3] ss:$0 sm:$0xff]  ;;  %v6101_v62 = vld [vmem:[#allocation8 + $0x5] ss:$0 sm:$0xff] }
 0x243   : > { %4327 = vtanh.f32 %v2378_v53  ;;  %v2114_v7 = vadd.f32 %v2098_v14, %v2059_v31  ;;  %v2262_v18 = vmul.f32 %v4374_v33, %v6055_v17  ;;  %v1898_v44 = vadd.f32 %v1882_v61, %v1827_v50  ;;  %v6105_v58 = vld [vmem:[#allocation8 + $0x6] ss:$0 sm:$0xff] }
 0x244   : > { %v2440_v20 = vmul.f32 %v2424_v63, %v5947_v1  ;;  %v2347_v26 = vmul.f32 0.044715, %v2331_v3  ;;  %v6070_v16 = vadd.f32 %v5619_v60, %v2277_v42  ;;  %v1991_v36 = vmul.f32 %v4375_v6, %v6005_v8  ;;  %v6114_v3 = vld [vmem:[#allocation8 + $0x7] ss:$0 sm:$0xff] }
 0x245   : > { %v2168_v51 = vadd.f32 %v2152_v46, %v2114_v7  ;;  %v1953_v56 = vadd.f32 %v1937_v57, %v1898_v44  ;;  %v2044_v47 = vmul.f32 %v4372_v19, %v6022_v30  ;;  %v2099_v29 = vmul.f32 %v4376_v12, %v6028_v38 }
 0x246   : > { %v4326_v41 = vpop.eup %4325  ;;  %3964 = vmatmul.mubr.f32.gmra.mrb[24].mxu0 %v2440_v20  ;;  %v2363_v1 = vadd.f32 %v2347_v26, %v6043_v27  ;;  %v2316_v49 = vmul.f32 %v6070_v16, %v6070_v16  ;;  %v2153_v43 = vmul.f32 %v4377_v9, %v6066_v55  ;;  %v2653_v22 = vmul.f32 %v6077_v45, %v5972_v32  ;;  %v6127_v20 = vld [vmem:[#allocation2 + $0x1c0] sm:$0xff] }
 0x247   : > { %v2409_v54 = vadd.f32 1.0, %v4326_v41  ;;  %v2223_v21 = vadd.f32 %v2207_v23, %v2168_v51  ;;  %v2007_v48 = vadd.f32 %v1991_v36, %v1953_v56  ;;  %v2708_v24 = vmul.f32 %v6085_v15, %v5988_v40  ;;  %v6103_v40 = vld [vmem:[#allocation2 + $0xa0] sm:$0xff] }
 0x248   : > { %v2379_v19 = vmul.f32 0.7978846, %v2363_v1  ;;  %v2332_v34 = vmul.f32 %v2316_v49, %v6070_v16  ;;  %v2208_v14 = vmul.f32 %v4373_v39, %v6075_v4  ;;  %v2763_v32 = vmul.f32 %v6091_v37, %v5992_v25  ;;  %v6133_v56 = vld [vmem:[#allocation2 + $0x2e0] sm:$0xff] }
 0x249   : > { %v2425_v28 = vmul.f32 0.5, %v2409_v54  ;;  %v2278_v46 = vadd.f32 %v2262_v18, %v2223_v21  ;;  %v2060_v59 = vadd.f32 %v2044_v47, %v2007_v48  ;;  %v2724_v5 = vadd.f32 %v2708_v24, %v2653_v22  ;;  %v6146_v48 = vld [vmem:[#allocation2 + $0x1c8] sm:$0xff] }
 0x24a   : > { %4329 = vtanh.f32 %v2379_v19  ;;  %v2348_v50 = vmul.f32 0.044715, %v2332_v34  ;;  %v2263_v53 = vmul.f32 %v4374_v33, %v6087_v2  ;;  %v2817_v25 = vmul.f32 %v6097_v11, %v6037_v0  ;;  %v6123_v33 = vld [vmem:[#allocation8 + $0x8] ss:$0 sm:$0xff] }
 0x24b   : > { %v2441_v31 = vmul.f32 %v2425_v28, %v5979_v13  ;;  %v6112_v61 = vadd.f32 %v5619_v60, %v2278_v46  ;;  %v2115_v57 = vadd.f32 %v2099_v29, %v2060_v59  ;;  %v2779_v63 = vadd.f32 %v2763_v32, %v2724_v5  ;;  %v4378_v32 = vld [vmem:[%s6707_s4] ss:$0 sm:$0xff] }
 0x24c   : > { %v2364_v42 = vadd.f32 %v2348_v50, %v6070_v16  ;;  %v2870_v39 = vmul.f32 %v6099_v10, %v6051_v35  ;;  %v2925_v23 = vmul.f32 %v6101_v62, %v6055_v17  ;;  %v2979_v7 = vmul.f32 %v6105_v58, %v6103_v40 }
 0x24d   : > { %v4328_v13 = vpop.eup %4327  ;;  %3966 = vmatprep.mubr.f32.mxu0 %v2441_v31  ;;  %v2317_v60 = vmul.f32 %v6112_v61, %v6112_v61  ;;  %v2169_v18 = vadd.f32 %v2153_v43, %v2115_v57  ;;  %v2833_v44 = vadd.f32 %v2817_v25, %v2779_v63  ;;  %v2654_v26 = vmul.f32 %v6077_v45, %v6005_v8  ;;  %v6142_v43 = vld [vmem:[#allocation2 + $0xa8] sm:$0xff] }
 0x24e   : > { %v2410_v6 = vadd.f32 1.0, %v4328_v13  ;;  %v2380_v36 = vmul.f32 0.7978846, %v2364_v42  ;;  %v3034_v51 = vmul.f32 %v6114_v3, %v6127_v20  ;;  %v2709_v47 = vmul.f32 %v6085_v15, %v6022_v30 }
 0x24f   : > { %v2333_v12 = vmul.f32 %v2317_v60, %v6112_v61  ;;  %v2224_v29 = vadd.f32 %v2208_v14, %v2169_v18  ;;  %v2886_v41 = vadd.f32 %v2870_v39, %v2833_v44  ;;  %v3089_v1 = vmul.f32 %v6123_v33, %v6133_v56 }
 0x250   : > { %v2426_v49 = vmul.f32 0.5, %v2410_v6  ;;  %4331 = vtanh.f32 %v2380_v36  ;;  %v2725_v8 = vadd.f32 %v2709_v47, %v2654_v26  ;;  %v2764_v9 = vmul.f32 %v6091_v37, %v6028_v38  ;;  %v6181_v26 = vld [vmem:[%s6707_s4] ss:$0 sm:$0xff] }
 0x251   : > { %v2349_v22 = vmul.f32 0.044715, %v2333_v12  ;;  %v2279_v54 = vadd.f32 %v2263_v53, %v2224_v29  ;;  %v2941_v21 = vadd.f32 %v2925_v23, %v2886_v41  ;;  %v2818_v30 = vmul.f32 %v6097_v11, %v6066_v55 }
 0x252   : > { %v2442_v24 = vmul.f32 %v2426_v49, %v6011_v52  ;;  %v2780_v19 = vadd.f32 %v2764_v9, %v2725_v8  ;;  %v2871_v34 = vmul.f32 %v6099_v10, %v6075_v4  ;;  %v2926_v14 = vmul.f32 %v6101_v62, %v6087_v2  ;;  %v6161_v52 = vld [vmem:[#allocation2 + $0x2e8] sm:$0xff] }
 0x253   : > { %v2365_v38 = vadd.f32 %v2349_v22, %v6112_v61  ;;  %v6157_v28 = vadd.f32 %v4378_v32, %v2279_v54  ;;  %v2995_v46 = vadd.f32 %v2979_v7, %v2941_v21  ;;  %v2980_v59 = vmul.f32 %v6105_v58, %v6142_v43 }
 0x254   : > { %v4330_v5 = vpop.eup %4329  ;;  %3967 = vmatmul.mubr.f32.gmra.mrb[26].mxu0 %v2442_v24  ;;  %v2834_v50 = vadd.f32 %v2818_v30, %v2780_v19  ;;  %v3035_v53 = vmul.f32 %v6114_v3, %v6146_v48  ;;  %v2655_v25 = vmul.f32 %v6077_v45, %v6037_v0  ;;  %v2710_v31 = vmul.f32 %v6085_v15, %v6051_v35  ;;  %v6176_v35 = vld [vmem:[#allocation2 + $0xb0] sm:$0xff] }
 0x255   : > { %v2411_v57 = vadd.f32 1.0, %v4330_v5  ;;  %v2381_v63 = vmul.f32 0.7978846, %v2365_v38  ;;  %v2318_v42 = vmul.f32 %v6157_v28, %v6157_v28  ;;  %v3050_v39 = vadd.f32 %v3034_v51, %v2995_v46  ;;  %v6207_v46 = vld [vmem:[#allocation2 + $0x1d0] sm:$0xff] }
 0x256   : > { %v2887_v23 = vadd.f32 %v2871_v34, %v2834_v50  ;;  %v3090_v7 = vmul.f32 %v6123_v33, %v6161_v52  ;;  %v2726_v13 = vadd.f32 %v2710_v31, %v2655_v25  ;;  %v2765_v60 = vmul.f32 %v6091_v37, %v6055_v17  ;;  %v6213_v25 = vld [vmem:[#allocation2 + $0xb8] sm:$0xff] }
 0x257   : > { %v2427_v18 = vmul.f32 0.5, %v2411_v57  ;;  %4333 = vtanh.f32 %v2381_v63  ;;  %v2334_v0 = vmul.f32 %v2318_v42, %v6157_v28  ;;  %v3105_v44 = vadd.f32 %v3089_v1, %v3050_v39  ;;  %v6216_v57 = vld [vmem:[#allocation2 + $0x2f0] sm:$0xff] }
 0x258   : > { %v2942_v6 = vadd.f32 %v2926_v14, %v2887_v23  ;;  %v2781_v36 = vadd.f32 %v2765_v60, %v2726_v13  ;;  %v2819_v51 = vmul.f32 %v6097_v11, %v6103_v40  ;;  %v2872_v17 = vmul.f32 %v6099_v10, %v6127_v20 }
 0x259   : > { %v2443_v47 = vmul.f32 %v2427_v18, %v6043_v27  ;;  %v2350_v12 = vmul.f32 0.044715, %v2334_v0  ;;  %v6189_v29 = vadd.f32 %v6181_v26, %v3105_v44  ;;  %v2927_v41 = vmul.f32 %v6101_v62, %v6133_v56 }
 0x25a   : > { %v4332_v1 = vpop.eup %4331  ;;  %v2996_v49 = vadd.f32 %v2980_v59, %v2942_v6  ;;  %v2835_v8 = vadd.f32 %v2819_v51, %v2781_v36  ;;  %v2981_v9 = vmul.f32 %v6105_v58, %v6176_v35  ;;  %v2656_v22 = vmul.f32 %v6077_v45, %v6066_v55  ;;  %v6232_v51 = vld [vmem:[#allocation2 + $0x1d8] sm:$0xff] }
 0x25b   : > { %3969 = vmatprep.mubr.f32.mxu0 %v2443_v47  ;;  %v2412_v54 = vadd.f32 1.0, %v4332_v1  ;;  %v2366_v27 = vadd.f32 %v2350_v12, %v6157_v28  ;;  %v3144_v21 = vmul.f32 %v6189_v29, %v6189_v29  ;;  %v2711_v30 = vmul.f32 %v6085_v15, %v6075_v4 }
 0x25c   : > { %v3051_v24 = vadd.f32 %v3035_v53, %v2996_v49  ;;  %v2888_v19 = vadd.f32 %v2872_v17, %v2835_v8  ;;  %v2766_v34 = vmul.f32 %v6091_v37, %v6087_v2  ;;  %v2820_v14 = vmul.f32 %v6097_v11, %v6142_v43 }
 0x25d   : > { %v2428_v38 = vmul.f32 0.5, %v2412_v54  ;;  %v2382_v55 = vmul.f32 0.7978846, %v2366_v27  ;;  %v3160_v32 = vmul.f32 %v3144_v21, %v6189_v29  ;;  %v2727_v59 = vadd.f32 %v2711_v30, %v2656_v22  ;;  %v6243_v54 = vld [vmem:[#allocation2 + $0xc0] sm:$0xff] }
 0x25e   : > { %v3106_v5 = vadd.f32 %v3090_v7, %v3051_v24  ;;  %v2943_v50 = vadd.f32 %v2927_v41, %v2888_v19  ;;  %v3036_v4 = vmul.f32 %v6114_v3, %v6207_v46  ;;  %v2873_v53 = vmul.f32 %v6099_v10, %v6146_v48 }
 0x25f   : > { %v2444_v2 = vmul.f32 %v2428_v38, %v6070_v16  ;;  %4335 = vtanh.f32 %v2382_v55  ;;  %v3176_v31 = vmul.f32 0.044715, %v3160_v32  ;;  %v2782_v63 = vadd.f32 %v2766_v34, %v2727_v59 }
 0x260   : > { %v6219_v42 = vadd.f32 %v6181_v26, %v3106_v5  ;;  %v2997_v39 = vadd.f32 %v2981_v9, %v2943_v50  ;;  %v3091_v23 = vmul.f32 %v6123_v33, %v6216_v57  ;;  %v2928_v7 = vmul.f32 %v6101_v62, %v6161_v52  ;;  %v6241_v9 = vld [vmem:[#allocation2 + $0x2f8] sm:$0xff]  ;;  %v6262_v5 = vld [vmem:[#allocation2 + $0x1e0] sm:$0xff] }
 0x261   : > { %v4334_v13 = vpop.eup %4333  ;;  %3970 = vmatmul.mubr.f32.gmra.mrb[28].mxu0 %v2444_v2  ;;  %v3192_v60 = vadd.f32 %v3176_v31, %v6189_v29  ;;  %v2836_v16 = vadd.f32 %v2820_v14, %v2782_v63  ;;  %v2982_v18 = vmul.f32 %v6105_v58, %v6213_v25  ;;  %v2657_v0 = vmul.f32 %v6077_v45, %v6103_v40 }
 0x262   : > { %v2413_v44 = vadd.f32 1.0, %v4334_v13  ;;  %v3145_v6 = vmul.f32 %v6219_v42, %v6219_v42  ;;  %v3052_v36 = vadd.f32 %v3036_v4, %v2997_v39  ;;  %v2712_v17 = vmul.f32 %v6085_v15, %v6127_v20 }
 0x263   : > { %v3208_v47 = vmul.f32 0.7978846, %v3192_v60  ;;  %v2889_v12 = vadd.f32 %v2873_v53, %v2836_v16  ;;  %v2767_v41 = vmul.f32 %v6091_v37, %v6133_v56  ;;  %v2821_v1 = vmul.f32 %v6097_v11, %v6176_v35  ;;  %v6273_v60 = vld [vmem:[#allocation2 + $0x300] sm:$0xff] }
 0x264   : > { %v2429_v49 = vmul.f32 0.5, %v2413_v44  ;;  %v3161_v40 = vmul.f32 %v3145_v6, %v6219_v42  ;;  %v3107_v8 = vadd.f32 %v3091_v23, %v3052_v36  ;;  %v2728_v22 = vadd.f32 %v2712_v17, %v2657_v0  ;;  %v6279_v44 = vld [vmem:[#allocation2 + $0xc8] sm:$0xff] }
 0x265   : > { %4337 = vtanh.f32 %v3208_v47  ;;  %v2944_v27 = vadd.f32 %v2928_v7, %v2889_v12  ;;  %v3037_v20 = vmul.f32 %v6114_v3, %v6232_v51  ;;  %v2874_v56 = vmul.f32 %v6099_v10, %v6207_v46 }
 0x266   : > { %v2445_v21 = vmul.f32 %v2429_v49, %v6112_v61  ;;  %v3177_v30 = vmul.f32 0.044715, %v3161_v40  ;;  %v6251_v24 = vadd.f32 %v6181_v26, %v3107_v8  ;;  %v2783_v19 = vadd.f32 %v2767_v41, %v2728_v22 }
 0x267   : > { %v2998_v34 = vadd.f32 %v2982_v18, %v2944_v27  ;;  %v3092_v14 = vmul.f32 %v6123_v33, %v6241_v9  ;;  %v2929_v38 = vmul.f32 %v6101_v62, %v6216_v57  ;;  %v2983_v55 = vmul.f32 %v6105_v58, %v6243_v54 }
 0x268   : > { %3972 = vmatprep.mubr.f32.mxu0 %v2445_v21  ;;  %v3193_v32 = vadd.f32 %v3177_v30, %v6219_v42  ;;  %v3146_v61 = vmul.f32 %v6251_v24, %v6251_v24  ;;  %v2837_v59 = vadd.f32 %v2821_v1, %v2783_v19  ;;  %v2658_v50 = vmul.f32 %v6077_v45, %v6142_v43 }
 0x269   : > { %v4336_v4 = vpop.eup %4335  ;;  %v3053_v53 = vadd.f32 %v3037_v20, %v2998_v34  ;;  %v3038_v2 = vmul.f32 %v6114_v3, %v6262_v5  ;;  %v2713_v31 = vmul.f32 %v6085_v15, %v6146_v48  ;;  %v2768_v63 = vmul.f32 %v6091_v37, %v6161_v52  ;;  %v6294_v20 = vld [vmem:[#allocation2 + $0x1e8] sm:$0xff] }
 0x26a   : > { %v2414_v39 = vadd.f32 1.0, %v4336_v4  ;;  %v3209_v23 = vmul.f32 0.7978846, %v3193_v32  ;;  %v3162_v7 = vmul.f32 %v3146_v61, %v6251_v24  ;;  %v2890_v13 = vadd.f32 %v2874_v56, %v2837_v59 }
 0x26b   : > { %v3108_v16 = vadd.f32 %v3092_v14, %v3053_v53  ;;  %v3093_v43 = vmul.f32 %v6123_v33, %v6273_v60  ;;  %v2729_v18 = vadd.f32 %v2713_v31, %v2658_v50  ;;  %v2822_v0 = vmul.f32 %v6097_v11, %v6213_v25  ;;  %v6309_v50 = vld [vmem:[#allocation2 + $0xd0] sm:$0xff] }
 0x26c   : > { %v2430_v48 = vmul.f32 0.5, %v2414_v39  ;;  %4339 = vtanh.f32 %v3209_v23  ;;  %v3178_v52 = vmul.f32 0.044715, %v3162_v7  ;;  %v2945_v6 = vadd.f32 %v2929_v38, %v2890_v13 }
 0x26d   : > { %v6282_v36 = vadd.f32 %v6181_v26, %v3108_v16  ;;  %v2784_v17 = vadd.f32 %v2768_v63, %v2729_v18  ;;  %v2875_v47 = vmul.f32 %v6099_v10, %v6232_v51  ;;  %v2930_v12 = vmul.f32 %v6101_v62, %v6241_v9 }
 0x26e   : > { %v2446_v41 = vmul.f32 %v2430_v48, %v6157_v28  ;;  %v3194_v1 = vadd.f32 %v3178_v52, %v6251_v24  ;;  %v2999_v49 = vadd.f32 %v2983_v55, %v2945_v6  ;;  %v2984_v40 = vmul.f32 %v6105_v58, %v6279_v44  ;;  %v6303_v55 = vld [vmem:[#allocation2 + $0x308] sm:$0xff] }
 0x26f   : > { %v4338_v8 = vpop.eup %4337  ;;  %v3147_v22 = vmul.f32 %v6282_v36, %v6282_v36  ;;  %v2838_v27 = vadd.f32 %v2822_v0, %v2784_v17  ;;  %v2659_v56 = vmul.f32 %v6077_v45, %v6176_v35  ;;  %v2714_v21 = vmul.f32 %v6085_v15, %v6207_v46 }
 0x270   : > { %3973 = vmatmul.mubr.f32.gmra.mrb[30].mxu0 %v2446_v41  ;;  %v3240_v28 = vadd.f32 1.0, %v4338_v8  ;;  %v3210_v30 = vmul.f32 0.7978846, %v3194_v1  ;;  %v3054_v19 = vadd.f32 %v3038_v2, %v2999_v49  ;;  %v2769_v34 = vmul.f32 %v6091_v37, %v6216_v57  ;;  %v6332_v41 = vld [vmem:[#allocation2 + $0x1f0] sm:$0xff] }
 0x271   : > { %v3163_v14 = vmul.f32 %v3147_v22, %v6282_v36  ;;  %v2891_v38 = vadd.f32 %v2875_v47, %v2838_v27  ;;  %v2730_v32 = vadd.f32 %v2714_v21, %v2659_v56  ;;  %v2823_v61 = vmul.f32 %v6097_v11, %v6243_v54  ;;  %v6341_v27 = vld [vmem:[#allocation2 + $0xd8] sm:$0xff] }
 0x272   : > { %v3256_v35 = vmul.f32 0.5, %v3240_v28  ;;  %4341 = vtanh.f32 %v3210_v30  ;;  %v3109_v59 = vadd.f32 %v3093_v43, %v3054_v19  ;;  %v3039_v46 = vmul.f32 %v6114_v3, %v6294_v20 }
 0x273   : > { %v3179_v4 = vmul.f32 0.044715, %v3163_v14  ;;  %v2946_v53 = vadd.f32 %v2930_v12, %v2891_v38  ;;  %v2785_v57 = vadd.f32 %v2769_v34, %v2730_v32  ;;  %v2876_v2 = vmul.f32 %v6099_v10, %v6262_v5 }
 0x274   : > { %v3272_v31 = vmul.f32 %v3256_v35, %v6189_v29  ;;  %v6315_v63 = vadd.f32 %v6181_v26, %v3109_v59  ;;  %v3094_v39 = vmul.f32 %v6123_v33, %v6303_v55  ;;  %v2931_v23 = vmul.f32 %v6101_v62, %v6273_v60 }
 0x275   : > { %v3195_v7 = vadd.f32 %v3179_v4, %v6282_v36  ;;  %v3000_v13 = vadd.f32 %v2984_v40, %v2946_v53  ;;  %v2839_v16 = vadd.f32 %v2823_v61, %v2785_v57  ;;  %v2985_v43 = vmul.f32 %v6105_v58, %v6309_v50  ;;  %v6360_v57 = vld [vmem:[#allocation2 + $0x1f8] sm:$0xff] }
 0x276   : > { %v4340_v18 = vpop.eup %4339  ;;  %4007 = vmatprep.mubr.f32.mxu1 %v3272_v31  ;;  %v3148_v29 = vmul.f32 %v6315_v63, %v6315_v63  ;;  %v2660_v0 = vmul.f32 %v6077_v45, %v6213_v25  ;;  %v2715_v48 = vmul.f32 %v6085_v15, %v6232_v51  ;;  %v2770_v52 = vmul.f32 %v6091_v37, %v6241_v9  ;;  %v6339_v9 = vld [vmem:[#allocation2 + $0x310] sm:$0xff] }
 0x277   : > { %v3241_v6 = vadd.f32 1.0, %v4340_v18  ;;  %v3211_v17 = vmul.f32 0.7978846, %v3195_v7  ;;  %v3055_v47 = vadd.f32 %v3039_v46, %v3000_v13  ;;  %v2892_v12 = vadd.f32 %v2876_v2, %v2839_v16 }
 0x278   : > { %v3164_v1 = vmul.f32 %v3148_v29, %v6315_v63  ;;  %v3040_v49 = vmul.f32 %v6114_v3, %v6332_v41  ;;  %v2731_v40 = vadd.f32 %v2715_v48, %v2660_v0  ;;  %v2824_v25 = vmul.f32 %v6097_v11, %v6279_v44  ;;  %v6371_v29 = vld [vmem:[#allocation2 + $0xe0] sm:$0xff] }
 0x279   : > { %v3257_v8 = vmul.f32 0.5, %v3241_v6  ;;  %4343 = vtanh.f32 %v3211_v17  ;;  %v3110_v51 = vadd.f32 %v3094_v39, %v3055_v47  ;;  %v2947_v22 = vadd.f32 %v2931_v23, %v2892_v12 }
 0x27a   : > { %v3180_v56 = vmul.f32 0.044715, %v3164_v1  ;;  %v3095_v21 = vmul.f32 %v6123_v33, %v6339_v9  ;;  %v2786_v28 = vadd.f32 %v2770_v52, %v2731_v40  ;;  %v2877_v30 = vmul.f32 %v6099_v10, %v6294_v20 }
 0x27b   : > { %v3273_v19 = vmul.f32 %v3257_v8, %v6219_v42  ;;  %v6349_v34 = vadd.f32 %v6181_v26, %v3110_v51  ;;  %v3001_v14 = vadd.f32 %v2985_v43, %v2947_v22  ;;  %v2932_v38 = vmul.f32 %v6101_v62, %v6303_v55  ;;  %v6369_v43 = vld [vmem:[#allocation2 + $0x318] sm:$0xff] }
 0x27c   : > { %v4342_v32 = vpop.eup %4341  ;;  %v3196_v61 = vadd.f32 %v3180_v56, %v6315_v63  ;;  %v2840_v35 = vadd.f32 %v2824_v25, %v2786_v28  ;;  %v2986_v59 = vmul.f32 %v6105_v58, %v6341_v27  ;;  %v2661_v46 = vmul.f32 %v6077_v45, %v6243_v54 }
 0x27d   : > { %4008 = vmatmul.mubr.f32.vlgmr.msra.gmra.mrb[16].mxu1 %v3273_v19  ;;  %v3242_v4 = vadd.f32 1.0, %v4342_v32  ;;  %v3149_v42 = vmul.f32 %v6349_v34, %v6349_v34  ;;  %v3056_v53 = vadd.f32 %v3040_v49, %v3001_v14  ;;  %v2716_v2 = vmul.f32 %v6085_v15, %v6262_v5 }
 0x27e   : > { %v3212_v31 = vmul.f32 0.7978846, %v3196_v61  ;;  %v2893_v39 = vadd.f32 %v2877_v30, %v2840_v35  ;;  %v2771_v23 = vmul.f32 %v6091_v37, %v6273_v60  ;;  %v2825_v7 = vmul.f32 %v6097_v11, %v6309_v50 }
 0x27f   : > { %v3258_v54 = vmul.f32 0.5, %v3242_v4  ;;  %v3165_v13 = vmul.f32 %v3149_v42, %v6349_v34  ;;  %v3111_v16 = vadd.f32 %v3095_v21, %v3056_v53  ;;  %v2732_v18 = vadd.f32 %v2716_v2, %v2661_v46  ;;  %v6392_v21 = vld [vmem:[#allocation2 + $0x200] sm:$0xff]  ;;  %v6405_v4 = vld [vmem:[#allocation2 + $0xe8] sm:$0xff] }
 0x280   : > { %4345 = vtanh.f32 %v3212_v31  ;;  %v2948_v0 = vadd.f32 %v2932_v38, %v2893_v39  ;;  %v3041_v5 = vmul.f32 %v6114_v3, %v6360_v57  ;;  %v2878_v60 = vmul.f32 %v6099_v10, %v6332_v41 }
 0x281   : > { %v3274_v48 = vmul.f32 %v3258_v54, %v6251_v24  ;;  %v3181_v52 = vmul.f32 0.044715, %v3165_v13  ;;  %v6379_v6 = vadd.f32 %v6181_v26, %v3111_v16  ;;  %v2787_v17 = vadd.f32 %v2771_v23, %v2732_v18 }
 0x282   : > { %v3002_v47 = vadd.f32 %v2986_v59, %v2948_v0  ;;  %v3096_v12 = vmul.f32 %v6123_v33, %v6369_v43  ;;  %v2933_v1 = vmul.f32 %v6101_v62, %v6339_v9  ;;  %v2987_v49 = vmul.f32 %v6105_v58, %v6371_v29  ;;  %v6422_v0 = vld [vmem:[#allocation2 + $0x208] sm:$0xff] }
 0x283   : > { %v4344_v40 = vpop.eup %4343  ;;  %4010 = vmatprep.mubr.f32.mxu1 %v3274_v48  ;;  %v3197_v25 = vadd.f32 %v3181_v52, %v6349_v34  ;;  %v3150_v24 = vmul.f32 %v6379_v6, %v6379_v6  ;;  %v2841_v8 = vadd.f32 %v2825_v7, %v2787_v17  ;;  %v2662_v51 = vmul.f32 %v6077_v45, %v6279_v44  ;;  %v6401_v44 = vld [vmem:[#allocation2 + $0x320] sm:$0xff] }
 0x284   : > { %v3243_v22 = vadd.f32 1.0, %v4344_v40  ;;  %v3057_v56 = vadd.f32 %v3041_v5, %v3002_v47  ;;  %v2717_v28 = vmul.f32 %v6085_v15, %v6294_v20  ;;  %v2772_v30 = vmul.f32 %v6091_v37, %v6303_v55 }
 0x285   : > { %v3213_v19 = vmul.f32 0.7978846, %v3197_v25  ;;  %v3166_v14 = vmul.f32 %v3150_v24, %v6379_v6  ;;  %v2894_v38 = vadd.f32 %v2878_v60, %v2841_v8  ;;  %v3042_v32 = vmul.f32 %v6114_v3, %v6392_v21  ;;  %v6437_v8 = vld [vmem:[#allocation2 + $0xf0] sm:$0xff] }
 0x286   : > { %v3259_v61 = vmul.f32 0.5, %v3243_v22  ;;  %v3112_v35 = vadd.f32 %v3096_v12, %v3057_v56  ;;  %v2733_v59 = vadd.f32 %v2717_v28, %v2662_v51  ;;  %v2826_v46 = vmul.f32 %v6097_v11, %v6341_v27 }
 0x287   : > { %4347 = vtanh.f32 %v3213_v19  ;;  %v3182_v20 = vmul.f32 0.044715, %v3166_v14  ;;  %v2949_v55 = vadd.f32 %v2933_v1, %v2894_v38  ;;  %v3097_v42 = vmul.f32 %v6123_v33, %v6401_v44 }
 0x288   : > { %v3275_v53 = vmul.f32 %v3259_v61, %v6282_v36  ;;  %v6411_v2 = vadd.f32 %v6181_v26, %v3112_v35  ;;  %v2788_v31 = vadd.f32 %v2772_v30, %v2733_v59  ;;  %v2879_v39 = vmul.f32 %v6099_v10, %v6360_v57 }
 0x289   : > { %v3198_v23 = vadd.f32 %v3182_v20, %v6379_v6  ;;  %v3003_v7 = vadd.f32 %v2987_v49, %v2949_v55  ;;  %v2934_v54 = vmul.f32 %v6101_v62, %v6369_v43  ;;  %v2988_v13 = vmul.f32 %v6105_v58, %v6405_v4  ;;  %v6431_v49 = vld [vmem:[#allocation2 + $0x328] sm:$0xff] }
 0x28a   : > { %v4346_v16 = vpop.eup %4345  ;;  %4011 = vmatmul.mubr.f32.gmra.mrb[18].mxu1 %v3275_v53  ;;  %v3151_v36 = vmul.f32 %v6411_v2, %v6411_v2  ;;  %v2842_v18 = vadd.f32 %v2826_v46, %v2788_v31  ;;  %v2663_v5 = vmul.f32 %v6077_v45, %v6309_v50  ;;  %v2718_v60 = vmul.f32 %v6085_v15, %v6332_v41 }
 0x28b   : > { %v3244_v48 = vadd.f32 1.0, %v4346_v16  ;;  %v3214_v52 = vmul.f32 0.7978846, %v3198_v23  ;;  %v3058_v17 = vadd.f32 %v3042_v32, %v3003_v7  ;;  %v2773_v47 = vmul.f32 %v6091_v37, %v6339_v9  ;;  %v6460_v23 = vld [vmem:[#allocation2 + $0x210] sm:$0xff] }
 0x28c   : > { %v3167_v12 = vmul.f32 %v3151_v36, %v6411_v2  ;;  %v2895_v1 = vadd.f32 %v2879_v39, %v2842_v18  ;;  %v2734_v40 = vadd.f32 %v2718_v60, %v2663_v5  ;;  %v2827_v25 = vmul.f32 %v6097_v11, %v6371_v29  ;;  %v6469_v18 = vld [vmem:[#allocation2 + $0xf8] sm:$0xff] }
 0x28d   : > { %v3260_v24 = vmul.f32 0.5, %v3244_v48  ;;  %4349 = vtanh.f32 %v3214_v52  ;;  %v3113_v50 = vadd.f32 %v3097_v42, %v3058_v17  ;;  %v3043_v41 = vmul.f32 %v6114_v3, %v6422_v0 }
 0x28e   : > { %v3183_v51 = vmul.f32 0.044715, %v3167_v12  ;;  %v2950_v22 = vadd.f32 %v2934_v54, %v2895_v1  ;;  %v2789_v9 = vadd.f32 %v2773_v47, %v2734_v40  ;;  %v2880_v56 = vmul.f32 %v6099_v10, %v6392_v21 }
 0x28f   : > { %v3276_v28 = vmul.f32 %v3260_v24, %v6315_v63  ;;  %v6443_v30 = vadd.f32 %v6181_v26, %v3113_v50  ;;  %v3098_v19 = vmul.f32 %v6123_v33, %v6431_v49  ;;  %v2935_v14 = vmul.f32 %v6101_v62, %v6401_v44 }
 0x290   : > { %v3199_v38 = vadd.f32 %v3183_v51, %v6411_v2  ;;  %v3004_v32 = vadd.f32 %v2988_v13, %v2950_v22  ;;  %v2843_v61 = vadd.f32 %v2827_v25, %v2789_v9  ;;  %v2989_v35 = vmul.f32 %v6105_v58, %v6437_v8  ;;  %v6488_v9 = vld [vmem:[#allocation2 + $0x218] sm:$0xff] }
 0x291   : > { %v4348_v59 = vpop.eup %4347  ;;  %4013 = vmatprep.mubr.f32.mxu1 %v3276_v28  ;;  %v3152_v63 = vmul.f32 %v6443_v30, %v6443_v30  ;;  %v2664_v46 = vmul.f32 %v6077_v45, %v6341_v27  ;;  %v2719_v20 = vmul.f32 %v6085_v15, %v6360_v57  ;;  %v2774_v55 = vmul.f32 %v6091_v37, %v6369_v43  ;;  %v6467_v43 = vld [vmem:[#allocation2 + $0x330] sm:$0xff] }
 0x292   : > { %v3245_v42 = vadd.f32 1.0, %v4348_v59  ;;  %v3215_v53 = vmul.f32 0.7978846, %v3199_v38  ;;  %v3059_v31 = vadd.f32 %v3043_v41, %v3004_v32  ;;  %v2896_v39 = vadd.f32 %v2880_v56, %v2843_v61 }
 0x293   : > { %v3168_v7 = vmul.f32 %v3152_v63, %v6443_v30  ;;  %v3044_v54 = vmul.f32 %v6114_v3, %v6460_v23  ;;  %v2735_v13 = vadd.f32 %v2719_v20, %v2664_v46  ;;  %v2828_v27 = vmul.f32 %v6097_v11, %v6405_v4  ;;  %v2970_v63 = vld [vmem:[#allocation2 + $0x100] sm:$0xff] }
 0x294   : > { %v3261_v16 = vmul.f32 0.5, %v3245_v42  ;;  %4351 = vtanh.f32 %v3215_v53  ;;  %v3114_v57 = vadd.f32 %v3098_v19, %v3059_v31  ;;  %v2951_v36 = vadd.f32 %v2935_v14, %v2896_v39 }
 0x295   : > { %v3184_v5 = vmul.f32 0.044715, %v3168_v7  ;;  %v3099_v60 = vmul.f32 %v6123_v33, %v6467_v43  ;;  %v2790_v48 = vadd.f32 %v2774_v55, %v2735_v13  ;;  %v2881_v52 = vmul.f32 %v6099_v10, %v6422_v0 }
 0x296   : > { %v3277_v17 = vmul.f32 %v3261_v16, %v6349_v34  ;;  %v6477_v47 = vadd.f32 %v6181_v26, %v3114_v57  ;;  %v3005_v12 = vadd.f32 %v2989_v35, %v2951_v36  ;;  %v2936_v1 = vmul.f32 %v6101_v62, %v6431_v49  ;;  %v6497_v35 = vld [vmem:[#allocation2 + $0x338] sm:$0xff] }
 0x297   : > { %v4350_v40 = vpop.eup %4349  ;;  %v3200_v25 = vadd.f32 %v3184_v5, %v6443_v30  ;;  %v2844_v24 = vadd.f32 %v2828_v27, %v2790_v48  ;;  %v2990_v50 = vmul.f32 %v6105_v58, %v6469_v18  ;;  %v2665_v41 = vmul.f32 %v6077_v45, %v6371_v29  ;;  %v3080_v48 = vld [vmem:[#allocation2 + $0x340] sm:$0xff] }
 0x298   : > { %4014 = vmatmul.mubr.f32.gmra.mrb[20].mxu1 %v3277_v17  ;;  %v3246_v51 = vadd.f32 1.0, %v4350_v40  ;;  %v3153_v34 = vmul.f32 %v6477_v47, %v6477_v47  ;;  %v3060_v22 = vadd.f32 %v3044_v54, %v3005_v12  ;;  %v2720_v56 = vmul.f32 %v6085_v15, %v6392_v21 }
 0x299   : > { %v3216_v28 = vmul.f32 0.7978846, %v3200_v25  ;;  %v2897_v19 = vadd.f32 %v2881_v52, %v2844_v24  ;;  %v2775_v14 = vmul.f32 %v6091_v37, %v6401_v44  ;;  %v2829_v38 = vmul.f32 %v6097_v11, %v6437_v8 }
 0x29a   : > { %v3262_v29 = vmul.f32 0.5, %v3246_v51  ;;  %v3169_v32 = vmul.f32 %v3153_v34, %v6477_v47  ;;  %v3115_v61 = vadd.f32 %v3099_v60, %v3060_v22  ;;  %v2736_v59 = vadd.f32 %v2720_v56, %v2665_v41  ;;  %v3025_v60 = vld [vmem:[#allocation2 + $0x220] sm:$0xff]  ;;  %v2971_v51 = vld [vmem:[#allocation2 + $0x108] sm:$0xff] }
 0x29b   : > { %4353 = vtanh.f32 %v3216_v28  ;;  %v2952_v46 = vadd.f32 %v2936_v1, %v2897_v19  ;;  %v3045_v21 = vmul.f32 %v6114_v3, %v6488_v9  ;;  %v2882_v20 = vmul.f32 %v6099_v10, %v6460_v23 }
 0x29c   : > { %v3278_v44 = vmul.f32 %v3262_v29, %v6379_v6  ;;  %v3185_v55 = vmul.f32 0.044715, %v3169_v32  ;;  %v6505_v42 = vadd.f32 %v6181_v26, %v3115_v61  ;;  %v2791_v53 = vadd.f32 %v2775_v14, %v2736_v59 }
 0x29d   : > { %v3006_v31 = vadd.f32 %v2990_v50, %v2952_v46  ;;  %v3100_v39 = vmul.f32 %v6123_v33, %v6497_v35  ;;  %v2937_v7 = vmul.f32 %v6101_v62, %v6467_v43  ;;  %v2991_v54 = vmul.f32 %v6105_v58, %v2970_v63  ;;  %v3026_v46 = vld [vmem:[#allocation2 + $0x228] sm:$0xff] }
 0x29e   : > { %v4352_v13 = vpop.eup %4351  ;;  %4016 = vmatprep.mubr.f32.mxu1 %v3278_v44  ;;  %v3201_v27 = vadd.f32 %v3185_v55, %v6477_v47  ;;  %v3154_v6 = vmul.f32 %v6505_v42, %v6505_v42  ;;  %v2845_v16 = vadd.f32 %v2829_v38, %v2791_v53  ;;  %v2666_v57 = vmul.f32 %v6077_v45, %v6405_v4 }
 0x29f   : > { %v3247_v36 = vadd.f32 1.0, %v4352_v13  ;;  %v3061_v5 = vadd.f32 %v3045_v21, %v3006_v31  ;;  %v2721_v52 = vmul.f32 %v6085_v15, %v6422_v0  ;;  %v2776_v17 = vmul.f32 %v6091_v37, %v6431_v49 }
 0x2a0   : > { %v3217_v12 = vmul.f32 0.7978846, %v3201_v27  ;;  %v3170_v1 = vmul.f32 %v3154_v6, %v6505_v42  ;;  %v2898_v40 = vadd.f32 %v2882_v20, %v2845_v16  ;;  %v3046_v25 = vmul.f32 %v6114_v3, %v3025_v60 }
 0x2a1   : > { %v3263_v24 = vmul.f32 0.5, %v3247_v36  ;;  %v3116_v50 = vadd.f32 %v3100_v39, %v3061_v5  ;;  %v2737_v41 = vadd.f32 %v2721_v52, %v2666_v57  ;;  %v2830_v4 = vmul.f32 %v6097_v11, %v6469_v18  ;;  %v2972_v57 = vld [vmem:[#allocation2 + $0x110] sm:$0xff] }
 0x2a2   : > { %4355 = vtanh.f32 %v3217_v12  ;;  %v3186_v34 = vmul.f32 0.044715, %v3170_v1  ;;  %v2953_v22 = vadd.f32 %v2937_v7, %v2898_v40  ;;  %v3101_v0 = vmul.f32 %v6123_v33, %v3080_v48 }
 0x2a3   : > { %v3279_v49 = vmul.f32 %v3263_v24, %v6411_v2  ;;  %v6528_v56 = vadd.f32 %v6181_v26, %v3116_v50  ;;  %v2792_v28 = vadd.f32 %v2776_v17, %v2737_v41  ;;  %v2883_v19 = vmul.f32 %v6099_v10, %v6488_v9 }
 0x2a4   : > { %v3202_v14 = vadd.f32 %v3186_v34, %v6505_v42  ;;  %v3007_v38 = vadd.f32 %v2991_v54, %v2953_v22  ;;  %v2938_v29 = vmul.f32 %v6101_v62, %v6497_v35  ;;  %v2992_v32 = vmul.f32 %v6105_v58, %v2971_v51  ;;  %v3081_v54 = vld [vmem:[#allocation2 + $0x348] sm:$0xff] }
 0x2a5   : > { %v4354_v61 = vpop.eup %4353  ;;  %4017 = vmatmul.mubr.f32.gmra.mrb[22].mxu1 %v3279_v49  ;;  %v3155_v2 = vmul.f32 %v6528_v56, %v6528_v56  ;;  %v2846_v59 = vadd.f32 %v2830_v4, %v2792_v28  ;;  %v2667_v21 = vmul.f32 %v6077_v45, %v6437_v8  ;;  %v2722_v20 = vmul.f32 %v6085_v15, %v6460_v23  ;;  %v4379_v28 = vld [vmem:[#allocation2] sm:$0xff] }
 0x2a6   : > { %v3248_v44 = vadd.f32 1.0, %v4354_v61  ;;  %v3218_v55 = vmul.f32 0.7978846, %v3202_v14  ;;  %v3062_v53 = vadd.f32 %v3046_v25, %v3007_v38  ;;  %v2777_v31 = vmul.f32 %v6091_v37, %v6467_v43 }
 0x2a7   : > { %v3171_v39 = vmul.f32 %v3155_v2, %v6528_v56  ;;  %v2899_v7 = vadd.f32 %v2883_v19, %v2846_v59  ;;  %v2738_v13 = vadd.f32 %v2722_v20, %v2667_v21  ;;  %v2831_v27 = vmul.f32 %v6097_v11, %v2970_v63 }
 0x2a8   : > { %v3264_v6 = vmul.f32 0.5, %v3248_v44  ;;  %4357 = vtanh.f32 %v3218_v55  ;;  %v3117_v16 = vadd.f32 %v3101_v0, %v3062_v53  ;;  %v3047_v8 = vmul.f32 %v6114_v3, %v3026_v46 }
 0x2a9   : > { %v3187_v23 = vmul.f32 0.044715, %v3171_v39  ;;  %v2954_v36 = vadd.f32 %v2938_v29, %v2899_v7  ;;  %v2793_v5 = vadd.f32 %v2777_v31, %v2738_v13  ;;  %v2884_v52 = vmul.f32 %v6099_v10, %v3025_v60 }
 0x2aa   : > { %v3280_v43 = vmul.f32 %v3264_v6, %v6443_v30  ;;  %v6550_v17 = vadd.f32 %v6181_v26, %v3117_v16  ;;  %v3102_v12 = vmul.f32 %v6123_v33, %v3081_v54  ;;  %v2939_v63 = vmul.f32 %v6101_v62, %v3080_v48 }
 0x2ab   : > { %v3203_v1 = vadd.f32 %v3187_v23, %v6528_v56  ;;  %v3008_v40 = vadd.f32 %v2992_v32, %v2954_v36  ;;  %v2847_v25 = vadd.f32 %v2831_v27, %v2793_v5  ;;  %v2993_v24 = vmul.f32 %v6105_v58, %v2972_v57 }
 0x2ac   : > { %v4356_v50 = vpop.eup %4355  ;;  %4019 = vmatprep.mubr.f32.mxu1 %v3280_v43  ;;  %v3156_v60 = vmul.f32 %v6550_v17, %v6550_v17  ;;  %v2668_v30 = vmul.f32 %v6077_v45, %v6469_v18  ;;  %v2723_v41 = vmul.f32 %v6085_v15, %v6488_v9  ;;  %v2778_v48 = vmul.f32 %v6091_v37, %v6497_v35 }
 0x2ad   : > { %v3249_v4 = vadd.f32 1.0, %v4356_v50  ;;  %v3219_v34 = vmul.f32 0.7978846, %v3203_v1  ;;  %v3063_v22 = vadd.f32 %v3047_v8, %v3008_v40  ;;  %v2900_v0 = vadd.f32 %v2884_v52, %v2847_v25 }
 0x2ae   : > { %v3172_v49 = vmul.f32 %v3156_v60, %v6550_v17  ;;  %v3048_v19 = vmul.f32 %v4379_v28, %v6114_v3  ;;  %v2739_v14 = vadd.f32 %v2723_v41, %v2668_v30  ;;  %v2832_v38 = vmul.f32 %v6097_v11, %v2971_v51 }
 0x2af   : > { %v3265_v29 = vmul.f32 0.5, %v3249_v4  ;;  %4359 = vtanh.f32 %v3219_v34  ;;  %v3118_v45 = vadd.f32 %v3102_v12, %v3063_v22  ;;  %v2955_v18 = vadd.f32 %v2939_v63, %v2900_v0 }
 0x2b0   : > { %v3188_v15 = vmul.f32 0.044715, %v3172_v49  ;;  %v2794_v9 = vadd.f32 %v2778_v48, %v2739_v14  ;;  %v2885_v37 = vmul.f32 %v6099_v10, %v3026_v46  ;;  %v3103_v2 = vmul.f32 %v4379_v28, %v6123_v33 }
 0x2b1   : > { %v3281_v35 = vmul.f32 %v3265_v29, %v6477_v47  ;;  %v3141_v32 = vadd.f32 %v6181_v26, %v3118_v45  ;;  %v3009_v61 = vadd.f32 %v2993_v24, %v2955_v18  ;;  %v2940_v53 = vmul.f32 %v6101_v62, %v3081_v54 }
 0x2b2   : > { %v4358_v59 = vpop.eup %4357  ;;  %v3204_v3 = vadd.f32 %v3188_v15, %v6550_v17  ;;  %v2848_v21 = vadd.f32 %v2832_v38, %v2794_v9  ;;  %v2994_v10 = vmul.f32 %v4379_v28, %v6105_v58 }
 0x2b3   : > { %4020 = vmatmul.mubr.f32.gmra.mrb[24].mxu1 %v3281_v35  ;;  %v3250_v11 = vadd.f32 1.0, %v4358_v59  ;;  %v3157_v51 = vmul.f32 %v3141_v32, %v3141_v32  ;;  %v3064_v20 = vadd.f32 %v3048_v19, %v3009_v61 }
 0x2b4   : > { %v3220_v44 = vmul.f32 0.7978846, %v3204_v3  ;;  %v2901_v55 = vadd.f32 %v2885_v37, %v2848_v21 }
 0x2b5   : > { %v3266_v47 = vmul.f32 0.5, %v3250_v11  ;;  %v3173_v46 = vmul.f32 %v3157_v51, %v3141_v32  ;;  %v3119_v31 = vadd.f32 %v3103_v2, %v3064_v20 }
 0x2b6   : > { %4361 = vtanh.f32 %v3220_v44  ;;  %v2956_v39 = vadd.f32 %v2940_v53, %v2901_v55 }
 0x2b7   : > { %v3282_v33 = vmul.f32 %v3266_v47, %v6505_v42  ;;  %v3189_v7 = vmul.f32 0.044715, %v3173_v46  ;;  %v3142_v13 = vadd.f32 %v6181_v26, %v3119_v31 }
 0x2b8   : > { %v3010_v27 = vadd.f32 %v2994_v10, %v2956_v39 }
 0x2b9   : > { %v4360_v6 = vpop.eup %4359  ;;  %4022 = vmatprep.mubr.f32.mxu1 %v3282_v33  ;;  %v3205_v16 = vadd.f32 %v3189_v7, %v3141_v32  ;;  %v3158_v8 = vmul.f32 %v3142_v13, %v3142_v13 }
 0x2ba   : > { %v3251_v57 = vadd.f32 1.0, %v4360_v6  ;;  %v3065_v23 = vadd.f32 %v3048_v19, %v3010_v27 }
 0x2bb   : > { %v3221_v62 = vmul.f32 0.7978846, %v3205_v16  ;;  %v3174_v54 = vmul.f32 %v3158_v8, %v3142_v13 }
 0x2bc   : > { %v3267_v58 = vmul.f32 0.5, %v3251_v57  ;;  %v3120_v36 = vadd.f32 %v3103_v2, %v3065_v23 }
 0x2bd   : > { %4363 = vtanh.f32 %v3221_v62  ;;  %v3190_v5 = vmul.f32 0.044715, %v3174_v54 }
 0x2be   : > { %v3283_v52 = vmul.f32 %v3267_v58, %v6528_v56  ;;  %v3143_v42 = vadd.f32 %v6181_v26, %v3120_v36 }
 0x2bf   : > { %v3206_v43 = vadd.f32 %v3190_v5, %v3142_v13 }
 0x2c0   : > { %v4362_v12 = vpop.eup %4361  ;;  %4023 = vmatmul.mubr.f32.gmra.mrb[26].mxu1 %v3283_v52  ;;  %v3159_v63 = vmul.f32 %v3143_v42, %v3143_v42 }
 0x2c1   : > { %v3252_v1 = vadd.f32 1.0, %v4362_v12  ;;  %v3222_v40 = vmul.f32 0.7978846, %v3206_v43 }
 0x2c2   : > { %v3175_v25 = vmul.f32 %v3159_v63, %v3143_v42 }
 0x2c3   : > { %v3268_v24 = vmul.f32 0.5, %v3252_v1  ;;  %4365 = vtanh.f32 %v3222_v40 }
 0x2c4   : > { %v3191_v50 = vmul.f32 0.044715, %v3175_v25 }
 0x2c5   : > { %v3284_v60 = vmul.f32 %v3268_v24, %v6550_v17  ;;  %v6582_v17 = vld [vmem:[%s6709_s6] ss:$0 sm:$0xff] }
 0x2c6   : > { %v3207_v30 = vadd.f32 %v3191_v50, %v3143_v42 }
 0x2c7   : > { %v4364_v41 = vpop.eup %4363  ;;  %4025 = vmatprep.mubr.f32.mxu1 %v3284_v60 }
 0x2c8   : > { %v3253_v48 = vadd.f32 1.0, %v4364_v41  ;;  %v3223_v4 = vmul.f32 0.7978846, %v3207_v30 }
 0x2ca   : > { %v3269_v56 = vmul.f32 0.5, %v3253_v48  ;;  %4367 = vtanh.f32 %v3223_v4 }
 0x2cc   : > { %v3285_v26 = vmul.f32 %v3269_v56, %v3141_v32 }
 0x2cd   : > { %v4366_v34 = vpop.eup %4365 }
 0x2ce   : > { %4026 = vmatmul.mubr.f32.gmra.mrb[28].mxu1 %v3285_v26  ;;  %v3254_v22 = vadd.f32 1.0, %v4366_v34 }
 0x2d0   : > { %v3270_v0 = vmul.f32 0.5, %v3254_v22 }
 0x2d2   : > { %v3286_v49 = vmul.f32 %v3270_v0, %v3142_v13 }
 0x2d4   : > { %v4368_v28 = vpop.eup %4367  ;;  %4028 = vmatprep.mubr.f32.mxu1 %v3286_v49 }
 0x2d5   : > { %v3255_v19 = vadd.f32 1.0, %v4368_v28 }
 0x2d7   : > { %v3271_v14 = vmul.f32 0.5, %v3255_v19 }
 0x2d9   : > { %v3287_v38 = vmul.f32 %v3271_v14, %v3143_v42 }
 0x2db   : > { %4029 = vmatmul.mubr.f32.gmra.mrb[30].mxu1 %v3287_v38 }
 0x2e2   : > { %v3953_v29 = vpop.f32.mrb[16].mxu0 }
 0x2e3   : > { %v2542_v45 = vadd.f32 %v3953_v29, %v6582_v17  ;;  %v2536_v18 = vpop.f32.mrb[17].mxu0 }
 0x2e4   : > { %v2537_v15 = vadd.f32 %v6582_v17, %v2536_v18 }
 0x2e5   : > { %2616 = vst [vmem:[%s6588_s29 + $0x8] sm:$0xff] %v2542_v45 }
 0x2e6   : > { %2615 = vst [vmem:[%s6588_s29] sm:$0xff] %v2537_v15 }
 0x2f3   : > { %v3956_v9 = vpop.f32.mrb[18].mxu0 }
 0x2f4   : > { %v2552_v37 = vadd.f32 %v3956_v9, %v6582_v17  ;;  %v2546_v35 = vpop.f32.mrb[19].mxu0 }
 0x2f5   : > { %v2547_v32 = vadd.f32 %v6582_v17, %v2546_v35 }
 0x2f6   : > { %2618 = vst [vmem:[%s6588_s29 + $0x18] sm:$0xff] %v2552_v37 }
 0x2f7   : > { %2617 = vst [vmem:[%s6588_s29 + $0x10] sm:$0xff] %v2547_v32 }
 0x2fe   : > { %v3959_v61 = vpop.f32.mrb[20].mxu0 }
 0x2ff   : > { %v2562_v2 = vadd.f32 %v3959_v61, %v6582_v17  ;;  %v2556_v59 = vpop.f32.mrb[21].mxu0 }
 0x300   : > { %v2557_v3 = vadd.f32 %v6582_v17, %v2556_v59 }
 0x301   : > { %2620 = vst [vmem:[%s6588_s29 + $0x28] sm:$0xff] %v2562_v2 }
 0x302   : > { %2619 = vst [vmem:[%s6588_s29 + $0x20] sm:$0xff] %v2557_v3 }
 0x30c   : > { %v3962_v21 = vpop.f32.mrb[22].mxu0 }
 0x30d   : > { %v2572_v11 = vadd.f32 %v3962_v21, %v6582_v17  ;;  %v2566_v51 = vpop.f32.mrb[23].mxu0 }
 0x30e   : > { %v2567_v20 = vadd.f32 %v6582_v17, %v2566_v51 }
 0x30f   : > { %2622 = vst [vmem:[%s6588_s29 + $0x38] sm:$0xff] %v2572_v11 }
 0x310   : > { %2621 = vst [vmem:[%s6588_s29 + $0x30] sm:$0xff] %v2567_v20 }
 0x319   : > { %v3965_v44 = vpop.f32.mrb[24].mxu0 }
 0x31a   : > { %v2582_v55 = vadd.f32 %v3965_v44, %v6582_v17  ;;  %v2576_v53 = vpop.f32.mrb[25].mxu0 }
 0x31b   : > { %v2577_v10 = vadd.f32 %v6582_v17, %v2576_v53 }
 0x31c   : > { %2624 = vst [vmem:[%s6588_s29 + $0x48] sm:$0xff] %v2582_v55 }
 0x31d   : > { %2623 = vst [vmem:[%s6588_s29 + $0x40] sm:$0xff] %v2577_v10 }
 0x327   : > { %v3968_v47 = vpop.f32.mrb[26].mxu0 }
 0x328   : > { %v2592_v46 = vadd.f32 %v3968_v47, %v6582_v17  ;;  %v2586_v31 = vpop.f32.mrb[27].mxu0 }
 0x329   : > { %v2587_v39 = vadd.f32 %v6582_v17, %v2586_v31 }
 0x32a   : > { %2626 = vst [vmem:[%s6588_s29 + $0x58] sm:$0xff] %v2592_v46 }
 0x32b   : > { %2625 = vst [vmem:[%s6588_s29 + $0x50] sm:$0xff] %v2587_v39 }
 0x334   : > { %v3971_v33 = vpop.f32.mrb[28].mxu0 }
 0x335   : > { %v2602_v7 = vadd.f32 %v3971_v33, %v6582_v17  ;;  %v2596_v13 = vpop.f32.mrb[29].mxu0 }
 0x336   : > { %v2597_v27 = vadd.f32 %v6582_v17, %v2596_v13 }
 0x337   : > { %2628 = vst [vmem:[%s6588_s29 + $0x68] sm:$0xff] %v2602_v7 }
 0x338   : > { %2627 = vst [vmem:[%s6588_s29 + $0x60] sm:$0xff] %v2597_v27 }
 0x343   : > { %v3974_v6 = vpop.f32.mrb[30].mxu0 }
 0x344   : > { %v2612_v16 = vadd.f32 %v3974_v6, %v6582_v17  ;;  %v2606_v8 = vpop.f32.mrb[31].mxu0 }
 0x345   : > { %v2607_v57 = vadd.f32 %v6582_v17, %v2606_v8 }
 0x346   : > { %2630 = vst [vmem:[%s6588_s29 + $0x78] sm:$0xff] %v2612_v16 }
 0x347   : > { %2629 = vst [vmem:[%s6588_s29 + $0x70] sm:$0xff] %v2607_v57 }
 0x350   : > { %v4009_v23 = vpop.f32.mrb[16].mxu1 }
 0x351   : > { %v3383_v62 = vadd.f32 %v4009_v23, %v6582_v17  ;;  %v3377_v54 = vpop.f32.mrb[17].mxu1 }
 0x352   : > { %v3378_v58 = vadd.f32 %v6582_v17, %v3377_v54 }
 0x353   : > { %3657 = vst [vmem:[%s6588_s29 + $0x88] sm:$0xff] %v3383_v62 }
 0x354   : > { %3656 = vst [vmem:[%s6588_s29 + $0x80] sm:$0xff] %v3378_v58 }
 0x35d   : > { %v4012_v36 = vpop.f32.mrb[18].mxu1 }
 0x35e   : > { %v3393_v5 = vadd.f32 %v4012_v36, %v6582_v17  ;;  %v3387_v52 = vpop.f32.mrb[19].mxu1 }
 0x35f   : > { %v3388_v42 = vadd.f32 %v6582_v17, %v3387_v52 }
 0x360   : > { %3659 = vst [vmem:[%s6588_s29 + $0x98] sm:$0xff] %v3393_v5 }
 0x361   : > { %3658 = vst [vmem:[%s6588_s29 + $0x90] sm:$0xff] %v3388_v42 }
 0x36b   : > { %v4015_v43 = vpop.f32.mrb[20].mxu1 }
 0x36c   : > { %v3403_v12 = vadd.f32 %v4015_v43, %v6582_v17  ;;  %v3397_v63 = vpop.f32.mrb[21].mxu1 }
 0x36d   : > { %v3398_v1 = vadd.f32 %v6582_v17, %v3397_v63 }
 0x36e   : > { %3661 = vst [vmem:[%s6588_s29 + $0xa8] sm:$0xff] %v3403_v12 }
 0x36f   : > { %3660 = vst [vmem:[%s6588_s29 + $0xa0] sm:$0xff] %v3398_v1 }
 0x378   : > { %v4018_v40 = vpop.f32.mrb[22].mxu1 }
 0x379   : > { %v3413_v25 = vadd.f32 %v4018_v40, %v6582_v17  ;;  %v3407_v24 = vpop.f32.mrb[23].mxu1 }
 0x37a   : > { %v3408_v50 = vadd.f32 %v6582_v17, %v3407_v24 }
 0x37b   : > { %3663 = vst [vmem:[%s6588_s29 + $0xb8] sm:$0xff] %v3413_v25 }
 0x37c   : > { %3662 = vst [vmem:[%s6588_s29 + $0xb0] sm:$0xff] %v3408_v50 }
 0x386   : > { %v4021_v60 = vpop.f32.mrb[24].mxu1 }
 0x387   : > { %v3423_v30 = vadd.f32 %v4021_v60, %v6582_v17  ;;  %v3417_v41 = vpop.f32.mrb[25].mxu1 }
 0x388   : > { %v3418_v48 = vadd.f32 %v6582_v17, %v3417_v41 }
 0x389   : > { %3665 = vst [vmem:[%s6588_s29 + $0xc8] sm:$0xff] %v3423_v30 }
 0x38a   : > { %3664 = vst [vmem:[%s6588_s29 + $0xc0] sm:$0xff] %v3418_v48 }
 0x393   : > { %v4024_v4 = vpop.f32.mrb[26].mxu1 }
 0x394   : > { %v3433_v56 = vadd.f32 %v4024_v4, %v6582_v17  ;;  %v3427_v26 = vpop.f32.mrb[27].mxu1 }
 0x395   : > { %v3428_v34 = vadd.f32 %v6582_v17, %v3427_v26 }
 0x396   : > { %3667 = vst [vmem:[%s6588_s29 + $0xd8] sm:$0xff] %v3433_v56 }
 0x397   : > { %3666 = vst [vmem:[%s6588_s29 + $0xd0] sm:$0xff] %v3428_v34 }
 0x3a1   : > { %v4027_v22 = vpop.f32.mrb[28].mxu1 }
 0x3a2   : > { %v3443_v0 = vadd.f32 %v4027_v22, %v6582_v17  ;;  %v3437_v49 = vpop.f32.mrb[29].mxu1 }
 0x3a3   : > { %v3438_v28 = vadd.f32 %v6582_v17, %v3437_v49 }
 0x3a4   : > { %3669 = vst [vmem:[%s6588_s29 + $0xe8] sm:$0xff] %v3443_v0 }
 0x3a5   : > { %3668 = vst [vmem:[%s6588_s29 + $0xe0] sm:$0xff] %v3438_v28 }
 0x3ae   : > { %v4030_v19 = vpop.f32.mrb[30].mxu1 }
 0x3af   : > { %v3453_v14 = vadd.f32 %v4030_v19, %v6582_v17  ;;  %v3447_v38 = vpop.f32.mrb[31].mxu1 }
 0x3b0   : > { %v3448_v29 = vadd.f32 %v6582_v17, %v3447_v38 }
 0x3b1   : > { %3671 = vst [vmem:[%s6588_s29 + $0xf8] sm:$0xff] %v3453_v14 }
 0x3b2   : > { %3670 = vst [vmem:[%s6588_s29 + $0xf0] sm:$0xff] %v3448_v29 }
 0x3b3   : > { %4507 = shalt.err (!%p4504_p4)
}
 0x3b4   : > { %s4508_s12 = scalar_lea.hbm %s6654_s9, 4096  ;;  %s4512_s16 = scalar_lea.hbm %s6710_s7, 8192 }
 0x3b5   : > { %p4509_p9 = scmp.ne.s32.totalorder %s6654_s9, %s4508_s12  ;;  %p4513_p8 = scmp.lt.u32.totalorder %s6654_s9, %s6710_s7 }
 0x3b6   : > { %p4514_p13 = scmp.lt.u32.totalorder %s4512_s16, %s4508_s12  ;;  %p4516_p10 = scmp.lt.u32.totalorder %s4508_s12, %s6654_s9 }
 0x3b7   : > { %p4510_p0 = pnand %p4509_p9, %p4774_p5 }
 0x3b8   : > { %p4515_p6 = por %p4514_p13, %p4513_p8 }
 0x3b9   : > { %p4511_p11 = pneg %p4510_p0 }
 0x3ba   : > { %p4517_p3 = por %p4516_p10, %p4515_p6 }
 0x3bc   : > { %p4518_p7 = pnand %p4517_p3, %p4511_p11 }
 0x3be   : > { %4521 = shalt.err (!%p4518_p7)
}
 0x3bf   : > { %s4578_s8 = smov 128   ;;  %s4579_s30 = smov 8  }
 0x3c0   : > { %4173 = dma.vmem_to_hbm [thread:$0]  (%p4774_p5), %s6656_s11, 4096, %s6654_s9, %s3474_s28, %s4578_s8, %s4578_s8, %s4579_s30  }
 0x3c1 PF: > { %s6892_s13 = sld [smem:[#allocation16_spill]]  ;;  %s3502_s15 = sand.u32 1, %s4556_s24  }
 0x3c2   : > { %p6894_p1 = scmp.ge.s32.totalorder %s4568_s27, 2  ;;  %s3503_s10 = scalar_lea.sflag [#allocation5], %s3502_s15 }
 0x3c7   : > { %p6893_p12 = scmp.ne.s32.totalorder %s6892_s13, 0 }
 0x3c9   : > { %p4190_p2 = pnand %p6894_p1, %p6893_p12 }
 0x3cb   : > { %4551 = dma.done.wait (!%p4190_p2), %s3503_s10, 4096  }
 0x3cc   : > { %4553 = vsyncadd (!%p4190_p2), %s3503_s10, 4294963200  ;;  %p22_p4 = scmp.ge.s32.totalorder %s4760_s22, 4   ;;  %s6895_s24 = smov %s4560_s25 }
 0x3cd   : > { %s6896_s25 = smov %s4564_s26  ;;  %s6897_s26 = smov %s4770_s18 }
 0x3ce   : > { %s6898_s27 = smov %s4760_s22  ;;  %24 = sbr.rel (!%p22_p4) target bundleno = 7 (0x7), region = 126 }
 0x3d5   :  { %3508 = vsyncpa [#allocation4], 1 }
 0x3d6   :  { %3510 = vsyncpa [#allocation4 + $0x1], 1 }
 0x3d7   :  { %3511 = vsyncpa [#allocation7], 1 }
 0x3d8   :  { %3512 = vsyncpa [#allocation10], 1 }
 0x3d9   :  { %3513 = vsyncpa [#allocation5], 1 }
 0x3da   :  { %3515 = vsyncpa [#allocation5 + $0x1], 1 }

</bundles_post_ra>
